<compile_context>
chip_gen: v6e
topology: v6e:2x2x1
jax: 0.10.0
libtpu: 0.0.40
codegen_flags: <defaults>
</compile_context>

<pallas_src>
import math

import jax
import jax.numpy as jnp
from jax import lax
from jax.experimental import pallas as pl
from jax.experimental.pallas import tpu as pltpu

# ---------------- small, deterministic "LlamaConfig" -------------------------
VOCAB = 256
HIDDEN = 64
INTERMEDIATE = 128
N_HEADS = 4
N_KV_HEADS = 2                       # GQA, like Llama-3.2-1B
HEAD_DIM = HIDDEN // N_HEADS         # 16
N_DECODER_LAYERS = 2                 # decoder layers inside each LlamaForCausalLM
NUM_STACK = 2                        # StackedLlamaModule(num_layers=...) (6 in reference)
RMS_EPS = 1e-6
ROPE_THETA = 10000.0
NEG_INF = -1e30

REP = N_HEADS // N_KV_HEADS
Q_WIDTH = N_HEADS * HEAD_DIM         # 64
KV_WIDTH = N_KV_HEADS * HEAD_DIM     # 32
QKV_WIDTH = Q_WIDTH + 2 * KV_WIDTH   # 128  (lane dense)
GU_WIDTH = 2 * INTERMEDIATE          # 256  (lane dense)


# ------------------------- in-kernel helpers (f32 / bf16) ---------------------
def _rms(x, w):
    var = jnp.mean(x * x, axis=-1, keepdims=True)
    return (x * lax.rsqrt(var + RMS_EPS)) * w


def _mxu_dot(a, b):
    # a @ b with bf16 MXU operands (no-op cast for pre-cast bf16 weights), f32 accumulation.
    return jnp.dot(a.astype(jnp.bfloat16), b.astype(jnp.bfloat16),
                   preferred_element_type=jnp.float32)


def _mxu_nt(a, b):
    # a @ b.T (contract last dims) without materializing a transpose.
    return lax.dot_general(a.astype(jnp.bfloat16), b.astype(jnp.bfloat16),
                           (((1,), (1,)), ((), ())),
                           preferred_element_type=jnp.float32)


def _rope(x, cos, sin):
    # rotate_half in-kernel; concat of two 8-lane halves (HEAD_DIM=16 < vreg lane width).
    h = x.shape[-1] // 2
    rot = jnp.concatenate([-x[:, h:], x[:, :h]], axis=-1)
    return x * cos + rot * sin


# ------------------------ fused whole-model Pallas kernel ----------------------
def _make_model_kernel(n_layers, seq_len, has_pad, return_logits):
    scale = 1.0 / math.sqrt(HEAD_DIM)
    S = seq_len

    def kernel(*refs):
        it = iter(refs)
        h_ref = next(it)
        pad_ref = next(it) if has_pad else None
        cos_ref = next(it)
        sin_ref = next(it)
        ln1_ref = next(it)
        wqkv_ref = next(it)
        wo_ref = next(it)
        ln2_ref = next(it)
        wgu_ref = next(it)
        wd_ref = next(it)
        fln_ref = next(it)
        emb_ref = next(it)
        out_ref = next(it)

        h = h_ref[0]                                   # (S, HIDDEN) f32 residual stream
        cos = cos_ref[...]
        sin = sin_ref[...]

        # causal mask built in-kernel (2-D iota); fold key-padding mask in at trace time
        row = lax.broadcasted_iota(jnp.int32, (S, S), 0)
        col = lax.broadcasted_iota(jnp.int32, (S, S), 1)
        allowed = row >= col
        if has_pad:
            allowed = jnp.logical_and(allowed, pad_ref[0] > 0.5)   # (1, S) broadcast

        for l in range(n_layers):                      # fully unrolled decoder stack
            # --- self-attention block ---
            hn = _rms(h, ln1_ref[l])
            qkv = _mxu_dot(hn, wqkv_ref[l])            # (S, 128) fused [q|k|v]
            q = qkv[:, :Q_WIDTH]
            k = qkv[:, Q_WIDTH:Q_WIDTH + KV_WIDTH]
            v = qkv[:, Q_WIDTH + KV_WIDTH:]
            k_rot = [_rope(k[:, j * HEAD_DIM:(j + 1) * HEAD_DIM], cos, sin)
                     for j in range(N_KV_HEADS)]
            v_h = [v[:, j * HEAD_DIM:(j + 1) * HEAD_DIM] for j in range(N_KV_HEADS)]
            heads = []
            for hq in range(N_HEADS):
                j = hq // REP                          # GQA: shared K/V head, no repeat
                qh = _rope(q[:, hq * HEAD_DIM:(hq + 1) * HEAD_DIM], cos, sin)
                s = _mxu_nt(qh, k_rot[j]) * scale      # (S, S) f32
                s = jnp.where(allowed, s, NEG_INF)
                m = jnp.max(s, axis=-1, keepdims=True)
                p = jnp.exp(s - m)
                p = p * pl.reciprocal(jnp.sum(p, axis=-1, keepdims=True), approx=True)
                heads.append(_mxu_dot(p, v_h[j]))      # (S, HEAD_DIM)
            attn = jnp.concatenate(heads, axis=-1)     # (S, 64) lane-dense, stays in vregs
            h = h + _mxu_dot(attn, wo_ref[l])          # o_proj + residual

            # --- MLP block ---
            hn2 = _rms(h, ln2_ref[l])
            gu = _mxu_dot(hn2, wgu_ref[l])             # (S, 256) fused [gate|up]
            g = gu[:, :INTERMEDIATE]
            u = gu[:, INTERMEDIATE:]
            act = g * jax.nn.sigmoid(g) * u            # SwiGLU
            h = h + _mxu_dot(act, wd_ref[l])           # down_proj + residual

        # --- head: final rmsnorm + tied lm_head (no embed.T copy) ---
        hn = _rms(h, fln_ref[...])
        logits = _mxu_nt(hn, emb_ref[...])             # (S, VOCAB) f32
        if return_logits:
            out_ref[0] = logits
        else:
            mx = jnp.max(logits, axis=-1, keepdims=True)
            cid = lax.broadcasted_iota(jnp.int32, logits.shape, 1)
            out_ref[0] = jnp.min(jnp.where(logits >= mx, cid, VOCAB),
                                 axis=-1, keepdims=True).astype(jnp.int32)

    return kernel


# ------------------------------ glue (plain JAX) ------------------------------
def rope_cache(S, D):
    inv_freq = 1.0 / (ROPE_THETA ** (jnp.arange(0, D, 2, dtype=jnp.float32) / D))
    t = jnp.arange(S, dtype=jnp.float32)
    freqs = jnp.outer(t, inv_freq)                       # (S, D/2)
    emb = jnp.concatenate([freqs, freqs], axis=-1)       # (S, D)
    return jnp.cos(emb), jnp.sin(emb)


def llama_forward(params, input_ids, attention_mask=None, return_logits=True):
    """One LlamaForCausalLM forward as a single fused pallas_call with grid=(B,).
    Returns (B,S,VOCAB) f32 logits, or (B,S) int32 greedy token ids when
    return_logits=False (used for intermediate stack members)."""
    B, S = input_ids.shape
    L = N_DECODER_LAYERS
    h0 = jnp.take(params['embed'], input_ids, axis=0)        # (B, S, HIDDEN) f32
    cos, sin = rope_cache(S, HEAD_DIM)
    has_pad = attention_mask is not None

    inputs = [h0]
    in_specs = [pl.BlockSpec((1, S, HIDDEN), lambda b: (b, 0, 0))]
    if has_pad:
        pad = (attention_mask > 0).astype(jnp.float32).reshape(B, 1, S)
        inputs.append(pad)
        in_specs.append(pl.BlockSpec((1, 1, S), lambda b: (b, 0, 0)))

    const3 = lambda b: (0, 0, 0)
    const2 = lambda b: (0, 0)
    inputs += [cos, sin,
               params['ln1'], params['wqkv'], params['wo'],
               params['ln2'], params['wgu'], params['wd'],
               params['final_norm'], params['embed_bf16']]
    in_specs += [pl.BlockSpec((S, HEAD_DIM), const2),
                 pl.BlockSpec((S, HEAD_DIM), const2),
                 pl.BlockSpec((L, 1, HIDDEN), const3),
                 pl.BlockSpec((L, HIDDEN, QKV_WIDTH), const3),
                 pl.BlockSpec((L, Q_WIDTH, HIDDEN), const3),
                 pl.BlockSpec((L, 1, HIDDEN), const3),
                 pl.BlockSpec((L, HIDDEN, GU_WIDTH), const3),
                 pl.BlockSpec((L, INTERMEDIATE, HIDDEN), const3),
                 pl.BlockSpec((1, HIDDEN), const2),
                 pl.BlockSpec((VOCAB, HIDDEN), const2)]

    if return_logits:
        out_shape = jax.ShapeDtypeStruct((B, S, VOCAB), jnp.float32)
        out_spec = pl.BlockSpec((1, S, VOCAB), lambda b: (b, 0, 0))
    else:
        out_shape = jax.ShapeDtypeStruct((B, S, 1), jnp.int32)
        out_spec = pl.BlockSpec((1, S, 1), lambda b: (b, 0, 0))

    kernel = _make_model_kernel(L, S, has_pad, return_logits)
    out = pl.pallas_call(
        kernel,
        out_shape=out_shape,
        grid=(B,),
        in_specs=in_specs,
        out_specs=out_spec,
        compiler_params=pltpu.CompilerParams(dimension_semantics=("parallel",)),
    )(*inputs)

    if return_logits:
        return out
    return out.reshape(B, S)


def stacked_forward(stack_params, input_ids, attention_mask=None):
    """StackedLlamaModule.forward: feed each model's output into the next model."""
    x = input_ids
    n = len(stack_params)
    out = None
    for idx, params in enumerate(stack_params):
        last = (idx == n - 1)
        out = llama_forward(params, x, attention_mask, return_logits=last)
        if not last:
            # TODO(synk): the reference PyTorch passes float logits directly as `input_ids`
            # to the next LlamaForCausalLM (invalid for an embedding lookup); here the argmax
            # over vocab is fused into the head so full logits never hit HBM between members.
            x = out
    return out                                              # last model's logits


# ------------------------------ parameter init --------------------------------
def init_llama_params(key):
    keys = jax.random.split(key, 5)
    L = N_DECODER_LAYERS

    def w(k, shape, scale=0.02):
        return scale * jax.random.normal(k, shape, jnp.float32)

    embed = w(keys[0], (VOCAB, HIDDEN))
    return {
        'embed': embed,                                      # f32, embedding gather
        'embed_bf16': embed.astype(jnp.bfloat16),            # tied lm_head MXU operand
        'final_norm': jnp.ones((1, HIDDEN), jnp.float32),
        'ln1': jnp.ones((L, 1, HIDDEN), jnp.float32),
        'ln2': jnp.ones((L, 1, HIDDEN), jnp.float32),
        # matmul weights pre-cast to bf16 once (halves HBM bytes, no per-step casts)
        'wqkv': w(keys[1], (L, HIDDEN, QKV_WIDTH)).astype(jnp.bfloat16),   # fused [q|k|v]
        'wo':   w(keys[2], (L, Q_WIDTH, HIDDEN)).astype(jnp.bfloat16),
        'wgu':  w(keys[3], (L, HIDDEN, GU_WIDTH)).astype(jnp.bfloat16),    # fused [gate|up]
        'wd':   w(keys[4], (L, INTERMEDIATE, HIDDEN)).astype(jnp.bfloat16),
    }


# ----------------------------------- main --------------------------------------
if __name__ == "__main__":
    key = jax.random.PRNGKey(0)
    pkey, ikey = jax.random.split(key)
    stack_params = [init_llama_params(k) for k in jax.random.split(pkey, NUM_STACK)]

    B, S = 2, 8
    input_ids = jax.random.randint(ikey, (B, S), 0, VOCAB, dtype=jnp.int32)

    out = jax.jit(stacked_forward)(stack_params, input_ids)
    out = jax.block_until_ready(out)
    assert out.shape == (B, S, VOCAB) and out.dtype == jnp.float32
    assert bool(jnp.all(jnp.isfinite(out)))
    print("KERNEL_OK")
</pallas_src>

<mosaic_0001>
module attributes {stable_mosaic.version = 11 : i64} {
  func.func @kernel(%arg0: i32, %arg1: memref<1x8x64xf32, #tpu.memory_space<vmem>>, %arg2: memref<8x16xf32, #tpu.memory_space<vmem>>, %arg3: memref<8x16xf32, #tpu.memory_space<vmem>>, %arg4: memref<2x1x64xf32, #tpu.memory_space<vmem>>, %arg5: memref<2x64x128xbf16, #tpu.memory_space<vmem>>, %arg6: memref<2x64x64xbf16, #tpu.memory_space<vmem>>, %arg7: memref<2x1x64xf32, #tpu.memory_space<vmem>>, %arg8: memref<2x64x256xbf16, #tpu.memory_space<vmem>>, %arg9: memref<2x128x64xbf16, #tpu.memory_space<vmem>>, %arg10: memref<1x64xf32, #tpu.memory_space<vmem>>, %arg11: memref<256x64xbf16, #tpu.memory_space<vmem>>, %arg12: memref<1x8x1xi32, #tpu.memory_space<vmem>>) attributes {dimension_semantics = [#tpu.dimension_semantics<parallel>], iteration_bounds = array<i64: 2>, scalar_prefetch = 0 : i64, scratch_operands = 0 : i64, tpu.core_type = #tpu.core_type<tc>, window_params = [{transform_indices = @transform_0, window_bounds = array<i64: 1, 8, 64>}, {pipeline_mode = #tpu.pipeline_mode<synchronous>, transform_indices = @transform_1, window_bounds = array<i64: 8, 16>}, {pipeline_mode = #tpu.pipeline_mode<synchronous>, transform_indices = @transform_2, window_bounds = array<i64: 8, 16>}, {pipeline_mode = #tpu.pipeline_mode<synchronous>, transform_indices = @transform_3, window_bounds = array<i64: 2, 1, 64>}, {pipeline_mode = #tpu.pipeline_mode<synchronous>, transform_indices = @transform_4, window_bounds = array<i64: 2, 64, 128>}, {pipeline_mode = #tpu.pipeline_mode<synchronous>, transform_indices = @transform_5, window_bounds = array<i64: 2, 64, 64>}, {pipeline_mode = #tpu.pipeline_mode<synchronous>, transform_indices = @transform_6, window_bounds = array<i64: 2, 1, 64>}, {pipeline_mode = #tpu.pipeline_mode<synchronous>, transform_indices = @transform_7, window_bounds = array<i64: 2, 64, 256>}, {pipeline_mode = #tpu.pipeline_mode<synchronous>, transform_indices = @transform_8, window_bounds = array<i64: 2, 128, 64>}, {pipeline_mode = #tpu.pipeline_mode<synchronous>, transform_indices = @transform_9, window_bounds = array<i64: 1, 64>}, {pipeline_mode = #tpu.pipeline_mode<synchronous>, transform_indices = @transform_10, window_bounds = array<i64: 256, 64>}, {transform_indices = @transform_11, window_bounds = array<i64: 1, 8, 1>}]} {
    %c0 = arith.constant 0 : index
    %c0_0 = arith.constant 0 : index
    %c0_1 = arith.constant 0 : index
    %0 = vector.load %arg1[%c0, %c0_0, %c0_1] : memref<1x8x64xf32, #tpu.memory_space<vmem>>, vector<1x8x64xf32>
    %1 = vector.shape_cast %0 : vector<1x8x64xf32> to vector<8x64xf32>
    %c0_2 = arith.constant 0 : index
    %c0_3 = arith.constant 0 : index
    %2 = vector.load %arg2[%c0_2, %c0_3] : memref<8x16xf32, #tpu.memory_space<vmem>>, vector<8x16xf32>
    %c0_4 = arith.constant 0 : index
    %c0_5 = arith.constant 0 : index
    %3 = vector.load %arg3[%c0_4, %c0_5] : memref<8x16xf32, #tpu.memory_space<vmem>>, vector<8x16xf32>
    %4 = tpu.iota {dimensions = array<i32: 0>} : vector<8x8xi32>
    %5 = tpu.iota {dimensions = array<i32: 1>} : vector<8x8xi32>
    %6 = arith.cmpi sge, %4, %5 : vector<8x8xi32>
    %c0_6 = arith.constant 0 : index
    %c0_7 = arith.constant 0 : index
    %c0_8 = arith.constant 0 : index
    %7 = vector.load %arg4[%c0_6, %c0_7, %c0_8] : memref<2x1x64xf32, #tpu.memory_space<vmem>>, vector<1x1x64xf32>
    %8 = vector.shape_cast %7 : vector<1x1x64xf32> to vector<1x64xf32>
    %9 = arith.mulf %1, %1 : vector<8x64xf32>
    %cst = arith.constant dense<0.000000e+00> : vector<8xf32>
    %10 = vector.multi_reduction <add>, %9, %cst [1] : vector<8x64xf32> to vector<8xf32>
    %11 = vector.shape_cast %10 : vector<8xf32> to vector<8x1xf32>
    %cst_9 = arith.constant 6.400000e+01 : f32
    %12 = vector.broadcast %cst_9 : f32 to vector<8x1xf32>
    %13 = arith.divf %11, %12 : vector<8x1xf32>
    %cst_10 = arith.constant 9.99999997E-7 : f32
    %14 = vector.broadcast %cst_10 : f32 to vector<8x1xf32>
    %15 = arith.addf %13, %14 : vector<8x1xf32>
    %16 = math.rsqrt %15 : vector<8x1xf32>
    %17 = vector.broadcast %16 : vector<8x1xf32> to vector<8x64xf32>
    %18 = arith.mulf %1, %17 : vector<8x64xf32>
    %19 = vector.broadcast %8 : vector<1x64xf32> to vector<8x64xf32>
    %20 = arith.mulf %18, %19 : vector<8x64xf32>
    %c0_11 = arith.constant 0 : index
    %c0_12 = arith.constant 0 : index
    %c0_13 = arith.constant 0 : index
    %21 = vector.load %arg5[%c0_11, %c0_12, %c0_13] : memref<2x64x128xbf16, #tpu.memory_space<vmem>>, vector<1x64x128xbf16>
    %22 = vector.shape_cast %21 : vector<1x64x128xbf16> to vector<64x128xbf16>
    %23 = arith.truncf %20 : vector<8x64xf32> to vector<8x64xbf16>
    %cst_14 = arith.constant dense<0.000000e+00> : vector<8x128xf32>
    %24 = tpu.matmul %23, %22, %cst_14 {dimension_numbers = #tpu.dot_dimension_numbers<[1], [0], [0], [1], [0, 0, 1, 1], [], []>} : vector<8x64xbf16>, vector<64x128xbf16>, vector<8x128xf32> -> vector<8x128xf32>
    %25 = vector.extract_strided_slice %24 {offsets = [0, 0], sizes = [8, 64], strides = [1, 1]} : vector<8x128xf32> to vector<8x64xf32>
    %26 = vector.extract_strided_slice %24 {offsets = [0, 64], sizes = [8, 32], strides = [1, 1]} : vector<8x128xf32> to vector<8x32xf32>
    %27 = vector.extract_strided_slice %24 {offsets = [0, 96], sizes = [8, 32], strides = [1, 1]} : vector<8x128xf32> to vector<8x32xf32>
    %28 = vector.extract_strided_slice %26 {offsets = [0, 0], sizes = [8, 16], strides = [1, 1]} : vector<8x32xf32> to vector<8x16xf32>
    %29 = vector.extract_strided_slice %28 {offsets = [0, 8], sizes = [8, 8], strides = [1, 1]} : vector<8x16xf32> to vector<8x8xf32>
    %cst_15 = arith.constant 0.000000e+00 : f32
    %30 = vector.broadcast %cst_15 : f32 to vector<8x8xf32>
    %31 = arith.subf %30, %29 : vector<8x8xf32>
    %32 = vector.extract_strided_slice %28 {offsets = [0, 0], sizes = [8, 8], strides = [1, 1]} : vector<8x16xf32> to vector<8x8xf32>
    %33 = tpu.concatenate %31, %32 in 1 : vector<8x8xf32>, vector<8x8xf32> -> vector<8x16xf32>
    %34 = arith.mulf %28, %2 : vector<8x16xf32>
    %35 = arith.mulf %33, %3 : vector<8x16xf32>
    %36 = arith.addf %34, %35 : vector<8x16xf32>
    %37 = vector.extract_strided_slice %26 {offsets = [0, 16], sizes = [8, 16], strides = [1, 1]} : vector<8x32xf32> to vector<8x16xf32>
    %38 = vector.extract_strided_slice %37 {offsets = [0, 8], sizes = [8, 8], strides = [1, 1]} : vector<8x16xf32> to vector<8x8xf32>
    %cst_16 = arith.constant 0.000000e+00 : f32
    %39 = vector.broadcast %cst_16 : f32 to vector<8x8xf32>
    %40 = arith.subf %39, %38 : vector<8x8xf32>
    %41 = vector.extract_strided_slice %37 {offsets = [0, 0], sizes = [8, 8], strides = [1, 1]} : vector<8x16xf32> to vector<8x8xf32>
    %42 = tpu.concatenate %40, %41 in 1 : vector<8x8xf32>, vector<8x8xf32> -> vector<8x16xf32>
    %43 = arith.mulf %37, %2 : vector<8x16xf32>
    %44 = arith.mulf %42, %3 : vector<8x16xf32>
    %45 = arith.addf %43, %44 : vector<8x16xf32>
    %46 = vector.extract_strided_slice %27 {offsets = [0, 0], sizes = [8, 16], strides = [1, 1]} : vector<8x32xf32> to vector<8x16xf32>
    %47 = vector.extract_strided_slice %27 {offsets = [0, 16], sizes = [8, 16], strides = [1, 1]} : vector<8x32xf32> to vector<8x16xf32>
    %48 = vector.extract_strided_slice %25 {offsets = [0, 0], sizes = [8, 16], strides = [1, 1]} : vector<8x64xf32> to vector<8x16xf32>
    %49 = vector.extract_strided_slice %48 {offsets = [0, 8], sizes = [8, 8], strides = [1, 1]} : vector<8x16xf32> to vector<8x8xf32>
    %cst_17 = arith.constant 0.000000e+00 : f32
    %50 = vector.broadcast %cst_17 : f32 to vector<8x8xf32>
    %51 = arith.subf %50, %49 : vector<8x8xf32>
    %52 = vector.extract_strided_slice %48 {offsets = [0, 0], sizes = [8, 8], strides = [1, 1]} : vector<8x16xf32> to vector<8x8xf32>
    %53 = tpu.concatenate %51, %52 in 1 : vector<8x8xf32>, vector<8x8xf32> -> vector<8x16xf32>
    %54 = arith.mulf %48, %2 : vector<8x16xf32>
    %55 = arith.mulf %53, %3 : vector<8x16xf32>
    %56 = arith.addf %54, %55 : vector<8x16xf32>
    %57 = arith.truncf %56 : vector<8x16xf32> to vector<8x16xbf16>
    %58 = arith.truncf %36 : vector<8x16xf32> to vector<8x16xbf16>
    %cst_18 = arith.constant dense<0.000000e+00> : vector<8x8xf32>
    %59 = tpu.matmul %57, %58, %cst_18 {dimension_numbers = #tpu.dot_dimension_numbers<[1], [1], [0], [0], [0, 0, 1, 0], [], []>} : vector<8x16xbf16>, vector<8x16xbf16>, vector<8x8xf32> -> vector<8x8xf32>
    %cst_19 = arith.constant 2.500000e-01 : f32
    %60 = vector.broadcast %cst_19 : f32 to vector<8x8xf32>
    %61 = arith.mulf %59, %60 : vector<8x8xf32>
    %cst_20 = arith.constant -1.000000e+30 : f32
    %62 = vector.broadcast %cst_20 : f32 to vector<8x8xf32>
    %63 = arith.select %6, %61, %62 : vector<8x8xi1>, vector<8x8xf32>
    %cst_21 = arith.constant dense<0xFF800000> : vector<8xf32>
    %64 = vector.multi_reduction <maximumf>, %63, %cst_21 [1] : vector<8x8xf32> to vector<8xf32>
    %65 = vector.shape_cast %64 : vector<8xf32> to vector<8x1xf32>
    %66 = vector.broadcast %65 : vector<8x1xf32> to vector<8x8xf32>
    %67 = arith.subf %63, %66 : vector<8x8xf32>
    %68 = math.exp %67 : vector<8x8xf32>
    %cst_22 = arith.constant dense<0.000000e+00> : vector<8xf32>
    %69 = vector.multi_reduction <add>, %68, %cst_22 [1] : vector<8x8xf32> to vector<8xf32>
    %70 = vector.shape_cast %69 : vector<8xf32> to vector<8x1xf32>
    %71 = tpu.reciprocal %70 {approx = true} : vector<8x1xf32> -> vector<8x1xf32>
    %72 = vector.broadcast %71 : vector<8x1xf32> to vector<8x8xf32>
    %73 = arith.mulf %68, %72 : vector<8x8xf32>
    %74 = arith.truncf %73 : vector<8x8xf32> to vector<8x8xbf16>
    %75 = arith.truncf %46 : vector<8x16xf32> to vector<8x16xbf16>
    %cst_23 = arith.constant dense<0.000000e+00> : vector<8x16xf32>
    %76 = tpu.matmul %74, %75, %cst_23 {dimension_numbers = #tpu.dot_dimension_numbers<[1], [0], [0], [1], [0, 0, 1, 1], [], []>} : vector<8x8xbf16>, vector<8x16xbf16>, vector<8x16xf32> -> vector<8x16xf32>
    %77 = vector.extract_strided_slice %25 {offsets = [0, 16], sizes = [8, 16], strides = [1, 1]} : vector<8x64xf32> to vector<8x16xf32>
    %78 = vector.extract_strided_slice %77 {offsets = [0, 8], sizes = [8, 8], strides = [1, 1]} : vector<8x16xf32> to vector<8x8xf32>
    %cst_24 = arith.constant 0.000000e+00 : f32
    %79 = vector.broadcast %cst_24 : f32 to vector<8x8xf32>
    %80 = arith.subf %79, %78 : vector<8x8xf32>
    %81 = vector.extract_strided_slice %77 {offsets = [0, 0], sizes = [8, 8], strides = [1, 1]} : vector<8x16xf32> to vector<8x8xf32>
    %82 = tpu.concatenate %80, %81 in 1 : vector<8x8xf32>, vector<8x8xf32> -> vector<8x16xf32>
    %83 = arith.mulf %77, %2 : vector<8x16xf32>
    %84 = arith.mulf %82, %3 : vector<8x16xf32>
    %85 = arith.addf %83, %84 : vector<8x16xf32>
    %86 = arith.truncf %85 : vector<8x16xf32> to vector<8x16xbf16>
    %87 = arith.truncf %36 : vector<8x16xf32> to vector<8x16xbf16>
    %cst_25 = arith.constant dense<0.000000e+00> : vector<8x8xf32>
    %88 = tpu.matmul %86, %87, %cst_25 {dimension_numbers = #tpu.dot_dimension_numbers<[1], [1], [0], [0], [0, 0, 1, 0], [], []>} : vector<8x16xbf16>, vector<8x16xbf16>, vector<8x8xf32> -> vector<8x8xf32>
    %cst_26 = arith.constant 2.500000e-01 : f32
    %89 = vector.broadcast %cst_26 : f32 to vector<8x8xf32>
    %90 = arith.mulf %88, %89 : vector<8x8xf32>
    %cst_27 = arith.constant -1.000000e+30 : f32
    %91 = vector.broadcast %cst_27 : f32 to vector<8x8xf32>
    %92 = arith.select %6, %90, %91 : vector<8x8xi1>, vector<8x8xf32>
    %cst_28 = arith.constant dense<0xFF800000> : vector<8xf32>
    %93 = vector.multi_reduction <maximumf>, %92, %cst_28 [1] : vector<8x8xf32> to vector<8xf32>
    %94 = vector.shape_cast %93 : vector<8xf32> to vector<8x1xf32>
    %95 = vector.broadcast %94 : vector<8x1xf32> to vector<8x8xf32>
    %96 = arith.subf %92, %95 : vector<8x8xf32>
    %97 = math.exp %96 : vector<8x8xf32>
    %cst_29 = arith.constant dense<0.000000e+00> : vector<8xf32>
    %98 = vector.multi_reduction <add>, %97, %cst_29 [1] : vector<8x8xf32> to vector<8xf32>
    %99 = vector.shape_cast %98 : vector<8xf32> to vector<8x1xf32>
    %100 = tpu.reciprocal %99 {approx = true} : vector<8x1xf32> -> vector<8x1xf32>
    %101 = vector.broadcast %100 : vector<8x1xf32> to vector<8x8xf32>
    %102 = arith.mulf %97, %101 : vector<8x8xf32>
    %103 = arith.truncf %102 : vector<8x8xf32> to vector<8x8xbf16>
    %104 = arith.truncf %46 : vector<8x16xf32> to vector<8x16xbf16>
    %cst_30 = arith.constant dense<0.000000e+00> : vector<8x16xf32>
    %105 = tpu.matmul %103, %104, %cst_30 {dimension_numbers = #tpu.dot_dimension_numbers<[1], [0], [0], [1], [0, 0, 1, 1], [], []>} : vector<8x8xbf16>, vector<8x16xbf16>, vector<8x16xf32> -> vector<8x16xf32>
    %106 = vector.extract_strided_slice %25 {offsets = [0, 32], sizes = [8, 16], strides = [1, 1]} : vector<8x64xf32> to vector<8x16xf32>
    %107 = vector.extract_strided_slice %106 {offsets = [0, 8], sizes = [8, 8], strides = [1, 1]} : vector<8x16xf32> to vector<8x8xf32>
    %cst_31 = arith.constant 0.000000e+00 : f32
    %108 = vector.broadcast %cst_31 : f32 to vector<8x8xf32>
    %109 = arith.subf %108, %107 : vector<8x8xf32>
    %110 = vector.extract_strided_slice %106 {offsets = [0, 0], sizes = [8, 8], strides = [1, 1]} : vector<8x16xf32> to vector<8x8xf32>
    %111 = tpu.concatenate %109, %110 in 1 : vector<8x8xf32>, vector<8x8xf32> -> vector<8x16xf32>
    %112 = arith.mulf %106, %2 : vector<8x16xf32>
    %113 = arith.mulf %111, %3 : vector<8x16xf32>
    %114 = arith.addf %112, %113 : vector<8x16xf32>
    %115 = arith.truncf %114 : vector<8x16xf32> to vector<8x16xbf16>
    %116 = arith.truncf %45 : vector<8x16xf32> to vector<8x16xbf16>
    %cst_32 = arith.constant dense<0.000000e+00> : vector<8x8xf32>
    %117 = tpu.matmul %115, %116, %cst_32 {dimension_numbers = #tpu.dot_dimension_numbers<[1], [1], [0], [0], [0, 0, 1, 0], [], []>} : vector<8x16xbf16>, vector<8x16xbf16>, vector<8x8xf32> -> vector<8x8xf32>
    %cst_33 = arith.constant 2.500000e-01 : f32
    %118 = vector.broadcast %cst_33 : f32 to vector<8x8xf32>
    %119 = arith.mulf %117, %118 : vector<8x8xf32>
    %cst_34 = arith.constant -1.000000e+30 : f32
    %120 = vector.broadcast %cst_34 : f32 to vector<8x8xf32>
    %121 = arith.select %6, %119, %120 : vector<8x8xi1>, vector<8x8xf32>
    %cst_35 = arith.constant dense<0xFF800000> : vector<8xf32>
    %122 = vector.multi_reduction <maximumf>, %121, %cst_35 [1] : vector<8x8xf32> to vector<8xf32>
    %123 = vector.shape_cast %122 : vector<8xf32> to vector<8x1xf32>
    %124 = vector.broadcast %123 : vector<8x1xf32> to vector<8x8xf32>
    %125 = arith.subf %121, %124 : vector<8x8xf32>
    %126 = math.exp %125 : vector<8x8xf32>
    %cst_36 = arith.constant dense<0.000000e+00> : vector<8xf32>
    %127 = vector.multi_reduction <add>, %126, %cst_36 [1] : vector<8x8xf32> to vector<8xf32>
    %128 = vector.shape_cast %127 : vector<8xf32> to vector<8x1xf32>
    %129 = tpu.reciprocal %128 {approx = true} : vector<8x1xf32> -> vector<8x1xf32>
    %130 = vector.broadcast %129 : vector<8x1xf32> to vector<8x8xf32>
    %131 = arith.mulf %126, %130 : vector<8x8xf32>
    %132 = arith.truncf %131 : vector<8x8xf32> to vector<8x8xbf16>
    %133 = arith.truncf %47 : vector<8x16xf32> to vector<8x16xbf16>
    %cst_37 = arith.constant dense<0.000000e+00> : vector<8x16xf32>
    %134 = tpu.matmul %132, %133, %cst_37 {dimension_numbers = #tpu.dot_dimension_numbers<[1], [0], [0], [1], [0, 0, 1, 1], [], []>} : vector<8x8xbf16>, vector<8x16xbf16>, vector<8x16xf32> -> vector<8x16xf32>
    %135 = vector.extract_strided_slice %25 {offsets = [0, 48], sizes = [8, 16], strides = [1, 1]} : vector<8x64xf32> to vector<8x16xf32>
    %136 = vector.extract_strided_slice %135 {offsets = [0, 8], sizes = [8, 8], strides = [1, 1]} : vector<8x16xf32> to vector<8x8xf32>
    %cst_38 = arith.constant 0.000000e+00 : f32
    %137 = vector.broadcast %cst_38 : f32 to vector<8x8xf32>
    %138 = arith.subf %137, %136 : vector<8x8xf32>
    %139 = vector.extract_strided_slice %135 {offsets = [0, 0], sizes = [8, 8], strides = [1, 1]} : vector<8x16xf32> to vector<8x8xf32>
    %140 = tpu.concatenate %138, %139 in 1 : vector<8x8xf32>, vector<8x8xf32> -> vector<8x16xf32>
    %141 = arith.mulf %135, %2 : vector<8x16xf32>
    %142 = arith.mulf %140, %3 : vector<8x16xf32>
    %143 = arith.addf %141, %142 : vector<8x16xf32>
    %144 = arith.truncf %143 : vector<8x16xf32> to vector<8x16xbf16>
    %145 = arith.truncf %45 : vector<8x16xf32> to vector<8x16xbf16>
    %cst_39 = arith.constant dense<0.000000e+00> : vector<8x8xf32>
    %146 = tpu.matmul %144, %145, %cst_39 {dimension_numbers = #tpu.dot_dimension_numbers<[1], [1], [0], [0], [0, 0, 1, 0], [], []>} : vector<8x16xbf16>, vector<8x16xbf16>, vector<8x8xf32> -> vector<8x8xf32>
    %cst_40 = arith.constant 2.500000e-01 : f32
    %147 = vector.broadcast %cst_40 : f32 to vector<8x8xf32>
    %148 = arith.mulf %146, %147 : vector<8x8xf32>
    %cst_41 = arith.constant -1.000000e+30 : f32
    %149 = vector.broadcast %cst_41 : f32 to vector<8x8xf32>
    %150 = arith.select %6, %148, %149 : vector<8x8xi1>, vector<8x8xf32>
    %cst_42 = arith.constant dense<0xFF800000> : vector<8xf32>
    %151 = vector.multi_reduction <maximumf>, %150, %cst_42 [1] : vector<8x8xf32> to vector<8xf32>
    %152 = vector.shape_cast %151 : vector<8xf32> to vector<8x1xf32>
    %153 = vector.broadcast %152 : vector<8x1xf32> to vector<8x8xf32>
    %154 = arith.subf %150, %153 : vector<8x8xf32>
    %155 = math.exp %154 : vector<8x8xf32>
    %cst_43 = arith.constant dense<0.000000e+00> : vector<8xf32>
    %156 = vector.multi_reduction <add>, %155, %cst_43 [1] : vector<8x8xf32> to vector<8xf32>
    %157 = vector.shape_cast %156 : vector<8xf32> to vector<8x1xf32>
    %158 = tpu.reciprocal %157 {approx = true} : vector<8x1xf32> -> vector<8x1xf32>
    %159 = vector.broadcast %158 : vector<8x1xf32> to vector<8x8xf32>
    %160 = arith.mulf %155, %159 : vector<8x8xf32>
    %161 = arith.truncf %160 : vector<8x8xf32> to vector<8x8xbf16>
    %162 = arith.truncf %47 : vector<8x16xf32> to vector<8x16xbf16>
    %cst_44 = arith.constant dense<0.000000e+00> : vector<8x16xf32>
    %163 = tpu.matmul %161, %162, %cst_44 {dimension_numbers = #tpu.dot_dimension_numbers<[1], [0], [0], [1], [0, 0, 1, 1], [], []>} : vector<8x8xbf16>, vector<8x16xbf16>, vector<8x16xf32> -> vector<8x16xf32>
    %164 = tpu.concatenate %76, %105, %134, %163 in 1 : vector<8x16xf32>, vector<8x16xf32>, vector<8x16xf32>, vector<8x16xf32> -> vector<8x64xf32>
    %c0_45 = arith.constant 0 : index
    %c0_46 = arith.constant 0 : index
    %c0_47 = arith.constant 0 : index
    %165 = vector.load %arg6[%c0_45, %c0_46, %c0_47] : memref<2x64x64xbf16, #tpu.memory_space<vmem>>, vector<1x64x64xbf16>
    %166 = vector.shape_cast %165 : vector<1x64x64xbf16> to vector<64x64xbf16>
    %167 = arith.truncf %164 : vector<8x64xf32> to vector<8x64xbf16>
    %cst_48 = arith.constant dense<0.000000e+00> : vector<8x64xf32>
    %168 = tpu.matmul %167, %166, %cst_48 {dimension_numbers = #tpu.dot_dimension_numbers<[1], [0], [0], [1], [0, 0, 1, 1], [], []>} : vector<8x64xbf16>, vector<64x64xbf16>, vector<8x64xf32> -> vector<8x64xf32>
    %169 = arith.addf %1, %168 : vector<8x64xf32>
    %c0_49 = arith.constant 0 : index
    %c0_50 = arith.constant 0 : index
    %c0_51 = arith.constant 0 : index
    %170 = vector.load %arg7[%c0_49, %c0_50, %c0_51] : memref<2x1x64xf32, #tpu.memory_space<vmem>>, vector<1x1x64xf32>
    %171 = vector.shape_cast %170 : vector<1x1x64xf32> to vector<1x64xf32>
    %172 = arith.mulf %169, %169 : vector<8x64xf32>
    %cst_52 = arith.constant dense<0.000000e+00> : vector<8xf32>
    %173 = vector.multi_reduction <add>, %172, %cst_52 [1] : vector<8x64xf32> to vector<8xf32>
    %174 = vector.shape_cast %173 : vector<8xf32> to vector<8x1xf32>
    %cst_53 = arith.constant 6.400000e+01 : f32
    %175 = vector.broadcast %cst_53 : f32 to vector<8x1xf32>
    %176 = arith.divf %174, %175 : vector<8x1xf32>
    %cst_54 = arith.constant 9.99999997E-7 : f32
    %177 = vector.broadcast %cst_54 : f32 to vector<8x1xf32>
    %178 = arith.addf %176, %177 : vector<8x1xf32>
    %179 = math.rsqrt %178 : vector<8x1xf32>
    %180 = vector.broadcast %179 : vector<8x1xf32> to vector<8x64xf32>
    %181 = arith.mulf %169, %180 : vector<8x64xf32>
    %182 = vector.broadcast %171 : vector<1x64xf32> to vector<8x64xf32>
    %183 = arith.mulf %181, %182 : vector<8x64xf32>
    %c0_55 = arith.constant 0 : index
    %c0_56 = arith.constant 0 : index
    %c0_57 = arith.constant 0 : index
    %184 = vector.load %arg8[%c0_55, %c0_56, %c0_57] : memref<2x64x256xbf16, #tpu.memory_space<vmem>>, vector<1x64x256xbf16>
    %185 = vector.shape_cast %184 : vector<1x64x256xbf16> to vector<64x256xbf16>
    %186 = arith.truncf %183 : vector<8x64xf32> to vector<8x64xbf16>
    %cst_58 = arith.constant dense<0.000000e+00> : vector<8x256xf32>
    %187 = tpu.matmul %186, %185, %cst_58 {dimension_numbers = #tpu.dot_dimension_numbers<[1], [0], [0], [1], [0, 0, 1, 1], [], []>} : vector<8x64xbf16>, vector<64x256xbf16>, vector<8x256xf32> -> vector<8x256xf32>
    %188 = vector.extract_strided_slice %187 {offsets = [0, 0], sizes = [8, 128], strides = [1, 1]} : vector<8x256xf32> to vector<8x128xf32>
    %189 = vector.extract_strided_slice %187 {offsets = [0, 128], sizes = [8, 128], strides = [1, 1]} : vector<8x256xf32> to vector<8x128xf32>
    %190 = arith.negf %188 : vector<8x128xf32>
    %191 = math.exp %190 : vector<8x128xf32>
    %cst_59 = arith.constant 1.000000e+00 : f32
    %192 = vector.broadcast %cst_59 : f32 to vector<8x128xf32>
    %193 = arith.addf %192, %191 : vector<8x128xf32>
    %194 = arith.divf %192, %193 : vector<8x128xf32>
    %195 = arith.mulf %188, %194 : vector<8x128xf32>
    %196 = arith.mulf %195, %189 : vector<8x128xf32>
    %c0_60 = arith.constant 0 : index
    %c0_61 = arith.constant 0 : index
    %c0_62 = arith.constant 0 : index
    %197 = vector.load %arg9[%c0_60, %c0_61, %c0_62] : memref<2x128x64xbf16, #tpu.memory_space<vmem>>, vector<1x128x64xbf16>
    %198 = vector.shape_cast %197 : vector<1x128x64xbf16> to vector<128x64xbf16>
    %199 = arith.truncf %196 : vector<8x128xf32> to vector<8x128xbf16>
    %cst_63 = arith.constant dense<0.000000e+00> : vector<8x64xf32>
    %200 = tpu.matmul %199, %198, %cst_63 {dimension_numbers = #tpu.dot_dimension_numbers<[1], [0], [0], [1], [0, 0, 1, 1], [], []>} : vector<8x128xbf16>, vector<128x64xbf16>, vector<8x64xf32> -> vector<8x64xf32>
    %201 = arith.addf %169, %200 : vector<8x64xf32>
    %c1 = arith.constant 1 : index
    %c0_64 = arith.constant 0 : index
    %c0_65 = arith.constant 0 : index
    %202 = vector.load %arg4[%c1, %c0_64, %c0_65] : memref<2x1x64xf32, #tpu.memory_space<vmem>>, vector<1x1x64xf32>
    %203 = vector.shape_cast %202 : vector<1x1x64xf32> to vector<1x64xf32>
    %204 = arith.mulf %201, %201 : vector<8x64xf32>
    %cst_66 = arith.constant dense<0.000000e+00> : vector<8xf32>
    %205 = vector.multi_reduction <add>, %204, %cst_66 [1] : vector<8x64xf32> to vector<8xf32>
    %206 = vector.shape_cast %205 : vector<8xf32> to vector<8x1xf32>
    %cst_67 = arith.constant 6.400000e+01 : f32
    %207 = vector.broadcast %cst_67 : f32 to vector<8x1xf32>
    %208 = arith.divf %206, %207 : vector<8x1xf32>
    %cst_68 = arith.constant 9.99999997E-7 : f32
    %209 = vector.broadcast %cst_68 : f32 to vector<8x1xf32>
    %210 = arith.addf %208, %209 : vector<8x1xf32>
    %211 = math.rsqrt %210 : vector<8x1xf32>
    %212 = vector.broadcast %211 : vector<8x1xf32> to vector<8x64xf32>
    %213 = arith.mulf %201, %212 : vector<8x64xf32>
    %214 = vector.broadcast %203 : vector<1x64xf32> to vector<8x64xf32>
    %215 = arith.mulf %213, %214 : vector<8x64xf32>
    %c1_69 = arith.constant 1 : index
    %c0_70 = arith.constant 0 : index
    %c0_71 = arith.constant 0 : index
    %216 = vector.load %arg5[%c1_69, %c0_70, %c0_71] : memref<2x64x128xbf16, #tpu.memory_space<vmem>>, vector<1x64x128xbf16>
    %217 = vector.shape_cast %216 : vector<1x64x128xbf16> to vector<64x128xbf16>
    %218 = arith.truncf %215 : vector<8x64xf32> to vector<8x64xbf16>
    %cst_72 = arith.constant dense<0.000000e+00> : vector<8x128xf32>
    %219 = tpu.matmul %218, %217, %cst_72 {dimension_numbers = #tpu.dot_dimension_numbers<[1], [0], [0], [1], [0, 0, 1, 1], [], []>} : vector<8x64xbf16>, vector<64x128xbf16>, vector<8x128xf32> -> vector<8x128xf32>
    %220 = vector.extract_strided_slice %219 {offsets = [0, 0], sizes = [8, 64], strides = [1, 1]} : vector<8x128xf32> to vector<8x64xf32>
    %221 = vector.extract_strided_slice %219 {offsets = [0, 64], sizes = [8, 32], strides = [1, 1]} : vector<8x128xf32> to vector<8x32xf32>
    %222 = vector.extract_strided_slice %219 {offsets = [0, 96], sizes = [8, 32], strides = [1, 1]} : vector<8x128xf32> to vector<8x32xf32>
    %223 = vector.extract_strided_slice %221 {offsets = [0, 0], sizes = [8, 16], strides = [1, 1]} : vector<8x32xf32> to vector<8x16xf32>
    %224 = vector.extract_strided_slice %223 {offsets = [0, 8], sizes = [8, 8], strides = [1, 1]} : vector<8x16xf32> to vector<8x8xf32>
    %cst_73 = arith.constant 0.000000e+00 : f32
    %225 = vector.broadcast %cst_73 : f32 to vector<8x8xf32>
    %226 = arith.subf %225, %224 : vector<8x8xf32>
    %227 = vector.extract_strided_slice %223 {offsets = [0, 0], sizes = [8, 8], strides = [1, 1]} : vector<8x16xf32> to vector<8x8xf32>
    %228 = tpu.concatenate %226, %227 in 1 : vector<8x8xf32>, vector<8x8xf32> -> vector<8x16xf32>
    %229 = arith.mulf %223, %2 : vector<8x16xf32>
    %230 = arith.mulf %228, %3 : vector<8x16xf32>
    %231 = arith.addf %229, %230 : vector<8x16xf32>
    %232 = vector.extract_strided_slice %221 {offsets = [0, 16], sizes = [8, 16], strides = [1, 1]} : vector<8x32xf32> to vector<8x16xf32>
    %233 = vector.extract_strided_slice %232 {offsets = [0, 8], sizes = [8, 8], strides = [1, 1]} : vector<8x16xf32> to vector<8x8xf32>
    %cst_74 = arith.constant 0.000000e+00 : f32
    %234 = vector.broadcast %cst_74 : f32 to vector<8x8xf32>
    %235 = arith.subf %234, %233 : vector<8x8xf32>
    %236 = vector.extract_strided_slice %232 {offsets = [0, 0], sizes = [8, 8], strides = [1, 1]} : vector<8x16xf32> to vector<8x8xf32>
    %237 = tpu.concatenate %235, %236 in 1 : vector<8x8xf32>, vector<8x8xf32> -> vector<8x16xf32>
    %238 = arith.mulf %232, %2 : vector<8x16xf32>
    %239 = arith.mulf %237, %3 : vector<8x16xf32>
    %240 = arith.addf %238, %239 : vector<8x16xf32>
    %241 = vector.extract_strided_slice %222 {offsets = [0, 0], sizes = [8, 16], strides = [1, 1]} : vector<8x32xf32> to vector<8x16xf32>
    %242 = vector.extract_strided_slice %222 {offsets = [0, 16], sizes = [8, 16], strides = [1, 1]} : vector<8x32xf32> to vector<8x16xf32>
    %243 = vector.extract_strided_slice %220 {offsets = [0, 0], sizes = [8, 16], strides = [1, 1]} : vector<8x64xf32> to vector<8x16xf32>
    %244 = vector.extract_strided_slice %243 {offsets = [0, 8], sizes = [8, 8], strides = [1, 1]} : vector<8x16xf32> to vector<8x8xf32>
    %cst_75 = arith.constant 0.000000e+00 : f32
    %245 = vector.broadcast %cst_75 : f32 to vector<8x8xf32>
    %246 = arith.subf %245, %244 : vector<8x8xf32>
    %247 = vector.extract_strided_slice %243 {offsets = [0, 0], sizes = [8, 8], strides = [1, 1]} : vector<8x16xf32> to vector<8x8xf32>
    %248 = tpu.concatenate %246, %247 in 1 : vector<8x8xf32>, vector<8x8xf32> -> vector<8x16xf32>
    %249 = arith.mulf %243, %2 : vector<8x16xf32>
    %250 = arith.mulf %248, %3 : vector<8x16xf32>
    %251 = arith.addf %249, %250 : vector<8x16xf32>
    %252 = arith.truncf %251 : vector<8x16xf32> to vector<8x16xbf16>
    %253 = arith.truncf %231 : vector<8x16xf32> to vector<8x16xbf16>
    %cst_76 = arith.constant dense<0.000000e+00> : vector<8x8xf32>
    %254 = tpu.matmul %252, %253, %cst_76 {dimension_numbers = #tpu.dot_dimension_numbers<[1], [1], [0], [0], [0, 0, 1, 0], [], []>} : vector<8x16xbf16>, vector<8x16xbf16>, vector<8x8xf32> -> vector<8x8xf32>
    %cst_77 = arith.constant 2.500000e-01 : f32
    %255 = vector.broadcast %cst_77 : f32 to vector<8x8xf32>
    %256 = arith.mulf %254, %255 : vector<8x8xf32>
    %cst_78 = arith.constant -1.000000e+30 : f32
    %257 = vector.broadcast %cst_78 : f32 to vector<8x8xf32>
    %258 = arith.select %6, %256, %257 : vector<8x8xi1>, vector<8x8xf32>
    %cst_79 = arith.constant dense<0xFF800000> : vector<8xf32>
    %259 = vector.multi_reduction <maximumf>, %258, %cst_79 [1] : vector<8x8xf32> to vector<8xf32>
    %260 = vector.shape_cast %259 : vector<8xf32> to vector<8x1xf32>
    %261 = vector.broadcast %260 : vector<8x1xf32> to vector<8x8xf32>
    %262 = arith.subf %258, %261 : vector<8x8xf32>
    %263 = math.exp %262 : vector<8x8xf32>
    %cst_80 = arith.constant dense<0.000000e+00> : vector<8xf32>
    %264 = vector.multi_reduction <add>, %263, %cst_80 [1] : vector<8x8xf32> to vector<8xf32>
    %265 = vector.shape_cast %264 : vector<8xf32> to vector<8x1xf32>
    %266 = tpu.reciprocal %265 {approx = true} : vector<8x1xf32> -> vector<8x1xf32>
    %267 = vector.broadcast %266 : vector<8x1xf32> to vector<8x8xf32>
    %268 = arith.mulf %263, %267 : vector<8x8xf32>
    %269 = arith.truncf %268 : vector<8x8xf32> to vector<8x8xbf16>
    %270 = arith.truncf %241 : vector<8x16xf32> to vector<8x16xbf16>
    %cst_81 = arith.constant dense<0.000000e+00> : vector<8x16xf32>
    %271 = tpu.matmul %269, %270, %cst_81 {dimension_numbers = #tpu.dot_dimension_numbers<[1], [0], [0], [1], [0, 0, 1, 1], [], []>} : vector<8x8xbf16>, vector<8x16xbf16>, vector<8x16xf32> -> vector<8x16xf32>
    %272 = vector.extract_strided_slice %220 {offsets = [0, 16], sizes = [8, 16], strides = [1, 1]} : vector<8x64xf32> to vector<8x16xf32>
    %273 = vector.extract_strided_slice %272 {offsets = [0, 8], sizes = [8, 8], strides = [1, 1]} : vector<8x16xf32> to vector<8x8xf32>
    %cst_82 = arith.constant 0.000000e+00 : f32
    %274 = vector.broadcast %cst_82 : f32 to vector<8x8xf32>
    %275 = arith.subf %274, %273 : vector<8x8xf32>
    %276 = vector.extract_strided_slice %272 {offsets = [0, 0], sizes = [8, 8], strides = [1, 1]} : vector<8x16xf32> to vector<8x8xf32>
    %277 = tpu.concatenate %275, %276 in 1 : vector<8x8xf32>, vector<8x8xf32> -> vector<8x16xf32>
    %278 = arith.mulf %272, %2 : vector<8x16xf32>
    %279 = arith.mulf %277, %3 : vector<8x16xf32>
    %280 = arith.addf %278, %279 : vector<8x16xf32>
    %281 = arith.truncf %280 : vector<8x16xf32> to vector<8x16xbf16>
    %282 = arith.truncf %231 : vector<8x16xf32> to vector<8x16xbf16>
    %cst_83 = arith.constant dense<0.000000e+00> : vector<8x8xf32>
    %283 = tpu.matmul %281, %282, %cst_83 {dimension_numbers = #tpu.dot_dimension_numbers<[1], [1], [0], [0], [0, 0, 1, 0], [], []>} : vector<8x16xbf16>, vector<8x16xbf16>, vector<8x8xf32> -> vector<8x8xf32>
    %cst_84 = arith.constant 2.500000e-01 : f32
    %284 = vector.broadcast %cst_84 : f32 to vector<8x8xf32>
    %285 = arith.mulf %283, %284 : vector<8x8xf32>
    %cst_85 = arith.constant -1.000000e+30 : f32
    %286 = vector.broadcast %cst_85 : f32 to vector<8x8xf32>
    %287 = arith.select %6, %285, %286 : vector<8x8xi1>, vector<8x8xf32>
    %cst_86 = arith.constant dense<0xFF800000> : vector<8xf32>
    %288 = vector.multi_reduction <maximumf>, %287, %cst_86 [1] : vector<8x8xf32> to vector<8xf32>
    %289 = vector.shape_cast %288 : vector<8xf32> to vector<8x1xf32>
    %290 = vector.broadcast %289 : vector<8x1xf32> to vector<8x8xf32>
    %291 = arith.subf %287, %290 : vector<8x8xf32>
    %292 = math.exp %291 : vector<8x8xf32>
    %cst_87 = arith.constant dense<0.000000e+00> : vector<8xf32>
    %293 = vector.multi_reduction <add>, %292, %cst_87 [1] : vector<8x8xf32> to vector<8xf32>
    %294 = vector.shape_cast %293 : vector<8xf32> to vector<8x1xf32>
    %295 = tpu.reciprocal %294 {approx = true} : vector<8x1xf32> -> vector<8x1xf32>
    %296 = vector.broadcast %295 : vector<8x1xf32> to vector<8x8xf32>
    %297 = arith.mulf %292, %296 : vector<8x8xf32>
    %298 = arith.truncf %297 : vector<8x8xf32> to vector<8x8xbf16>
    %299 = arith.truncf %241 : vector<8x16xf32> to vector<8x16xbf16>
    %cst_88 = arith.constant dense<0.000000e+00> : vector<8x16xf32>
    %300 = tpu.matmul %298, %299, %cst_88 {dimension_numbers = #tpu.dot_dimension_numbers<[1], [0], [0], [1], [0, 0, 1, 1], [], []>} : vector<8x8xbf16>, vector<8x16xbf16>, vector<8x16xf32> -> vector<8x16xf32>
    %301 = vector.extract_strided_slice %220 {offsets = [0, 32], sizes = [8, 16], strides = [1, 1]} : vector<8x64xf32> to vector<8x16xf32>
    %302 = vector.extract_strided_slice %301 {offsets = [0, 8], sizes = [8, 8], strides = [1, 1]} : vector<8x16xf32> to vector<8x8xf32>
    %cst_89 = arith.constant 0.000000e+00 : f32
    %303 = vector.broadcast %cst_89 : f32 to vector<8x8xf32>
    %304 = arith.subf %303, %302 : vector<8x8xf32>
    %305 = vector.extract_strided_slice %301 {offsets = [0, 0], sizes = [8, 8], strides = [1, 1]} : vector<8x16xf32> to vector<8x8xf32>
    %306 = tpu.concatenate %304, %305 in 1 : vector<8x8xf32>, vector<8x8xf32> -> vector<8x16xf32>
    %307 = arith.mulf %301, %2 : vector<8x16xf32>
    %308 = arith.mulf %306, %3 : vector<8x16xf32>
    %309 = arith.addf %307, %308 : vector<8x16xf32>
    %310 = arith.truncf %309 : vector<8x16xf32> to vector<8x16xbf16>
    %311 = arith.truncf %240 : vector<8x16xf32> to vector<8x16xbf16>
    %cst_90 = arith.constant dense<0.000000e+00> : vector<8x8xf32>
    %312 = tpu.matmul %310, %311, %cst_90 {dimension_numbers = #tpu.dot_dimension_numbers<[1], [1], [0], [0], [0, 0, 1, 0], [], []>} : vector<8x16xbf16>, vector<8x16xbf16>, vector<8x8xf32> -> vector<8x8xf32>
    %cst_91 = arith.constant 2.500000e-01 : f32
    %313 = vector.broadcast %cst_91 : f32 to vector<8x8xf32>
    %314 = arith.mulf %312, %313 : vector<8x8xf32>
    %cst_92 = arith.constant -1.000000e+30 : f32
    %315 = vector.broadcast %cst_92 : f32 to vector<8x8xf32>
    %316 = arith.select %6, %314, %315 : vector<8x8xi1>, vector<8x8xf32>
    %cst_93 = arith.constant dense<0xFF800000> : vector<8xf32>
    %317 = vector.multi_reduction <maximumf>, %316, %cst_93 [1] : vector<8x8xf32> to vector<8xf32>
    %318 = vector.shape_cast %317 : vector<8xf32> to vector<8x1xf32>
    %319 = vector.broadcast %318 : vector<8x1xf32> to vector<8x8xf32>
    %320 = arith.subf %316, %319 : vector<8x8xf32>
    %321 = math.exp %320 : vector<8x8xf32>
    %cst_94 = arith.constant dense<0.000000e+00> : vector<8xf32>
    %322 = vector.multi_reduction <add>, %321, %cst_94 [1] : vector<8x8xf32> to vector<8xf32>
    %323 = vector.shape_cast %322 : vector<8xf32> to vector<8x1xf32>
    %324 = tpu.reciprocal %323 {approx = true} : vector<8x1xf32> -> vector<8x1xf32>
    %325 = vector.broadcast %324 : vector<8x1xf32> to vector<8x8xf32>
    %326 = arith.mulf %321, %325 : vector<8x8xf32>
    %327 = arith.truncf %326 : vector<8x8xf32> to vector<8x8xbf16>
    %328 = arith.truncf %242 : vector<8x16xf32> to vector<8x16xbf16>
    %cst_95 = arith.constant dense<0.000000e+00> : vector<8x16xf32>
    %329 = tpu.matmul %327, %328, %cst_95 {dimension_numbers = #tpu.dot_dimension_numbers<[1], [0], [0], [1], [0, 0, 1, 1], [], []>} : vector<8x8xbf16>, vector<8x16xbf16>, vector<8x16xf32> -> vector<8x16xf32>
    %330 = vector.extract_strided_slice %220 {offsets = [0, 48], sizes = [8, 16], strides = [1, 1]} : vector<8x64xf32> to vector<8x16xf32>
    %331 = vector.extract_strided_slice %330 {offsets = [0, 8], sizes = [8, 8], strides = [1, 1]} : vector<8x16xf32> to vector<8x8xf32>
    %cst_96 = arith.constant 0.000000e+00 : f32
    %332 = vector.broadcast %cst_96 : f32 to vector<8x8xf32>
    %333 = arith.subf %332, %331 : vector<8x8xf32>
    %334 = vector.extract_strided_slice %330 {offsets = [0, 0], sizes = [8, 8], strides = [1, 1]} : vector<8x16xf32> to vector<8x8xf32>
    %335 = tpu.concatenate %333, %334 in 1 : vector<8x8xf32>, vector<8x8xf32> -> vector<8x16xf32>
    %336 = arith.mulf %330, %2 : vector<8x16xf32>
    %337 = arith.mulf %335, %3 : vector<8x16xf32>
    %338 = arith.addf %336, %337 : vector<8x16xf32>
    %339 = arith.truncf %338 : vector<8x16xf32> to vector<8x16xbf16>
    %340 = arith.truncf %240 : vector<8x16xf32> to vector<8x16xbf16>
    %cst_97 = arith.constant dense<0.000000e+00> : vector<8x8xf32>
    %341 = tpu.matmul %339, %340, %cst_97 {dimension_numbers = #tpu.dot_dimension_numbers<[1], [1], [0], [0], [0, 0, 1, 0], [], []>} : vector<8x16xbf16>, vector<8x16xbf16>, vector<8x8xf32> -> vector<8x8xf32>
    %cst_98 = arith.constant 2.500000e-01 : f32
    %342 = vector.broadcast %cst_98 : f32 to vector<8x8xf32>
    %343 = arith.mulf %341, %342 : vector<8x8xf32>
    %cst_99 = arith.constant -1.000000e+30 : f32
    %344 = vector.broadcast %cst_99 : f32 to vector<8x8xf32>
    %345 = arith.select %6, %343, %344 : vector<8x8xi1>, vector<8x8xf32>
    %cst_100 = arith.constant dense<0xFF800000> : vector<8xf32>
    %346 = vector.multi_reduction <maximumf>, %345, %cst_100 [1] : vector<8x8xf32> to vector<8xf32>
    %347 = vector.shape_cast %346 : vector<8xf32> to vector<8x1xf32>
    %348 = vector.broadcast %347 : vector<8x1xf32> to vector<8x8xf32>
    %349 = arith.subf %345, %348 : vector<8x8xf32>
    %350 = math.exp %349 : vector<8x8xf32>
    %cst_101 = arith.constant dense<0.000000e+00> : vector<8xf32>
    %351 = vector.multi_reduction <add>, %350, %cst_101 [1] : vector<8x8xf32> to vector<8xf32>
    %352 = vector.shape_cast %351 : vector<8xf32> to vector<8x1xf32>
    %353 = tpu.reciprocal %352 {approx = true} : vector<8x1xf32> -> vector<8x1xf32>
    %354 = vector.broadcast %353 : vector<8x1xf32> to vector<8x8xf32>
    %355 = arith.mulf %350, %354 : vector<8x8xf32>
    %356 = arith.truncf %355 : vector<8x8xf32> to vector<8x8xbf16>
    %357 = arith.truncf %242 : vector<8x16xf32> to vector<8x16xbf16>
    %cst_102 = arith.constant dense<0.000000e+00> : vector<8x16xf32>
    %358 = tpu.matmul %356, %357, %cst_102 {dimension_numbers = #tpu.dot_dimension_numbers<[1], [0], [0], [1], [0, 0, 1, 1], [], []>} : vector<8x8xbf16>, vector<8x16xbf16>, vector<8x16xf32> -> vector<8x16xf32>
    %359 = tpu.concatenate %271, %300, %329, %358 in 1 : vector<8x16xf32>, vector<8x16xf32>, vector<8x16xf32>, vector<8x16xf32> -> vector<8x64xf32>
    %c1_103 = arith.constant 1 : index
    %c0_104 = arith.constant 0 : index
    %c0_105 = arith.constant 0 : index
    %360 = vector.load %arg6[%c1_103, %c0_104, %c0_105] : memref<2x64x64xbf16, #tpu.memory_space<vmem>>, vector<1x64x64xbf16>
    %361 = vector.shape_cast %360 : vector<1x64x64xbf16> to vector<64x64xbf16>
    %362 = arith.truncf %359 : vector<8x64xf32> to vector<8x64xbf16>
    %cst_106 = arith.constant dense<0.000000e+00> : vector<8x64xf32>
    %363 = tpu.matmul %362, %361, %cst_106 {dimension_numbers = #tpu.dot_dimension_numbers<[1], [0], [0], [1], [0, 0, 1, 1], [], []>} : vector<8x64xbf16>, vector<64x64xbf16>, vector<8x64xf32> -> vector<8x64xf32>
    %364 = arith.addf %201, %363 : vector<8x64xf32>
    %c1_107 = arith.constant 1 : index
    %c0_108 = arith.constant 0 : index
    %c0_109 = arith.constant 0 : index
    %365 = vector.load %arg7[%c1_107, %c0_108, %c0_109] : memref<2x1x64xf32, #tpu.memory_space<vmem>>, vector<1x1x64xf32>
    %366 = vector.shape_cast %365 : vector<1x1x64xf32> to vector<1x64xf32>
    %367 = arith.mulf %364, %364 : vector<8x64xf32>
    %cst_110 = arith.constant dense<0.000000e+00> : vector<8xf32>
    %368 = vector.multi_reduction <add>, %367, %cst_110 [1] : vector<8x64xf32> to vector<8xf32>
    %369 = vector.shape_cast %368 : vector<8xf32> to vector<8x1xf32>
    %cst_111 = arith.constant 6.400000e+01 : f32
    %370 = vector.broadcast %cst_111 : f32 to vector<8x1xf32>
    %371 = arith.divf %369, %370 : vector<8x1xf32>
    %cst_112 = arith.constant 9.99999997E-7 : f32
    %372 = vector.broadcast %cst_112 : f32 to vector<8x1xf32>
    %373 = arith.addf %371, %372 : vector<8x1xf32>
    %374 = math.rsqrt %373 : vector<8x1xf32>
    %375 = vector.broadcast %374 : vector<8x1xf32> to vector<8x64xf32>
    %376 = arith.mulf %364, %375 : vector<8x64xf32>
    %377 = vector.broadcast %366 : vector<1x64xf32> to vector<8x64xf32>
    %378 = arith.mulf %376, %377 : vector<8x64xf32>
    %c1_113 = arith.constant 1 : index
    %c0_114 = arith.constant 0 : index
    %c0_115 = arith.constant 0 : index
    %379 = vector.load %arg8[%c1_113, %c0_114, %c0_115] : memref<2x64x256xbf16, #tpu.memory_space<vmem>>, vector<1x64x256xbf16>
    %380 = vector.shape_cast %379 : vector<1x64x256xbf16> to vector<64x256xbf16>
    %381 = arith.truncf %378 : vector<8x64xf32> to vector<8x64xbf16>
    %cst_116 = arith.constant dense<0.000000e+00> : vector<8x256xf32>
    %382 = tpu.matmul %381, %380, %cst_116 {dimension_numbers = #tpu.dot_dimension_numbers<[1], [0], [0], [1], [0, 0, 1, 1], [], []>} : vector<8x64xbf16>, vector<64x256xbf16>, vector<8x256xf32> -> vector<8x256xf32>
    %383 = vector.extract_strided_slice %382 {offsets = [0, 0], sizes = [8, 128], strides = [1, 1]} : vector<8x256xf32> to vector<8x128xf32>
    %384 = vector.extract_strided_slice %382 {offsets = [0, 128], sizes = [8, 128], strides = [1, 1]} : vector<8x256xf32> to vector<8x128xf32>
    %385 = arith.negf %383 : vector<8x128xf32>
    %386 = math.exp %385 : vector<8x128xf32>
    %cst_117 = arith.constant 1.000000e+00 : f32
    %387 = vector.broadcast %cst_117 : f32 to vector<8x128xf32>
    %388 = arith.addf %387, %386 : vector<8x128xf32>
    %389 = arith.divf %387, %388 : vector<8x128xf32>
    %390 = arith.mulf %383, %389 : vector<8x128xf32>
    %391 = arith.mulf %390, %384 : vector<8x128xf32>
    %c1_118 = arith.constant 1 : index
    %c0_119 = arith.constant 0 : index
    %c0_120 = arith.constant 0 : index
    %392 = vector.load %arg9[%c1_118, %c0_119, %c0_120] : memref<2x128x64xbf16, #tpu.memory_space<vmem>>, vector<1x128x64xbf16>
    %393 = vector.shape_cast %392 : vector<1x128x64xbf16> to vector<128x64xbf16>
    %394 = arith.truncf %391 : vector<8x128xf32> to vector<8x128xbf16>
    %cst_121 = arith.constant dense<0.000000e+00> : vector<8x64xf32>
    %395 = tpu.matmul %394, %393, %cst_121 {dimension_numbers = #tpu.dot_dimension_numbers<[1], [0], [0], [1], [0, 0, 1, 1], [], []>} : vector<8x128xbf16>, vector<128x64xbf16>, vector<8x64xf32> -> vector<8x64xf32>
    %396 = arith.addf %364, %395 : vector<8x64xf32>
    %c0_122 = arith.constant 0 : index
    %c0_123 = arith.constant 0 : index
    %397 = vector.load %arg10[%c0_122, %c0_123] : memref<1x64xf32, #tpu.memory_space<vmem>>, vector<1x64xf32>
    %398 = arith.mulf %396, %396 : vector<8x64xf32>
    %cst_124 = arith.constant dense<0.000000e+00> : vector<8xf32>
    %399 = vector.multi_reduction <add>, %398, %cst_124 [1] : vector<8x64xf32> to vector<8xf32>
    %400 = vector.shape_cast %399 : vector<8xf32> to vector<8x1xf32>
    %cst_125 = arith.constant 6.400000e+01 : f32
    %401 = vector.broadcast %cst_125 : f32 to vector<8x1xf32>
    %402 = arith.divf %400, %401 : vector<8x1xf32>
    %cst_126 = arith.constant 9.99999997E-7 : f32
    %403 = vector.broadcast %cst_126 : f32 to vector<8x1xf32>
    %404 = arith.addf %402, %403 : vector<8x1xf32>
    %405 = math.rsqrt %404 : vector<8x1xf32>
    %406 = vector.broadcast %405 : vector<8x1xf32> to vector<8x64xf32>
    %407 = arith.mulf %396, %406 : vector<8x64xf32>
    %408 = vector.broadcast %397 : vector<1x64xf32> to vector<8x64xf32>
    %409 = arith.mulf %407, %408 : vector<8x64xf32>
    %c0_127 = arith.constant 0 : index
    %c0_128 = arith.constant 0 : index
    %410 = vector.load %arg11[%c0_127, %c0_128] : memref<256x64xbf16, #tpu.memory_space<vmem>>, vector<256x64xbf16>
    %411 = arith.truncf %409 : vector<8x64xf32> to vector<8x64xbf16>
    %cst_129 = arith.constant dense<0.000000e+00> : vector<8x256xf32>
    %412 = tpu.matmul %411, %410, %cst_129 {dimension_numbers = #tpu.dot_dimension_numbers<[1], [1], [0], [0], [0, 0, 1, 0], [], []>} : vector<8x64xbf16>, vector<256x64xbf16>, vector<8x256xf32> -> vector<8x256xf32>
    %cst_130 = arith.constant dense<0xFF800000> : vector<8xf32>
    %413 = vector.multi_reduction <maximumf>, %412, %cst_130 [1] : vector<8x256xf32> to vector<8xf32>
    %414 = vector.shape_cast %413 : vector<8xf32> to vector<8x1xf32>
    %415 = tpu.iota {dimensions = array<i32: 1>} : vector<8x256xi32>
    %416 = vector.broadcast %414 : vector<8x1xf32> to vector<8x256xf32>
    %417 = arith.cmpf oge, %412, %416 : vector<8x256xf32>
    %c256_i32 = arith.constant 256 : i32
    %418 = vector.broadcast %c256_i32 : i32 to vector<8x256xi32>
    %419 = arith.select %417, %415, %418 : vector<8x256xi1>, vector<8x256xi32>
    %cst_131 = arith.constant dense<2147483647> : vector<8xi32>
    %420 = vector.multi_reduction <minsi>, %419, %cst_131 [1] : vector<8x256xi32> to vector<8xi32>
    %421 = vector.shape_cast %420 : vector<8xi32> to vector<8x1xi32>
    %c0_132 = arith.constant 0 : index
    %c0_133 = arith.constant 0 : index
    %c0_134 = arith.constant 0 : index
    %422 = vector.load %arg12[%c0_132, %c0_133, %c0_134] : memref<1x8x1xi32, #tpu.memory_space<vmem>>, vector<1x8x1xi32>
    %423 = vector.shape_cast %422 : vector<1x8x1xi32> to vector<8x1xi32>
    %424 = vector.shape_cast %421 : vector<8x1xi32> to vector<1x8x1xi32>
    tpu.vector_store %arg12[%c0_132, %c0_133, %c0_134], %424 {strides = array<i32>} : memref<1x8x1xi32, #tpu.memory_space<vmem>>, vector<1x8x1xi32>,
    return
  }
  func.func @transform_0(%arg0: i32) -> (i32, i32, i32) {
    %c0_i32 = arith.constant 0 : i32
    %c0_i32_0 = arith.constant 0 : i32
    %c0_i32_1 = arith.constant 0 : i32
    return %arg0, %c0_i32, %c0_i32_0 : i32, i32, i32
  }
  func.func @transform_1(%arg0: i32) -> (i32, i32) {
    %c0_i32 = arith.constant 0 : i32
    %c0_i32_0 = arith.constant 0 : i32
    %c0_i32_1 = arith.constant 0 : i32
    return %c0_i32, %c0_i32_0 : i32, i32
  }
  func.func @transform_2(%arg0: i32) -> (i32, i32) {
    %c0_i32 = arith.constant 0 : i32
    %c0_i32_0 = arith.constant 0 : i32
    %c0_i32_1 = arith.constant 0 : i32
    return %c0_i32, %c0_i32_0 : i32, i32
  }
  func.func @transform_3(%arg0: i32) -> (i32, i32, i32) {
    %c0_i32 = arith.constant 0 : i32
    %c0_i32_0 = arith.constant 0 : i32
    %c0_i32_1 = arith.constant 0 : i32
    %c0_i32_2 = arith.constant 0 : i32
    return %c0_i32, %c0_i32_0, %c0_i32_1 : i32, i32, i32
  }
  func.func @transform_4(%arg0: i32) -> (i32, i32, i32) {
    %c0_i32 = arith.constant 0 : i32
    %c0_i32_0 = arith.constant 0 : i32
    %c0_i32_1 = arith.constant 0 : i32
    %c0_i32_2 = arith.constant 0 : i32
    return %c0_i32, %c0_i32_0, %c0_i32_1 : i32, i32, i32
  }
  func.func @transform_5(%arg0: i32) -> (i32, i32, i32) {
    %c0_i32 = arith.constant 0 : i32
    %c0_i32_0 = arith.constant 0 : i32
    %c0_i32_1 = arith.constant 0 : i32
    %c0_i32_2 = arith.constant 0 : i32
    return %c0_i32, %c0_i32_0, %c0_i32_1 : i32, i32, i32
  }
  func.func @transform_6(%arg0: i32) -> (i32, i32, i32) {
    %c0_i32 = arith.constant 0 : i32
    %c0_i32_0 = arith.constant 0 : i32
    %c0_i32_1 = arith.constant 0 : i32
    %c0_i32_2 = arith.constant 0 : i32
    return %c0_i32, %c0_i32_0, %c0_i32_1 : i32, i32, i32
  }
  func.func @transform_7(%arg0: i32) -> (i32, i32, i32) {
    %c0_i32 = arith.constant 0 : i32
    %c0_i32_0 = arith.constant 0 : i32
    %c0_i32_1 = arith.constant 0 : i32
    %c0_i32_2 = arith.constant 0 : i32
    return %c0_i32, %c0_i32_0, %c0_i32_1 : i32, i32, i32
  }
  func.func @transform_8(%arg0: i32) -> (i32, i32, i32) {
    %c0_i32 = arith.constant 0 : i32
    %c0_i32_0 = arith.constant 0 : i32
    %c0_i32_1 = arith.constant 0 : i32
    %c0_i32_2 = arith.constant 0 : i32
    return %c0_i32, %c0_i32_0, %c0_i32_1 : i32, i32, i32
  }
  func.func @transform_9(%arg0: i32) -> (i32, i32) {
    %c0_i32 = arith.constant 0 : i32
    %c0_i32_0 = arith.constant 0 : i32
    %c0_i32_1 = arith.constant 0 : i32
    return %c0_i32, %c0_i32_0 : i32, i32
  }
  func.func @transform_10(%arg0: i32) -> (i32, i32) {
    %c0_i32 = arith.constant 0 : i32
    %c0_i32_0 = arith.constant 0 : i32
    %c0_i32_1 = arith.constant 0 : i32
    return %c0_i32, %c0_i32_0 : i32, i32
  }
  func.func @transform_11(%arg0: i32) -> (i32, i32, i32) {
    %c0_i32 = arith.constant 0 : i32
    %c0_i32_0 = arith.constant 0 : i32
    %c0_i32_1 = arith.constant 0 : i32
    return %arg0, %c0_i32, %c0_i32_0 : i32, i32, i32
  }
}

module attributes {stable_mosaic.version = 11 : i64} {
  func.func @kernel(%arg0: i32, %arg1: memref<1x8x64xf32, #tpu.memory_space<vmem>>, %arg2: memref<8x16xf32, #tpu.memory_space<vmem>>, %arg3: memref<8x16xf32, #tpu.memory_space<vmem>>, %arg4: memref<2x1x64xf32, #tpu.memory_space<vmem>>, %arg5: memref<2x64x128xbf16, #tpu.memory_space<vmem>>, %arg6: memref<2x64x64xbf16, #tpu.memory_space<vmem>>, %arg7: memref<2x1x64xf32, #tpu.memory_space<vmem>>, %arg8: memref<2x64x256xbf16, #tpu.memory_space<vmem>>, %arg9: memref<2x128x64xbf16, #tpu.memory_space<vmem>>, %arg10: memref<1x64xf32, #tpu.memory_space<vmem>>, %arg11: memref<256x64xbf16, #tpu.memory_space<vmem>>, %arg12: memref<1x8x256xf32, #tpu.memory_space<vmem>>) attributes {dimension_semantics = [#tpu.dimension_semantics<parallel>], iteration_bounds = array<i64: 2>, scalar_prefetch = 0 : i64, scratch_operands = 0 : i64, tpu.core_type = #tpu.core_type<tc>, window_params = [{transform_indices = @transform_0, window_bounds = array<i64: 1, 8, 64>}, {pipeline_mode = #tpu.pipeline_mode<synchronous>, transform_indices = @transform_1, window_bounds = array<i64: 8, 16>}, {pipeline_mode = #tpu.pipeline_mode<synchronous>, transform_indices = @transform_2, window_bounds = array<i64: 8, 16>}, {pipeline_mode = #tpu.pipeline_mode<synchronous>, transform_indices = @transform_3, window_bounds = array<i64: 2, 1, 64>}, {pipeline_mode = #tpu.pipeline_mode<synchronous>, transform_indices = @transform_4, window_bounds = array<i64: 2, 64, 128>}, {pipeline_mode = #tpu.pipeline_mode<synchronous>, transform_indices = @transform_5, window_bounds = array<i64: 2, 64, 64>}, {pipeline_mode = #tpu.pipeline_mode<synchronous>, transform_indices = @transform_6, window_bounds = array<i64: 2, 1, 64>}, {pipeline_mode = #tpu.pipeline_mode<synchronous>, transform_indices = @transform_7, window_bounds = array<i64: 2, 64, 256>}, {pipeline_mode = #tpu.pipeline_mode<synchronous>, transform_indices = @transform_8, window_bounds = array<i64: 2, 128, 64>}, {pipeline_mode = #tpu.pipeline_mode<synchronous>, transform_indices = @transform_9, window_bounds = array<i64: 1, 64>}, {pipeline_mode = #tpu.pipeline_mode<synchronous>, transform_indices = @transform_10, window_bounds = array<i64: 256, 64>}, {transform_indices = @transform_11, window_bounds = array<i64: 1, 8, 256>}]} {
    %c0 = arith.constant 0 : index
    %c0_0 = arith.constant 0 : index
    %c0_1 = arith.constant 0 : index
    %0 = vector.load %arg1[%c0, %c0_0, %c0_1] : memref<1x8x64xf32, #tpu.memory_space<vmem>>, vector<1x8x64xf32>
    %1 = vector.shape_cast %0 : vector<1x8x64xf32> to vector<8x64xf32>
    %c0_2 = arith.constant 0 : index
    %c0_3 = arith.constant 0 : index
    %2 = vector.load %arg2[%c0_2, %c0_3] : memref<8x16xf32, #tpu.memory_space<vmem>>, vector<8x16xf32>
    %c0_4 = arith.constant 0 : index
    %c0_5 = arith.constant 0 : index
    %3 = vector.load %arg3[%c0_4, %c0_5] : memref<8x16xf32, #tpu.memory_space<vmem>>, vector<8x16xf32>
    %4 = tpu.iota {dimensions = array<i32: 0>} : vector<8x8xi32>
    %5 = tpu.iota {dimensions = array<i32: 1>} : vector<8x8xi32>
    %6 = arith.cmpi sge, %4, %5 : vector<8x8xi32>
    %c0_6 = arith.constant 0 : index
    %c0_7 = arith.constant 0 : index
    %c0_8 = arith.constant 0 : index
    %7 = vector.load %arg4[%c0_6, %c0_7, %c0_8] : memref<2x1x64xf32, #tpu.memory_space<vmem>>, vector<1x1x64xf32>
    %8 = vector.shape_cast %7 : vector<1x1x64xf32> to vector<1x64xf32>
    %9 = arith.mulf %1, %1 : vector<8x64xf32>
    %cst = arith.constant dense<0.000000e+00> : vector<8xf32>
    %10 = vector.multi_reduction <add>, %9, %cst [1] : vector<8x64xf32> to vector<8xf32>
    %11 = vector.shape_cast %10 : vector<8xf32> to vector<8x1xf32>
    %cst_9 = arith.constant 6.400000e+01 : f32
    %12 = vector.broadcast %cst_9 : f32 to vector<8x1xf32>
    %13 = arith.divf %11, %12 : vector<8x1xf32>
    %cst_10 = arith.constant 9.99999997E-7 : f32
    %14 = vector.broadcast %cst_10 : f32 to vector<8x1xf32>
    %15 = arith.addf %13, %14 : vector<8x1xf32>
    %16 = math.rsqrt %15 : vector<8x1xf32>
    %17 = vector.broadcast %16 : vector<8x1xf32> to vector<8x64xf32>
    %18 = arith.mulf %1, %17 : vector<8x64xf32>
    %19 = vector.broadcast %8 : vector<1x64xf32> to vector<8x64xf32>
    %20 = arith.mulf %18, %19 : vector<8x64xf32>
    %c0_11 = arith.constant 0 : index
    %c0_12 = arith.constant 0 : index
    %c0_13 = arith.constant 0 : index
    %21 = vector.load %arg5[%c0_11, %c0_12, %c0_13] : memref<2x64x128xbf16, #tpu.memory_space<vmem>>, vector<1x64x128xbf16>
    %22 = vector.shape_cast %21 : vector<1x64x128xbf16> to vector<64x128xbf16>
    %23 = arith.truncf %20 : vector<8x64xf32> to vector<8x64xbf16>
    %cst_14 = arith.constant dense<0.000000e+00> : vector<8x128xf32>
    %24 = tpu.matmul %23, %22, %cst_14 {dimension_numbers = #tpu.dot_dimension_numbers<[1], [0], [0], [1], [0, 0, 1, 1], [], []>} : vector<8x64xbf16>, vector<64x128xbf16>, vector<8x128xf32> -> vector<8x128xf32>
    %25 = vector.extract_strided_slice %24 {offsets = [0, 0], sizes = [8, 64], strides = [1, 1]} : vector<8x128xf32> to vector<8x64xf32>
    %26 = vector.extract_strided_slice %24 {offsets = [0, 64], sizes = [8, 32], strides = [1, 1]} : vector<8x128xf32> to vector<8x32xf32>
    %27 = vector.extract_strided_slice %24 {offsets = [0, 96], sizes = [8, 32], strides = [1, 1]} : vector<8x128xf32> to vector<8x32xf32>
    %28 = vector.extract_strided_slice %26 {offsets = [0, 0], sizes = [8, 16], strides = [1, 1]} : vector<8x32xf32> to vector<8x16xf32>
    %29 = vector.extract_strided_slice %28 {offsets = [0, 8], sizes = [8, 8], strides = [1, 1]} : vector<8x16xf32> to vector<8x8xf32>
    %cst_15 = arith.constant 0.000000e+00 : f32
    %30 = vector.broadcast %cst_15 : f32 to vector<8x8xf32>
    %31 = arith.subf %30, %29 : vector<8x8xf32>
    %32 = vector.extract_strided_slice %28 {offsets = [0, 0], sizes = [8, 8], strides = [1, 1]} : vector<8x16xf32> to vector<8x8xf32>
    %33 = tpu.concatenate %31, %32 in 1 : vector<8x8xf32>, vector<8x8xf32> -> vector<8x16xf32>
    %34 = arith.mulf %28, %2 : vector<8x16xf32>
    %35 = arith.mulf %33, %3 : vector<8x16xf32>
    %36 = arith.addf %34, %35 : vector<8x16xf32>
    %37 = vector.extract_strided_slice %26 {offsets = [0, 16], sizes = [8, 16], strides = [1, 1]} : vector<8x32xf32> to vector<8x16xf32>
    %38 = vector.extract_strided_slice %37 {offsets = [0, 8], sizes = [8, 8], strides = [1, 1]} : vector<8x16xf32> to vector<8x8xf32>
    %cst_16 = arith.constant 0.000000e+00 : f32
    %39 = vector.broadcast %cst_16 : f32 to vector<8x8xf32>
    %40 = arith.subf %39, %38 : vector<8x8xf32>
    %41 = vector.extract_strided_slice %37 {offsets = [0, 0], sizes = [8, 8], strides = [1, 1]} : vector<8x16xf32> to vector<8x8xf32>
    %42 = tpu.concatenate %40, %41 in 1 : vector<8x8xf32>, vector<8x8xf32> -> vector<8x16xf32>
    %43 = arith.mulf %37, %2 : vector<8x16xf32>
    %44 = arith.mulf %42, %3 : vector<8x16xf32>
    %45 = arith.addf %43, %44 : vector<8x16xf32>
    %46 = vector.extract_strided_slice %27 {offsets = [0, 0], sizes = [8, 16], strides = [1, 1]} : vector<8x32xf32> to vector<8x16xf32>
    %47 = vector.extract_strided_slice %27 {offsets = [0, 16], sizes = [8, 16], strides = [1, 1]} : vector<8x32xf32> to vector<8x16xf32>
    %48 = vector.extract_strided_slice %25 {offsets = [0, 0], sizes = [8, 16], strides = [1, 1]} : vector<8x64xf32> to vector<8x16xf32>
    %49 = vector.extract_strided_slice %48 {offsets = [0, 8], sizes = [8, 8], strides = [1, 1]} : vector<8x16xf32> to vector<8x8xf32>
    %cst_17 = arith.constant 0.000000e+00 : f32
    %50 = vector.broadcast %cst_17 : f32 to vector<8x8xf32>
    %51 = arith.subf %50, %49 : vector<8x8xf32>
    %52 = vector.extract_strided_slice %48 {offsets = [0, 0], sizes = [8, 8], strides = [1, 1]} : vector<8x16xf32> to vector<8x8xf32>
    %53 = tpu.concatenate %51, %52 in 1 : vector<8x8xf32>, vector<8x8xf32> -> vector<8x16xf32>
    %54 = arith.mulf %48, %2 : vector<8x16xf32>
    %55 = arith.mulf %53, %3 : vector<8x16xf32>
    %56 = arith.addf %54, %55 : vector<8x16xf32>
    %57 = arith.truncf %56 : vector<8x16xf32> to vector<8x16xbf16>
    %58 = arith.truncf %36 : vector<8x16xf32> to vector<8x16xbf16>
    %cst_18 = arith.constant dense<0.000000e+00> : vector<8x8xf32>
    %59 = tpu.matmul %57, %58, %cst_18 {dimension_numbers = #tpu.dot_dimension_numbers<[1], [1], [0], [0], [0, 0, 1, 0], [], []>} : vector<8x16xbf16>, vector<8x16xbf16>, vector<8x8xf32> -> vector<8x8xf32>
    %cst_19 = arith.constant 2.500000e-01 : f32
    %60 = vector.broadcast %cst_19 : f32 to vector<8x8xf32>
    %61 = arith.mulf %59, %60 : vector<8x8xf32>
    %cst_20 = arith.constant -1.000000e+30 : f32
    %62 = vector.broadcast %cst_20 : f32 to vector<8x8xf32>
    %63 = arith.select %6, %61, %62 : vector<8x8xi1>, vector<8x8xf32>
    %cst_21 = arith.constant dense<0xFF800000> : vector<8xf32>
    %64 = vector.multi_reduction <maximumf>, %63, %cst_21 [1] : vector<8x8xf32> to vector<8xf32>
    %65 = vector.shape_cast %64 : vector<8xf32> to vector<8x1xf32>
    %66 = vector.broadcast %65 : vector<8x1xf32> to vector<8x8xf32>
    %67 = arith.subf %63, %66 : vector<8x8xf32>
    %68 = math.exp %67 : vector<8x8xf32>
    %cst_22 = arith.constant dense<0.000000e+00> : vector<8xf32>
    %69 = vector.multi_reduction <add>, %68, %cst_22 [1] : vector<8x8xf32> to vector<8xf32>
    %70 = vector.shape_cast %69 : vector<8xf32> to vector<8x1xf32>
    %71 = tpu.reciprocal %70 {approx = true} : vector<8x1xf32> -> vector<8x1xf32>
    %72 = vector.broadcast %71 : vector<8x1xf32> to vector<8x8xf32>
    %73 = arith.mulf %68, %72 : vector<8x8xf32>
    %74 = arith.truncf %73 : vector<8x8xf32> to vector<8x8xbf16>
    %75 = arith.truncf %46 : vector<8x16xf32> to vector<8x16xbf16>
    %cst_23 = arith.constant dense<0.000000e+00> : vector<8x16xf32>
    %76 = tpu.matmul %74, %75, %cst_23 {dimension_numbers = #tpu.dot_dimension_numbers<[1], [0], [0], [1], [0, 0, 1, 1], [], []>} : vector<8x8xbf16>, vector<8x16xbf16>, vector<8x16xf32> -> vector<8x16xf32>
    %77 = vector.extract_strided_slice %25 {offsets = [0, 16], sizes = [8, 16], strides = [1, 1]} : vector<8x64xf32> to vector<8x16xf32>
    %78 = vector.extract_strided_slice %77 {offsets = [0, 8], sizes = [8, 8], strides = [1, 1]} : vector<8x16xf32> to vector<8x8xf32>
    %cst_24 = arith.constant 0.000000e+00 : f32
    %79 = vector.broadcast %cst_24 : f32 to vector<8x8xf32>
    %80 = arith.subf %79, %78 : vector<8x8xf32>
    %81 = vector.extract_strided_slice %77 {offsets = [0, 0], sizes = [8, 8], strides = [1, 1]} : vector<8x16xf32> to vector<8x8xf32>
    %82 = tpu.concatenate %80, %81 in 1 : vector<8x8xf32>, vector<8x8xf32> -> vector<8x16xf32>
    %83 = arith.mulf %77, %2 : vector<8x16xf32>
    %84 = arith.mulf %82, %3 : vector<8x16xf32>
    %85 = arith.addf %83, %84 : vector<8x16xf32>
    %86 = arith.truncf %85 : vector<8x16xf32> to vector<8x16xbf16>
    %87 = arith.truncf %36 : vector<8x16xf32> to vector<8x16xbf16>
    %cst_25 = arith.constant dense<0.000000e+00> : vector<8x8xf32>
    %88 = tpu.matmul %86, %87, %cst_25 {dimension_numbers = #tpu.dot_dimension_numbers<[1], [1], [0], [0], [0, 0, 1, 0], [], []>} : vector<8x16xbf16>, vector<8x16xbf16>, vector<8x8xf32> -> vector<8x8xf32>
    %cst_26 = arith.constant 2.500000e-01 : f32
    %89 = vector.broadcast %cst_26 : f32 to vector<8x8xf32>
    %90 = arith.mulf %88, %89 : vector<8x8xf32>
    %cst_27 = arith.constant -1.000000e+30 : f32
    %91 = vector.broadcast %cst_27 : f32 to vector<8x8xf32>
    %92 = arith.select %6, %90, %91 : vector<8x8xi1>, vector<8x8xf32>
    %cst_28 = arith.constant dense<0xFF800000> : vector<8xf32>
    %93 = vector.multi_reduction <maximumf>, %92, %cst_28 [1] : vector<8x8xf32> to vector<8xf32>
    %94 = vector.shape_cast %93 : vector<8xf32> to vector<8x1xf32>
    %95 = vector.broadcast %94 : vector<8x1xf32> to vector<8x8xf32>
    %96 = arith.subf %92, %95 : vector<8x8xf32>
    %97 = math.exp %96 : vector<8x8xf32>
    %cst_29 = arith.constant dense<0.000000e+00> : vector<8xf32>
    %98 = vector.multi_reduction <add>, %97, %cst_29 [1] : vector<8x8xf32> to vector<8xf32>
    %99 = vector.shape_cast %98 : vector<8xf32> to vector<8x1xf32>
    %100 = tpu.reciprocal %99 {approx = true} : vector<8x1xf32> -> vector<8x1xf32>
    %101 = vector.broadcast %100 : vector<8x1xf32> to vector<8x8xf32>
    %102 = arith.mulf %97, %101 : vector<8x8xf32>
    %103 = arith.truncf %102 : vector<8x8xf32> to vector<8x8xbf16>
    %104 = arith.truncf %46 : vector<8x16xf32> to vector<8x16xbf16>
    %cst_30 = arith.constant dense<0.000000e+00> : vector<8x16xf32>
    %105 = tpu.matmul %103, %104, %cst_30 {dimension_numbers = #tpu.dot_dimension_numbers<[1], [0], [0], [1], [0, 0, 1, 1], [], []>} : vector<8x8xbf16>, vector<8x16xbf16>, vector<8x16xf32> -> vector<8x16xf32>
    %106 = vector.extract_strided_slice %25 {offsets = [0, 32], sizes = [8, 16], strides = [1, 1]} : vector<8x64xf32> to vector<8x16xf32>
    %107 = vector.extract_strided_slice %106 {offsets = [0, 8], sizes = [8, 8], strides = [1, 1]} : vector<8x16xf32> to vector<8x8xf32>
    %cst_31 = arith.constant 0.000000e+00 : f32
    %108 = vector.broadcast %cst_31 : f32 to vector<8x8xf32>
    %109 = arith.subf %108, %107 : vector<8x8xf32>
    %110 = vector.extract_strided_slice %106 {offsets = [0, 0], sizes = [8, 8], strides = [1, 1]} : vector<8x16xf32> to vector<8x8xf32>
    %111 = tpu.concatenate %109, %110 in 1 : vector<8x8xf32>, vector<8x8xf32> -> vector<8x16xf32>
    %112 = arith.mulf %106, %2 : vector<8x16xf32>
    %113 = arith.mulf %111, %3 : vector<8x16xf32>
    %114 = arith.addf %112, %113 : vector<8x16xf32>
    %115 = arith.truncf %114 : vector<8x16xf32> to vector<8x16xbf16>
    %116 = arith.truncf %45 : vector<8x16xf32> to vector<8x16xbf16>
    %cst_32 = arith.constant dense<0.000000e+00> : vector<8x8xf32>
    %117 = tpu.matmul %115, %116, %cst_32 {dimension_numbers = #tpu.dot_dimension_numbers<[1], [1], [0], [0], [0, 0, 1, 0], [], []>} : vector<8x16xbf16>, vector<8x16xbf16>, vector<8x8xf32> -> vector<8x8xf32>
    %cst_33 = arith.constant 2.500000e-01 : f32
    %118 = vector.broadcast %cst_33 : f32 to vector<8x8xf32>
    %119 = arith.mulf %117, %118 : vector<8x8xf32>
    %cst_34 = arith.constant -1.000000e+30 : f32
    %120 = vector.broadcast %cst_34 : f32 to vector<8x8xf32>
    %121 = arith.select %6, %119, %120 : vector<8x8xi1>, vector<8x8xf32>
    %cst_35 = arith.constant dense<0xFF800000> : vector<8xf32>
    %122 = vector.multi_reduction <maximumf>, %121, %cst_35 [1] : vector<8x8xf32> to vector<8xf32>
    %123 = vector.shape_cast %122 : vector<8xf32> to vector<8x1xf32>
    %124 = vector.broadcast %123 : vector<8x1xf32> to vector<8x8xf32>
    %125 = arith.subf %121, %124 : vector<8x8xf32>
    %126 = math.exp %125 : vector<8x8xf32>
    %cst_36 = arith.constant dense<0.000000e+00> : vector<8xf32>
    %127 = vector.multi_reduction <add>, %126, %cst_36 [1] : vector<8x8xf32> to vector<8xf32>
    %128 = vector.shape_cast %127 : vector<8xf32> to vector<8x1xf32>
    %129 = tpu.reciprocal %128 {approx = true} : vector<8x1xf32> -> vector<8x1xf32>
    %130 = vector.broadcast %129 : vector<8x1xf32> to vector<8x8xf32>
    %131 = arith.mulf %126, %130 : vector<8x8xf32>
    %132 = arith.truncf %131 : vector<8x8xf32> to vector<8x8xbf16>
    %133 = arith.truncf %47 : vector<8x16xf32> to vector<8x16xbf16>
    %cst_37 = arith.constant dense<0.000000e+00> : vector<8x16xf32>
    %134 = tpu.matmul %132, %133, %cst_37 {dimension_numbers = #tpu.dot_dimension_numbers<[1], [0], [0], [1], [0, 0, 1, 1], [], []>} : vector<8x8xbf16>, vector<8x16xbf16>, vector<8x16xf32> -> vector<8x16xf32>
    %135 = vector.extract_strided_slice %25 {offsets = [0, 48], sizes = [8, 16], strides = [1, 1]} : vector<8x64xf32> to vector<8x16xf32>
    %136 = vector.extract_strided_slice %135 {offsets = [0, 8], sizes = [8, 8], strides = [1, 1]} : vector<8x16xf32> to vector<8x8xf32>
    %cst_38 = arith.constant 0.000000e+00 : f32
    %137 = vector.broadcast %cst_38 : f32 to vector<8x8xf32>
    %138 = arith.subf %137, %136 : vector<8x8xf32>
    %139 = vector.extract_strided_slice %135 {offsets = [0, 0], sizes = [8, 8], strides = [1, 1]} : vector<8x16xf32> to vector<8x8xf32>
    %140 = tpu.concatenate %138, %139 in 1 : vector<8x8xf32>, vector<8x8xf32> -> vector<8x16xf32>
    %141 = arith.mulf %135, %2 : vector<8x16xf32>
    %142 = arith.mulf %140, %3 : vector<8x16xf32>
    %143 = arith.addf %141, %142 : vector<8x16xf32>
    %144 = arith.truncf %143 : vector<8x16xf32> to vector<8x16xbf16>
    %145 = arith.truncf %45 : vector<8x16xf32> to vector<8x16xbf16>
    %cst_39 = arith.constant dense<0.000000e+00> : vector<8x8xf32>
    %146 = tpu.matmul %144, %145, %cst_39 {dimension_numbers = #tpu.dot_dimension_numbers<[1], [1], [0], [0], [0, 0, 1, 0], [], []>} : vector<8x16xbf16>, vector<8x16xbf16>, vector<8x8xf32> -> vector<8x8xf32>
    %cst_40 = arith.constant 2.500000e-01 : f32
    %147 = vector.broadcast %cst_40 : f32 to vector<8x8xf32>
    %148 = arith.mulf %146, %147 : vector<8x8xf32>
    %cst_41 = arith.constant -1.000000e+30 : f32
    %149 = vector.broadcast %cst_41 : f32 to vector<8x8xf32>
    %150 = arith.select %6, %148, %149 : vector<8x8xi1>, vector<8x8xf32>
    %cst_42 = arith.constant dense<0xFF800000> : vector<8xf32>
    %151 = vector.multi_reduction <maximumf>, %150, %cst_42 [1] : vector<8x8xf32> to vector<8xf32>
    %152 = vector.shape_cast %151 : vector<8xf32> to vector<8x1xf32>
    %153 = vector.broadcast %152 : vector<8x1xf32> to vector<8x8xf32>
    %154 = arith.subf %150, %153 : vector<8x8xf32>
    %155 = math.exp %154 : vector<8x8xf32>
    %cst_43 = arith.constant dense<0.000000e+00> : vector<8xf32>
    %156 = vector.multi_reduction <add>, %155, %cst_43 [1] : vector<8x8xf32> to vector<8xf32>
    %157 = vector.shape_cast %156 : vector<8xf32> to vector<8x1xf32>
    %158 = tpu.reciprocal %157 {approx = true} : vector<8x1xf32> -> vector<8x1xf32>
    %159 = vector.broadcast %158 : vector<8x1xf32> to vector<8x8xf32>
    %160 = arith.mulf %155, %159 : vector<8x8xf32>
    %161 = arith.truncf %160 : vector<8x8xf32> to vector<8x8xbf16>
    %162 = arith.truncf %47 : vector<8x16xf32> to vector<8x16xbf16>
    %cst_44 = arith.constant dense<0.000000e+00> : vector<8x16xf32>
    %163 = tpu.matmul %161, %162, %cst_44 {dimension_numbers = #tpu.dot_dimension_numbers<[1], [0], [0], [1], [0, 0, 1, 1], [], []>} : vector<8x8xbf16>, vector<8x16xbf16>, vector<8x16xf32> -> vector<8x16xf32>
    %164 = tpu.concatenate %76, %105, %134, %163 in 1 : vector<8x16xf32>, vector<8x16xf32>, vector<8x16xf32>, vector<8x16xf32> -> vector<8x64xf32>
    %c0_45 = arith.constant 0 : index
    %c0_46 = arith.constant 0 : index
    %c0_47 = arith.constant 0 : index
    %165 = vector.load %arg6[%c0_45, %c0_46, %c0_47] : memref<2x64x64xbf16, #tpu.memory_space<vmem>>, vector<1x64x64xbf16>
    %166 = vector.shape_cast %165 : vector<1x64x64xbf16> to vector<64x64xbf16>
    %167 = arith.truncf %164 : vector<8x64xf32> to vector<8x64xbf16>
    %cst_48 = arith.constant dense<0.000000e+00> : vector<8x64xf32>
    %168 = tpu.matmul %167, %166, %cst_48 {dimension_numbers = #tpu.dot_dimension_numbers<[1], [0], [0], [1], [0, 0, 1, 1], [], []>} : vector<8x64xbf16>, vector<64x64xbf16>, vector<8x64xf32> -> vector<8x64xf32>
    %169 = arith.addf %1, %168 : vector<8x64xf32>
    %c0_49 = arith.constant 0 : index
    %c0_50 = arith.constant 0 : index
    %c0_51 = arith.constant 0 : index
    %170 = vector.load %arg7[%c0_49, %c0_50, %c0_51] : memref<2x1x64xf32, #tpu.memory_space<vmem>>, vector<1x1x64xf32>
    %171 = vector.shape_cast %170 : vector<1x1x64xf32> to vector<1x64xf32>
    %172 = arith.mulf %169, %169 : vector<8x64xf32>
    %cst_52 = arith.constant dense<0.000000e+00> : vector<8xf32>
    %173 = vector.multi_reduction <add>, %172, %cst_52 [1] : vector<8x64xf32> to vector<8xf32>
    %174 = vector.shape_cast %173 : vector<8xf32> to vector<8x1xf32>
    %cst_53 = arith.constant 6.400000e+01 : f32
    %175 = vector.broadcast %cst_53 : f32 to vector<8x1xf32>
    %176 = arith.divf %174, %175 : vector<8x1xf32>
    %cst_54 = arith.constant 9.99999997E-7 : f32
    %177 = vector.broadcast %cst_54 : f32 to vector<8x1xf32>
    %178 = arith.addf %176, %177 : vector<8x1xf32>
    %179 = math.rsqrt %178 : vector<8x1xf32>
    %180 = vector.broadcast %179 : vector<8x1xf32> to vector<8x64xf32>
    %181 = arith.mulf %169, %180 : vector<8x64xf32>
    %182 = vector.broadcast %171 : vector<1x64xf32> to vector<8x64xf32>
    %183 = arith.mulf %181, %182 : vector<8x64xf32>
    %c0_55 = arith.constant 0 : index
    %c0_56 = arith.constant 0 : index
    %c0_57 = arith.constant 0 : index
    %184 = vector.load %arg8[%c0_55, %c0_56, %c0_57] : memref<2x64x256xbf16, #tpu.memory_space<vmem>>, vector<1x64x256xbf16>
    %185 = vector.shape_cast %184 : vector<1x64x256xbf16> to vector<64x256xbf16>
    %186 = arith.truncf %183 : vector<8x64xf32> to vector<8x64xbf16>
    %cst_58 = arith.constant dense<0.000000e+00> : vector<8x256xf32>
    %187 = tpu.matmul %186, %185, %cst_58 {dimension_numbers = #tpu.dot_dimension_numbers<[1], [0], [0], [1], [0, 0, 1, 1], [], []>} : vector<8x64xbf16>, vector<64x256xbf16>, vector<8x256xf32> -> vector<8x256xf32>
    %188 = vector.extract_strided_slice %187 {offsets = [0, 0], sizes = [8, 128], strides = [1, 1]} : vector<8x256xf32> to vector<8x128xf32>
    %189 = vector.extract_strided_slice %187 {offsets = [0, 128], sizes = [8, 128], strides = [1, 1]} : vector<8x256xf32> to vector<8x128xf32>
    %190 = arith.negf %188 : vector<8x128xf32>
    %191 = math.exp %190 : vector<8x128xf32>
    %cst_59 = arith.constant 1.000000e+00 : f32
    %192 = vector.broadcast %cst_59 : f32 to vector<8x128xf32>
    %193 = arith.addf %192, %191 : vector<8x128xf32>
    %194 = arith.divf %192, %193 : vector<8x128xf32>
    %195 = arith.mulf %188, %194 : vector<8x128xf32>
    %196 = arith.mulf %195, %189 : vector<8x128xf32>
    %c0_60 = arith.constant 0 : index
    %c0_61 = arith.constant 0 : index
    %c0_62 = arith.constant 0 : index
    %197 = vector.load %arg9[%c0_60, %c0_61, %c0_62] : memref<2x128x64xbf16, #tpu.memory_space<vmem>>, vector<1x128x64xbf16>
    %198 = vector.shape_cast %197 : vector<1x128x64xbf16> to vector<128x64xbf16>
    %199 = arith.truncf %196 : vector<8x128xf32> to vector<8x128xbf16>
    %cst_63 = arith.constant dense<0.000000e+00> : vector<8x64xf32>
    %200 = tpu.matmul %199, %198, %cst_63 {dimension_numbers = #tpu.dot_dimension_numbers<[1], [0], [0], [1], [0, 0, 1, 1], [], []>} : vector<8x128xbf16>, vector<128x64xbf16>, vector<8x64xf32> -> vector<8x64xf32>
    %201 = arith.addf %169, %200 : vector<8x64xf32>
    %c1 = arith.constant 1 : index
    %c0_64 = arith.constant 0 : index
    %c0_65 = arith.constant 0 : index
    %202 = vector.load %arg4[%c1, %c0_64, %c0_65] : memref<2x1x64xf32, #tpu.memory_space<vmem>>, vector<1x1x64xf32>
    %203 = vector.shape_cast %202 : vector<1x1x64xf32> to vector<1x64xf32>
    %204 = arith.mulf %201, %201 : vector<8x64xf32>
    %cst_66 = arith.constant dense<0.000000e+00> : vector<8xf32>
    %205 = vector.multi_reduction <add>, %204, %cst_66 [1] : vector<8x64xf32> to vector<8xf32>
    %206 = vector.shape_cast %205 : vector<8xf32> to vector<8x1xf32>
    %cst_67 = arith.constant 6.400000e+01 : f32
    %207 = vector.broadcast %cst_67 : f32 to vector<8x1xf32>
    %208 = arith.divf %206, %207 : vector<8x1xf32>
    %cst_68 = arith.constant 9.99999997E-7 : f32
    %209 = vector.broadcast %cst_68 : f32 to vector<8x1xf32>
    %210 = arith.addf %208, %209 : vector<8x1xf32>
    %211 = math.rsqrt %210 : vector<8x1xf32>
    %212 = vector.broadcast %211 : vector<8x1xf32> to vector<8x64xf32>
    %213 = arith.mulf %201, %212 : vector<8x64xf32>
    %214 = vector.broadcast %203 : vector<1x64xf32> to vector<8x64xf32>
    %215 = arith.mulf %213, %214 : vector<8x64xf32>
    %c1_69 = arith.constant 1 : index
    %c0_70 = arith.constant 0 : index
    %c0_71 = arith.constant 0 : index
    %216 = vector.load %arg5[%c1_69, %c0_70, %c0_71] : memref<2x64x128xbf16, #tpu.memory_space<vmem>>, vector<1x64x128xbf16>
    %217 = vector.shape_cast %216 : vector<1x64x128xbf16> to vector<64x128xbf16>
    %218 = arith.truncf %215 : vector<8x64xf32> to vector<8x64xbf16>
    %cst_72 = arith.constant dense<0.000000e+00> : vector<8x128xf32>
    %219 = tpu.matmul %218, %217, %cst_72 {dimension_numbers = #tpu.dot_dimension_numbers<[1], [0], [0], [1], [0, 0, 1, 1], [], []>} : vector<8x64xbf16>, vector<64x128xbf16>, vector<8x128xf32> -> vector<8x128xf32>
    %220 = vector.extract_strided_slice %219 {offsets = [0, 0], sizes = [8, 64], strides = [1, 1]} : vector<8x128xf32> to vector<8x64xf32>
    %221 = vector.extract_strided_slice %219 {offsets = [0, 64], sizes = [8, 32], strides = [1, 1]} : vector<8x128xf32> to vector<8x32xf32>
    %222 = vector.extract_strided_slice %219 {offsets = [0, 96], sizes = [8, 32], strides = [1, 1]} : vector<8x128xf32> to vector<8x32xf32>
    %223 = vector.extract_strided_slice %221 {offsets = [0, 0], sizes = [8, 16], strides = [1, 1]} : vector<8x32xf32> to vector<8x16xf32>
    %224 = vector.extract_strided_slice %223 {offsets = [0, 8], sizes = [8, 8], strides = [1, 1]} : vector<8x16xf32> to vector<8x8xf32>
    %cst_73 = arith.constant 0.000000e+00 : f32
    %225 = vector.broadcast %cst_73 : f32 to vector<8x8xf32>
    %226 = arith.subf %225, %224 : vector<8x8xf32>
    %227 = vector.extract_strided_slice %223 {offsets = [0, 0], sizes = [8, 8], strides = [1, 1]} : vector<8x16xf32> to vector<8x8xf32>
    %228 = tpu.concatenate %226, %227 in 1 : vector<8x8xf32>, vector<8x8xf32> -> vector<8x16xf32>
    %229 = arith.mulf %223, %2 : vector<8x16xf32>
    %230 = arith.mulf %228, %3 : vector<8x16xf32>
    %231 = arith.addf %229, %230 : vector<8x16xf32>
    %232 = vector.extract_strided_slice %221 {offsets = [0, 16], sizes = [8, 16], strides = [1, 1]} : vector<8x32xf32> to vector<8x16xf32>
    %233 = vector.extract_strided_slice %232 {offsets = [0, 8], sizes = [8, 8], strides = [1, 1]} : vector<8x16xf32> to vector<8x8xf32>
    %cst_74 = arith.constant 0.000000e+00 : f32
    %234 = vector.broadcast %cst_74 : f32 to vector<8x8xf32>
    %235 = arith.subf %234, %233 : vector<8x8xf32>
    %236 = vector.extract_strided_slice %232 {offsets = [0, 0], sizes = [8, 8], strides = [1, 1]} : vector<8x16xf32> to vector<8x8xf32>
    %237 = tpu.concatenate %235, %236 in 1 : vector<8x8xf32>, vector<8x8xf32> -> vector<8x16xf32>
    %238 = arith.mulf %232, %2 : vector<8x16xf32>
    %239 = arith.mulf %237, %3 : vector<8x16xf32>
    %240 = arith.addf %238, %239 : vector<8x16xf32>
    %241 = vector.extract_strided_slice %222 {offsets = [0, 0], sizes = [8, 16], strides = [1, 1]} : vector<8x32xf32> to vector<8x16xf32>
    %242 = vector.extract_strided_slice %222 {offsets = [0, 16], sizes = [8, 16], strides = [1, 1]} : vector<8x32xf32> to vector<8x16xf32>
    %243 = vector.extract_strided_slice %220 {offsets = [0, 0], sizes = [8, 16], strides = [1, 1]} : vector<8x64xf32> to vector<8x16xf32>
    %244 = vector.extract_strided_slice %243 {offsets = [0, 8], sizes = [8, 8], strides = [1, 1]} : vector<8x16xf32> to vector<8x8xf32>
    %cst_75 = arith.constant 0.000000e+00 : f32
    %245 = vector.broadcast %cst_75 : f32 to vector<8x8xf32>
    %246 = arith.subf %245, %244 : vector<8x8xf32>
    %247 = vector.extract_strided_slice %243 {offsets = [0, 0], sizes = [8, 8], strides = [1, 1]} : vector<8x16xf32> to vector<8x8xf32>
    %248 = tpu.concatenate %246, %247 in 1 : vector<8x8xf32>, vector<8x8xf32> -> vector<8x16xf32>
    %249 = arith.mulf %243, %2 : vector<8x16xf32>
    %250 = arith.mulf %248, %3 : vector<8x16xf32>
    %251 = arith.addf %249, %250 : vector<8x16xf32>
    %252 = arith.truncf %251 : vector<8x16xf32> to vector<8x16xbf16>
    %253 = arith.truncf %231 : vector<8x16xf32> to vector<8x16xbf16>
    %cst_76 = arith.constant dense<0.000000e+00> : vector<8x8xf32>
    %254 = tpu.matmul %252, %253, %cst_76 {dimension_numbers = #tpu.dot_dimension_numbers<[1], [1], [0], [0], [0, 0, 1, 0], [], []>} : vector<8x16xbf16>, vector<8x16xbf16>, vector<8x8xf32> -> vector<8x8xf32>
    %cst_77 = arith.constant 2.500000e-01 : f32
    %255 = vector.broadcast %cst_77 : f32 to vector<8x8xf32>
    %256 = arith.mulf %254, %255 : vector<8x8xf32>
    %cst_78 = arith.constant -1.000000e+30 : f32
    %257 = vector.broadcast %cst_78 : f32 to vector<8x8xf32>
    %258 = arith.select %6, %256, %257 : vector<8x8xi1>, vector<8x8xf32>
    %cst_79 = arith.constant dense<0xFF800000> : vector<8xf32>
    %259 = vector.multi_reduction <maximumf>, %258, %cst_79 [1] : vector<8x8xf32> to vector<8xf32>
    %260 = vector.shape_cast %259 : vector<8xf32> to vector<8x1xf32>
    %261 = vector.broadcast %260 : vector<8x1xf32> to vector<8x8xf32>
    %262 = arith.subf %258, %261 : vector<8x8xf32>
    %263 = math.exp %262 : vector<8x8xf32>
    %cst_80 = arith.constant dense<0.000000e+00> : vector<8xf32>
    %264 = vector.multi_reduction <add>, %263, %cst_80 [1] : vector<8x8xf32> to vector<8xf32>
    %265 = vector.shape_cast %264 : vector<8xf32> to vector<8x1xf32>
    %266 = tpu.reciprocal %265 {approx = true} : vector<8x1xf32> -> vector<8x1xf32>
    %267 = vector.broadcast %266 : vector<8x1xf32> to vector<8x8xf32>
    %268 = arith.mulf %263, %267 : vector<8x8xf32>
    %269 = arith.truncf %268 : vector<8x8xf32> to vector<8x8xbf16>
    %270 = arith.truncf %241 : vector<8x16xf32> to vector<8x16xbf16>
    %cst_81 = arith.constant dense<0.000000e+00> : vector<8x16xf32>
    %271 = tpu.matmul %269, %270, %cst_81 {dimension_numbers = #tpu.dot_dimension_numbers<[1], [0], [0], [1], [0, 0, 1, 1], [], []>} : vector<8x8xbf16>, vector<8x16xbf16>, vector<8x16xf32> -> vector<8x16xf32>
    %272 = vector.extract_strided_slice %220 {offsets = [0, 16], sizes = [8, 16], strides = [1, 1]} : vector<8x64xf32> to vector<8x16xf32>
    %273 = vector.extract_strided_slice %272 {offsets = [0, 8], sizes = [8, 8], strides = [1, 1]} : vector<8x16xf32> to vector<8x8xf32>
    %cst_82 = arith.constant 0.000000e+00 : f32
    %274 = vector.broadcast %cst_82 : f32 to vector<8x8xf32>
    %275 = arith.subf %274, %273 : vector<8x8xf32>
    %276 = vector.extract_strided_slice %272 {offsets = [0, 0], sizes = [8, 8], strides = [1, 1]} : vector<8x16xf32> to vector<8x8xf32>
    %277 = tpu.concatenate %275, %276 in 1 : vector<8x8xf32>, vector<8x8xf32> -> vector<8x16xf32>
    %278 = arith.mulf %272, %2 : vector<8x16xf32>
    %279 = arith.mulf %277, %3 : vector<8x16xf32>
    %280 = arith.addf %278, %279 : vector<8x16xf32>
    %281 = arith.truncf %280 : vector<8x16xf32> to vector<8x16xbf16>
    %282 = arith.truncf %231 : vector<8x16xf32> to vector<8x16xbf16>
    %cst_83 = arith.constant dense<0.000000e+00> : vector<8x8xf32>
    %283 = tpu.matmul %281, %282, %cst_83 {dimension_numbers = #tpu.dot_dimension_numbers<[1], [1], [0], [0], [0, 0, 1, 0], [], []>} : vector<8x16xbf16>, vector<8x16xbf16>, vector<8x8xf32> -> vector<8x8xf32>
    %cst_84 = arith.constant 2.500000e-01 : f32
    %284 = vector.broadcast %cst_84 : f32 to vector<8x8xf32>
    %285 = arith.mulf %283, %284 : vector<8x8xf32>
    %cst_85 = arith.constant -1.000000e+30 : f32
    %286 = vector.broadcast %cst_85 : f32 to vector<8x8xf32>
    %287 = arith.select %6, %285, %286 : vector<8x8xi1>, vector<8x8xf32>
    %cst_86 = arith.constant dense<0xFF800000> : vector<8xf32>
    %288 = vector.multi_reduction <maximumf>, %287, %cst_86 [1] : vector<8x8xf32> to vector<8xf32>
    %289 = vector.shape_cast %288 : vector<8xf32> to vector<8x1xf32>
    %290 = vector.broadcast %289 : vector<8x1xf32> to vector<8x8xf32>
    %291 = arith.subf %287, %290 : vector<8x8xf32>
    %292 = math.exp %291 : vector<8x8xf32>
    %cst_87 = arith.constant dense<0.000000e+00> : vector<8xf32>
    %293 = vector.multi_reduction <add>, %292, %cst_87 [1] : vector<8x8xf32> to vector<8xf32>
    %294 = vector.shape_cast %293 : vector<8xf32> to vector<8x1xf32>
    %295 = tpu.reciprocal %294 {approx = true} : vector<8x1xf32> -> vector<8x1xf32>
    %296 = vector.broadcast %295 : vector<8x1xf32> to vector<8x8xf32>
    %297 = arith.mulf %292, %296 : vector<8x8xf32>
    %298 = arith.truncf %297 : vector<8x8xf32> to vector<8x8xbf16>
    %299 = arith.truncf %241 : vector<8x16xf32> to vector<8x16xbf16>
    %cst_88 = arith.constant dense<0.000000e+00> : vector<8x16xf32>
    %300 = tpu.matmul %298, %299, %cst_88 {dimension_numbers = #tpu.dot_dimension_numbers<[1], [0], [0], [1], [0, 0, 1, 1], [], []>} : vector<8x8xbf16>, vector<8x16xbf16>, vector<8x16xf32> -> vector<8x16xf32>
    %301 = vector.extract_strided_slice %220 {offsets = [0, 32], sizes = [8, 16], strides = [1, 1]} : vector<8x64xf32> to vector<8x16xf32>
    %302 = vector.extract_strided_slice %301 {offsets = [0, 8], sizes = [8, 8], strides = [1, 1]} : vector<8x16xf32> to vector<8x8xf32>
    %cst_89 = arith.constant 0.000000e+00 : f32
    %303 = vector.broadcast %cst_89 : f32 to vector<8x8xf32>
    %304 = arith.subf %303, %302 : vector<8x8xf32>
    %305 = vector.extract_strided_slice %301 {offsets = [0, 0], sizes = [8, 8], strides = [1, 1]} : vector<8x16xf32> to vector<8x8xf32>
    %306 = tpu.concatenate %304, %305 in 1 : vector<8x8xf32>, vector<8x8xf32> -> vector<8x16xf32>
    %307 = arith.mulf %301, %2 : vector<8x16xf32>
    %308 = arith.mulf %306, %3 : vector<8x16xf32>
    %309 = arith.addf %307, %308 : vector<8x16xf32>
    %310 = arith.truncf %309 : vector<8x16xf32> to vector<8x16xbf16>
    %311 = arith.truncf %240 : vector<8x16xf32> to vector<8x16xbf16>
    %cst_90 = arith.constant dense<0.000000e+00> : vector<8x8xf32>
    %312 = tpu.matmul %310, %311, %cst_90 {dimension_numbers = #tpu.dot_dimension_numbers<[1], [1], [0], [0], [0, 0, 1, 0], [], []>} : vector<8x16xbf16>, vector<8x16xbf16>, vector<8x8xf32> -> vector<8x8xf32>
    %cst_91 = arith.constant 2.500000e-01 : f32
    %313 = vector.broadcast %cst_91 : f32 to vector<8x8xf32>
    %314 = arith.mulf %312, %313 : vector<8x8xf32>
    %cst_92 = arith.constant -1.000000e+30 : f32
    %315 = vector.broadcast %cst_92 : f32 to vector<8x8xf32>
    %316 = arith.select %6, %314, %315 : vector<8x8xi1>, vector<8x8xf32>
    %cst_93 = arith.constant dense<0xFF800000> : vector<8xf32>
    %317 = vector.multi_reduction <maximumf>, %316, %cst_93 [1] : vector<8x8xf32> to vector<8xf32>
    %318 = vector.shape_cast %317 : vector<8xf32> to vector<8x1xf32>
    %319 = vector.broadcast %318 : vector<8x1xf32> to vector<8x8xf32>
    %320 = arith.subf %316, %319 : vector<8x8xf32>
    %321 = math.exp %320 : vector<8x8xf32>
    %cst_94 = arith.constant dense<0.000000e+00> : vector<8xf32>
    %322 = vector.multi_reduction <add>, %321, %cst_94 [1] : vector<8x8xf32> to vector<8xf32>
    %323 = vector.shape_cast %322 : vector<8xf32> to vector<8x1xf32>
    %324 = tpu.reciprocal %323 {approx = true} : vector<8x1xf32> -> vector<8x1xf32>
    %325 = vector.broadcast %324 : vector<8x1xf32> to vector<8x8xf32>
    %326 = arith.mulf %321, %325 : vector<8x8xf32>
    %327 = arith.truncf %326 : vector<8x8xf32> to vector<8x8xbf16>
    %328 = arith.truncf %242 : vector<8x16xf32> to vector<8x16xbf16>
    %cst_95 = arith.constant dense<0.000000e+00> : vector<8x16xf32>
    %329 = tpu.matmul %327, %328, %cst_95 {dimension_numbers = #tpu.dot_dimension_numbers<[1], [0], [0], [1], [0, 0, 1, 1], [], []>} : vector<8x8xbf16>, vector<8x16xbf16>, vector<8x16xf32> -> vector<8x16xf32>
    %330 = vector.extract_strided_slice %220 {offsets = [0, 48], sizes = [8, 16], strides = [1, 1]} : vector<8x64xf32> to vector<8x16xf32>
    %331 = vector.extract_strided_slice %330 {offsets = [0, 8], sizes = [8, 8], strides = [1, 1]} : vector<8x16xf32> to vector<8x8xf32>
    %cst_96 = arith.constant 0.000000e+00 : f32
    %332 = vector.broadcast %cst_96 : f32 to vector<8x8xf32>
    %333 = arith.subf %332, %331 : vector<8x8xf32>
    %334 = vector.extract_strided_slice %330 {offsets = [0, 0], sizes = [8, 8], strides = [1, 1]} : vector<8x16xf32> to vector<8x8xf32>
    %335 = tpu.concatenate %333, %334 in 1 : vector<8x8xf32>, vector<8x8xf32> -> vector<8x16xf32>
    %336 = arith.mulf %330, %2 : vector<8x16xf32>
    %337 = arith.mulf %335, %3 : vector<8x16xf32>
    %338 = arith.addf %336, %337 : vector<8x16xf32>
    %339 = arith.truncf %338 : vector<8x16xf32> to vector<8x16xbf16>
    %340 = arith.truncf %240 : vector<8x16xf32> to vector<8x16xbf16>
    %cst_97 = arith.constant dense<0.000000e+00> : vector<8x8xf32>
    %341 = tpu.matmul %339, %340, %cst_97 {dimension_numbers = #tpu.dot_dimension_numbers<[1], [1], [0], [0], [0, 0, 1, 0], [], []>} : vector<8x16xbf16>, vector<8x16xbf16>, vector<8x8xf32> -> vector<8x8xf32>
    %cst_98 = arith.constant 2.500000e-01 : f32
    %342 = vector.broadcast %cst_98 : f32 to vector<8x8xf32>
    %343 = arith.mulf %341, %342 : vector<8x8xf32>
    %cst_99 = arith.constant -1.000000e+30 : f32
    %344 = vector.broadcast %cst_99 : f32 to vector<8x8xf32>
    %345 = arith.select %6, %343, %344 : vector<8x8xi1>, vector<8x8xf32>
    %cst_100 = arith.constant dense<0xFF800000> : vector<8xf32>
    %346 = vector.multi_reduction <maximumf>, %345, %cst_100 [1] : vector<8x8xf32> to vector<8xf32>
    %347 = vector.shape_cast %346 : vector<8xf32> to vector<8x1xf32>
    %348 = vector.broadcast %347 : vector<8x1xf32> to vector<8x8xf32>
    %349 = arith.subf %345, %348 : vector<8x8xf32>
    %350 = math.exp %349 : vector<8x8xf32>
    %cst_101 = arith.constant dense<0.000000e+00> : vector<8xf32>
    %351 = vector.multi_reduction <add>, %350, %cst_101 [1] : vector<8x8xf32> to vector<8xf32>
    %352 = vector.shape_cast %351 : vector<8xf32> to vector<8x1xf32>
    %353 = tpu.reciprocal %352 {approx = true} : vector<8x1xf32> -> vector<8x1xf32>
    %354 = vector.broadcast %353 : vector<8x1xf32> to vector<8x8xf32>
    %355 = arith.mulf %350, %354 : vector<8x8xf32>
    %356 = arith.truncf %355 : vector<8x8xf32> to vector<8x8xbf16>
    %357 = arith.truncf %242 : vector<8x16xf32> to vector<8x16xbf16>
    %cst_102 = arith.constant dense<0.000000e+00> : vector<8x16xf32>
    %358 = tpu.matmul %356, %357, %cst_102 {dimension_numbers = #tpu.dot_dimension_numbers<[1], [0], [0], [1], [0, 0, 1, 1], [], []>} : vector<8x8xbf16>, vector<8x16xbf16>, vector<8x16xf32> -> vector<8x16xf32>
    %359 = tpu.concatenate %271, %300, %329, %358 in 1 : vector<8x16xf32>, vector<8x16xf32>, vector<8x16xf32>, vector<8x16xf32> -> vector<8x64xf32>
    %c1_103 = arith.constant 1 : index
    %c0_104 = arith.constant 0 : index
    %c0_105 = arith.constant 0 : index
    %360 = vector.load %arg6[%c1_103, %c0_104, %c0_105] : memref<2x64x64xbf16, #tpu.memory_space<vmem>>, vector<1x64x64xbf16>
    %361 = vector.shape_cast %360 : vector<1x64x64xbf16> to vector<64x64xbf16>
    %362 = arith.truncf %359 : vector<8x64xf32> to vector<8x64xbf16>
    %cst_106 = arith.constant dense<0.000000e+00> : vector<8x64xf32>
    %363 = tpu.matmul %362, %361, %cst_106 {dimension_numbers = #tpu.dot_dimension_numbers<[1], [0], [0], [1], [0, 0, 1, 1], [], []>} : vector<8x64xbf16>, vector<64x64xbf16>, vector<8x64xf32> -> vector<8x64xf32>
    %364 = arith.addf %201, %363 : vector<8x64xf32>
    %c1_107 = arith.constant 1 : index
    %c0_108 = arith.constant 0 : index
    %c0_109 = arith.constant 0 : index
    %365 = vector.load %arg7[%c1_107, %c0_108, %c0_109] : memref<2x1x64xf32, #tpu.memory_space<vmem>>, vector<1x1x64xf32>
    %366 = vector.shape_cast %365 : vector<1x1x64xf32> to vector<1x64xf32>
    %367 = arith.mulf %364, %364 : vector<8x64xf32>
    %cst_110 = arith.constant dense<0.000000e+00> : vector<8xf32>
    %368 = vector.multi_reduction <add>, %367, %cst_110 [1] : vector<8x64xf32> to vector<8xf32>
    %369 = vector.shape_cast %368 : vector<8xf32> to vector<8x1xf32>
    %cst_111 = arith.constant 6.400000e+01 : f32
    %370 = vector.broadcast %cst_111 : f32 to vector<8x1xf32>
    %371 = arith.divf %369, %370 : vector<8x1xf32>
    %cst_112 = arith.constant 9.99999997E-7 : f32
    %372 = vector.broadcast %cst_112 : f32 to vector<8x1xf32>
    %373 = arith.addf %371, %372 : vector<8x1xf32>
    %374 = math.rsqrt %373 : vector<8x1xf32>
    %375 = vector.broadcast %374 : vector<8x1xf32> to vector<8x64xf32>
    %376 = arith.mulf %364, %375 : vector<8x64xf32>
    %377 = vector.broadcast %366 : vector<1x64xf32> to vector<8x64xf32>
    %378 = arith.mulf %376, %377 : vector<8x64xf32>
    %c1_113 = arith.constant 1 : index
    %c0_114 = arith.constant 0 : index
    %c0_115 = arith.constant 0 : index
    %379 = vector.load %arg8[%c1_113, %c0_114, %c0_115] : memref<2x64x256xbf16, #tpu.memory_space<vmem>>, vector<1x64x256xbf16>
    %380 = vector.shape_cast %379 : vector<1x64x256xbf16> to vector<64x256xbf16>
    %381 = arith.truncf %378 : vector<8x64xf32> to vector<8x64xbf16>
    %cst_116 = arith.constant dense<0.000000e+00> : vector<8x256xf32>
    %382 = tpu.matmul %381, %380, %cst_116 {dimension_numbers = #tpu.dot_dimension_numbers<[1], [0], [0], [1], [0, 0, 1, 1], [], []>} : vector<8x64xbf16>, vector<64x256xbf16>, vector<8x256xf32> -> vector<8x256xf32>
    %383 = vector.extract_strided_slice %382 {offsets = [0, 0], sizes = [8, 128], strides = [1, 1]} : vector<8x256xf32> to vector<8x128xf32>
    %384 = vector.extract_strided_slice %382 {offsets = [0, 128], sizes = [8, 128], strides = [1, 1]} : vector<8x256xf32> to vector<8x128xf32>
    %385 = arith.negf %383 : vector<8x128xf32>
    %386 = math.exp %385 : vector<8x128xf32>
    %cst_117 = arith.constant 1.000000e+00 : f32
    %387 = vector.broadcast %cst_117 : f32 to vector<8x128xf32>
    %388 = arith.addf %387, %386 : vector<8x128xf32>
    %389 = arith.divf %387, %388 : vector<8x128xf32>
    %390 = arith.mulf %383, %389 : vector<8x128xf32>
    %391 = arith.mulf %390, %384 : vector<8x128xf32>
    %c1_118 = arith.constant 1 : index
    %c0_119 = arith.constant 0 : index
    %c0_120 = arith.constant 0 : index
    %392 = vector.load %arg9[%c1_118, %c0_119, %c0_120] : memref<2x128x64xbf16, #tpu.memory_space<vmem>>, vector<1x128x64xbf16>
    %393 = vector.shape_cast %392 : vector<1x128x64xbf16> to vector<128x64xbf16>
    %394 = arith.truncf %391 : vector<8x128xf32> to vector<8x128xbf16>
    %cst_121 = arith.constant dense<0.000000e+00> : vector<8x64xf32>
    %395 = tpu.matmul %394, %393, %cst_121 {dimension_numbers = #tpu.dot_dimension_numbers<[1], [0], [0], [1], [0, 0, 1, 1], [], []>} : vector<8x128xbf16>, vector<128x64xbf16>, vector<8x64xf32> -> vector<8x64xf32>
    %396 = arith.addf %364, %395 : vector<8x64xf32>
    %c0_122 = arith.constant 0 : index
    %c0_123 = arith.constant 0 : index
    %397 = vector.load %arg10[%c0_122, %c0_123] : memref<1x64xf32, #tpu.memory_space<vmem>>, vector<1x64xf32>
    %398 = arith.mulf %396, %396 : vector<8x64xf32>
    %cst_124 = arith.constant dense<0.000000e+00> : vector<8xf32>
    %399 = vector.multi_reduction <add>, %398, %cst_124 [1] : vector<8x64xf32> to vector<8xf32>
    %400 = vector.shape_cast %399 : vector<8xf32> to vector<8x1xf32>
    %cst_125 = arith.constant 6.400000e+01 : f32
    %401 = vector.broadcast %cst_125 : f32 to vector<8x1xf32>
    %402 = arith.divf %400, %401 : vector<8x1xf32>
    %cst_126 = arith.constant 9.99999997E-7 : f32
    %403 = vector.broadcast %cst_126 : f32 to vector<8x1xf32>
    %404 = arith.addf %402, %403 : vector<8x1xf32>
    %405 = math.rsqrt %404 : vector<8x1xf32>
    %406 = vector.broadcast %405 : vector<8x1xf32> to vector<8x64xf32>
    %407 = arith.mulf %396, %406 : vector<8x64xf32>
    %408 = vector.broadcast %397 : vector<1x64xf32> to vector<8x64xf32>
    %409 = arith.mulf %407, %408 : vector<8x64xf32>
    %c0_127 = arith.constant 0 : index
    %c0_128 = arith.constant 0 : index
    %410 = vector.load %arg11[%c0_127, %c0_128] : memref<256x64xbf16, #tpu.memory_space<vmem>>, vector<256x64xbf16>
    %411 = arith.truncf %409 : vector<8x64xf32> to vector<8x64xbf16>
    %cst_129 = arith.constant dense<0.000000e+00> : vector<8x256xf32>
    %412 = tpu.matmul %411, %410, %cst_129 {dimension_numbers = #tpu.dot_dimension_numbers<[1], [1], [0], [0], [0, 0, 1, 0], [], []>} : vector<8x64xbf16>, vector<256x64xbf16>, vector<8x256xf32> -> vector<8x256xf32>
    %c0_130 = arith.constant 0 : index
    %c0_131 = arith.constant 0 : index
    %c0_132 = arith.constant 0 : index
    %413 = vector.load %arg12[%c0_130, %c0_131, %c0_132] : memref<1x8x256xf32, #tpu.memory_space<vmem>>, vector<1x8x256xf32>
    %414 = vector.shape_cast %413 : vector<1x8x256xf32> to vector<8x256xf32>
    %415 = vector.shape_cast %412 : vector<8x256xf32> to vector<1x8x256xf32>
    tpu.vector_store %arg12[%c0_130, %c0_131, %c0_132], %415 {strides = array<i32>} : memref<1x8x256xf32, #tpu.memory_space<vmem>>, vector<1x8x256xf32>,
    return
  }
  func.func @transform_0(%arg0: i32) -> (i32, i32, i32) {
    %c0_i32 = arith.constant 0 : i32
    %c0_i32_0 = arith.constant 0 : i32
    %c0_i32_1 = arith.constant 0 : i32
    return %arg0, %c0_i32, %c0_i32_0 : i32, i32, i32
  }
  func.func @transform_1(%arg0: i32) -> (i32, i32) {
    %c0_i32 = arith.constant 0 : i32
    %c0_i32_0 = arith.constant 0 : i32
    %c0_i32_1 = arith.constant 0 : i32
    return %c0_i32, %c0_i32_0 : i32, i32
  }
  func.func @transform_2(%arg0: i32) -> (i32, i32) {
    %c0_i32 = arith.constant 0 : i32
    %c0_i32_0 = arith.constant 0 : i32
    %c0_i32_1 = arith.constant 0 : i32
    return %c0_i32, %c0_i32_0 : i32, i32
  }
  func.func @transform_3(%arg0: i32) -> (i32, i32, i32) {
    %c0_i32 = arith.constant 0 : i32
    %c0_i32_0 = arith.constant 0 : i32
    %c0_i32_1 = arith.constant 0 : i32
    %c0_i32_2 = arith.constant 0 : i32
    return %c0_i32, %c0_i32_0, %c0_i32_1 : i32, i32, i32
  }
  func.func @transform_4(%arg0: i32) -> (i32, i32, i32) {
    %c0_i32 = arith.constant 0 : i32
    %c0_i32_0 = arith.constant 0 : i32
    %c0_i32_1 = arith.constant 0 : i32
    %c0_i32_2 = arith.constant 0 : i32
    return %c0_i32, %c0_i32_0, %c0_i32_1 : i32, i32, i32
  }
  func.func @transform_5(%arg0: i32) -> (i32, i32, i32) {
    %c0_i32 = arith.constant 0 : i32
    %c0_i32_0 = arith.constant 0 : i32
    %c0_i32_1 = arith.constant 0 : i32
    %c0_i32_2 = arith.constant 0 : i32
    return %c0_i32, %c0_i32_0, %c0_i32_1 : i32, i32, i32
  }
  func.func @transform_6(%arg0: i32) -> (i32, i32, i32) {
    %c0_i32 = arith.constant 0 : i32
    %c0_i32_0 = arith.constant 0 : i32
    %c0_i32_1 = arith.constant 0 : i32
    %c0_i32_2 = arith.constant 0 : i32
    return %c0_i32, %c0_i32_0, %c0_i32_1 : i32, i32, i32
  }
  func.func @transform_7(%arg0: i32) -> (i32, i32, i32) {
    %c0_i32 = arith.constant 0 : i32
    %c0_i32_0 = arith.constant 0 : i32
    %c0_i32_1 = arith.constant 0 : i32
    %c0_i32_2 = arith.constant 0 : i32
    return %c0_i32, %c0_i32_0, %c0_i32_1 : i32, i32, i32
  }
  func.func @transform_8(%arg0: i32) -> (i32, i32, i32) {
    %c0_i32 = arith.constant 0 : i32
    %c0_i32_0 = arith.constant 0 : i32
    %c0_i32_1 = arith.constant 0 : i32
    %c0_i32_2 = arith.constant 0 : i32
    return %c0_i32, %c0_i32_0, %c0_i32_1 : i32, i32, i32
  }
  func.func @transform_9(%arg0: i32) -> (i32, i32) {
    %c0_i32 = arith.constant 0 : i32
    %c0_i32_0 = arith.constant 0 : i32
    %c0_i32_1 = arith.constant 0 : i32
    return %c0_i32, %c0_i32_0 : i32, i32
  }
  func.func @transform_10(%arg0: i32) -> (i32, i32) {
    %c0_i32 = arith.constant 0 : i32
    %c0_i32_0 = arith.constant 0 : i32
    %c0_i32_1 = arith.constant 0 : i32
    return %c0_i32, %c0_i32_0 : i32, i32
  }
  func.func @transform_11(%arg0: i32) -> (i32, i32, i32) {
    %c0_i32 = arith.constant 0 : i32
    %c0_i32_0 = arith.constant 0 : i32
    %c0_i32_1 = arith.constant 0 : i32
    return %arg0, %c0_i32, %c0_i32_0 : i32, i32, i32
  }
}

</mosaic_0001>

<bundles_post_ra>
// kernel: stacked_forward.2
= control target key start
LH: loop header
LB: loop body
LE: loop exit
PB: predicated region body
PF: predicated region fallthrough
CT: control target
= control target key end

     0   :  { %s3235_s17 = smov 0   ;;  %s3838_s0 = inlined_call_operand.vmem [shape: f32[2,8,64], index: 0, kind: input, shape index: {}]   ;;  %s3839_s1 = inlined_call_operand.vmem [shape: f32[8,16], index: 1, kind: input, shape index: {}]   ;;  %s3840_s2 = inlined_call_operand.vmem [shape: f32[8,16], index: 2, kind: input, shape index: {}]   ;;  %s3841_s3 = inlined_call_operand.vmem [shape: f32[2,1,64], index: 3, kind: input, shape index: {}]   ;;  %s3842_s4 = inlined_call_operand.vmem [shape: bf16[2,64,128], index: 4, kind: input, shape index: {}]   ;;  %s3843_s5 = inlined_call_operand.vmem [shape: bf16[2,64,64], index: 5, kind: input, shape index: {}]   ;;  %s3844_s6 = inlined_call_operand.vmem [shape: f32[2,1,64], index: 6, kind: input, shape index: {}]   ;;  %s3845_s7 = inlined_call_operand.vmem [shape: bf16[2,64,256], index: 7, kind: input, shape index: {}]   ;;  %s3846_s8 = inlined_call_operand.vmem [shape: bf16[2,128,64], index: 8, kind: input, shape index: {}]   ;;  %s3847_s9 = inlined_call_operand.vmem [shape: f32[1,64], index: 9, kind: input, shape index: {}]   ;;  %s3848_s10 = inlined_call_operand.vmem [shape: bf16[256,64], index: 10, kind: input, shape index: {}]   ;;  %s3849_s11 = inlined_call_operand.vmem [shape: s32[2,8,1], index: 11, kind: output, shape index: {}]  }
   0x1 LB: > { %s2578_s18 = sadd.s32 4294967295, %s3156_s17   ;;  %p2582_p0 = scmp.ge.s32.totalorder %s3156_s17, 1  ;;  %s3156_s17 = sphi %s3235_s17, %s21_s17  }
   0x2   : > { %p336_p1 = scmp.lt.s32.totalorder %s3156_s17, 3 }
   0x4   : > { %p337_p2 = pnand %p2582_p0, %p336_p1 }
   0x5   : > { %p374_p3 = scmp.lt.s32.totalorder (!%p337_p2), %s2578_s18, 1  ;;  %s3160_s14 = smov (!%p337_p2), 72  }
   0x6   : > { %340 = sbr.rel (%p337_p2) target bundleno = 5516 (0x158c), region = 64  ;;  %s3161_s15 = smov (!%p337_p2), 56  }
   0x7   : > { %s3162_s16 = smov (!%p337_p2), 120   ;;  %s3164_s23 = smov (!%p337_p2), 40  }
   0x8   : > { %s3165_s24 = smov (!%p337_p2), 80   ;;  %s3166_s25 = smov (!%p337_p2), 104  }
   0x9   : > { %s3167_s26 = smov (!%p337_p2), 88   ;;  %s3168_s29 = smov (!%p337_p2), 16  }
   0xa   : > { %s3856_s30 = smov (!%p337_p2), 32   ;;  %s3854_s12 = smov (!%p337_p2), 48  }
   0xb   : > { %s3867_s18 = smov (!%p374_p3, %s2578_s18), 1  ;;  %vm393_vm0 = vcmask 523264   ;;  %v3028_v3 = vld [vmem:[%s3842_s4 + $0x18] sm:$0xff]   ;;  %v3158_v4 = vmov 0.0   ;;  %v3029_v5 = vld [vmem:[%s3842_s4 + $0x10] sm:$0xff]   ;;  %vm3159_vm1 = vmmov 0  }
   0xc   : > { %s3850_s19 = sshll.u32 %s3867_s18, 3  ;;  %2811 = vmatprep.subr.bf16.mxu0 %v3158_v4  ;;  %2819 = vmatprep.mubr.msk.bf16.mxu0 %vm3159_vm1, %v3158_v4  ;;  %v3030_v6 = vld [vmem:[%s3842_s4 + $0x8] sm:$0xff]   ;;  %v3031_v7 = vld [vmem:[%s3842_s4] sm:$0xff]   ;;  %vm494_vm2 = vcmask 64512   ;;  %s3853_s13 = smov 8   ;;  %vm539_vm3 = vcmask 130048  }
   0xd   : > { %s377_s22 = scalar_lea.vmem %s3838_s0, %s3850_s19  ;;  %2812 = vmatpush3.bf16.msra.mxu0 %v3028_v3  ;;  %2823 = vmatprep.subr.bf16.mxu1 %v3158_v4  ;;  %v2585_v12 = vld [vmem:[%s3841_s3] ss:$0 sm:$0xff]  ;;  %s3852_s20 = smov 112   ;;  %vm607_vm5 = vcmask 1043456   ;;  %vm1039_vm6 = vcmask 261120   ;;  %vm1041_vm7 = vcmask 392192  }
   0xe   : > { %v3251_v0 = vld [vmem:[%s377_s22] sm:$0xff]  ;;  %2813 = vmatprep.subr.bf16.mxu0 %v3158_v4  ;;  %2825 = vmatprep.mubr.msk.bf16.mxu1 %vm3159_vm1, %v3158_v4  ;;  %s3163_s22 = smov 64   ;;  %s3851_s21 = smov 96   ;;  %vm2523_vm12 = vcmask 7168  }
   0xf   : > { %v392_v1 = vmul.f32 %v3251_v0, %v3251_v0  ;;  %v3299_v21 = vld [vmem:[%s3839_s1] sm:$0xff] }
  0x10   : > { %v3315_v23 = vld [vmem:[%s3840_s2] sm:$0xff] }
  0x11   : > { %v394_v2 = vsel %vm393_vm0, %v392_v1, 0.0  ;;  %2814 = vmatpush3.bf16.msra.mxu0 %v3029_v5 }
  0x12   : > { %395 = vadd.xlane.f32.xlu0 %v394_v2  ;;  %2815 = vmatprep.subr.bf16.mxu0 %v3158_v4 }
  0x15   : > { %2816 = vmatpush3.bf16.msra.mxu0 %v3030_v6 }
  0x16   : > { %2817 = vmatprep.subr.bf16.mxu0 %v3158_v4 }
  0x19   : > { %2818 = vmatpush3.bf16.msra.mxu0 %v3031_v7 }
  0x1a   : > { %2835 = vmatprep.subr.bf16.mxu0 %v3158_v4 }
  0x9b   : > { %v396_v8 = vpop.xlane.xlu0 %395 }
  0x9c   : > { %v398_v9 = vmul.f32 0.015625, %v396_v8 }
  0x9e   : > { %v399_v10 = vadd.f32 1e-06, %v398_v9 }
  0xa0   : > { %3100 = vrsqrt.f32 %v399_v10 }
  0xad   : > { %v3101_v11 = vpop.eup %3100 }
  0xae   : > { %v401_v13 = vmul.f32 %v3101_v11, %v3251_v0 }
  0xb0   : > { %v408_v14 = vmul.f32 %v2585_v12, %v401_v13 }
  0xb2   : > { %v417_v15 = vpack.c.bf16 %v408_v14, %v408_v14 }
  0xb4   : > { %2820 = vmatmul.mubr.msk.bf16.vlgmr.msra.gmra.mxu0 %vm393_vm0, %v417_v15 }
  0xb5   : > { %2837 = vmatprep.mubr.msk.bf16.mxu0 %vm3159_vm1, %v3158_v4 }
 0x174   : > { %v3285_v16 = vpop.f32.mrf.mxu0 }
 0x175   : > { %491 = vrot.lane.b32.xlu1 %v3285_v16, %s3160_s14  ;;  %v485_v17 = vsub.f32 0.0, %v3285_v16  ;;  %v531_v11 = vmul.f32 %v3285_v16, %v3299_v21 }
 0x176   : > { %v2821_v18 = vpop.f32.mrf.mxu0 }
 0x177   : > { %487 = vrot.lane.b32.xlu0 %v485_v17, %s3161_s15 }
 0x178   : > { %v482_v19 = vpop.f32.mrf.mxu0 }
 0x179   : > { %510 = vrot.lane.b32.xlu1 %v3285_v16, %s3161_s15 }
 0x17a   : > { %v2822_v20 = vpop.f32.mrf.mxu0 }
 0x17b   : > { %905 = vrot.lane.b32.xlu0 %v485_v17, %s3160_s14 }
 0x17d   : > { %654 = vrot.lane.b32.xlu1 %v3285_v16, %s3162_s16 }
 0x17f   : > { %497 = vrot.lane.b32.xlu0 %v3299_v21, %s3163_s22 }
 0x181   : > { %507 = vrot.lane.b32.xlu1 %v485_v17, %s3164_s23 }
 0x183   : > { %514 = vrot.lane.b32.xlu0 %v3299_v21, %s3165_s24 }
 0x185   : > { %651 = vrot.lane.b32.xlu1 %v485_v17, %s3166_s25 }
 0x189   : > { %772 = vrot.lane.b32.xlu1 %v485_v17, %s3167_s26 }
 0x18d   : > { %775 = vrot.lane.b32.xlu1 %v3285_v16, %s3166_s25 }
 0x191   : > { %908 = vrot.lane.b32.xlu1 %v3285_v16, %s3167_s26 }
 0x1e7   : > { %v492_v22 = vpop.permute.xlu1 %491 }
 0x1e9   : > { %v488_v24 = vpop.permute.xlu0 %487 }
 0x1ea   : > { %v495_v25 = vsel %vm494_vm2, %v488_v24, %v492_v22  ;;  %v386_v22 = vlaneseq }
 0x1eb   : > { %v501_v26 = vmul.f32 %v495_v25, %v3315_v23  ;;  %v511_v27 = vpop.permute.xlu1 %510 }
 0x1ec   : > { %v387_v24 = vshrl.u32 %v386_v22, 7  ;;  %v3388_v25 = vand.u32 127, %v386_v22 }
 0x1ed   : > { %503 = vrot.lane.b32.xlu1 %v501_v26, %s3163_s22  ;;  %v906_v39 = vpop.permute.xlu0 %905 }
 0x1ee   : > { %vm3391_vm4 = vcmp.ge.s32.totalorder %v387_v24, %v3388_v25 }
 0x1ef   : > { %v655_v28 = vpop.permute.xlu1 %654 }
 0x1f1   : > { %658 = vrot.lane.b32.xlu1 %v3299_v21, %s3168_s29  ;;  %v3339_v43 = vpop.permute.xlu0 %497 }
 0x1f2   : > { %v500_v44 = vmul.f32 %v3339_v43, %v3285_v16 }
 0x1f3   : > { %v508_v29 = vpop.permute.xlu1 %507 }
 0x1f4   : > { %v513_v30 = vsel %vm494_vm2, %v508_v29, %v511_v27 }
 0x1f5   : > { %v518_v31 = vmul.f32 %v513_v30, %v3315_v23  ;;  %v3344_v48 = vpop.permute.xlu0 %514 }
 0x1f6   : > { %v517_v49 = vmul.f32 %v3344_v48, %v3285_v16 }
 0x1f7   : > { %v652_v32 = vpop.permute.xlu1 %651  ;;  %520 = vrot.lane.b32.xlu0 %v518_v31, %s3165_s24 }
 0x1f8   : > { %v657_v33 = vsel %vm494_vm2, %v652_v32, %v655_v28 }
 0x1f9   : > { %v662_v34 = vmul.f32 %v657_v33, %v3315_v23 }
 0x1fb   : > { %v773_v35 = vpop.permute.xlu1 %772  ;;  %779 = vrot.lane.b32.xlu0 %v3299_v21, %s3856_s30  ;;  %664 = vrot.lane.b32.xlu1 %v662_v34, %s3168_s29 }
 0x1ff   : > { %v776_v36 = vpop.permute.xlu1 %775  ;;  %912 = vrot.lane.b32.xlu0 %v3299_v21, %s3854_s12 }
 0x200   : > { %v778_v37 = vsel %vm494_vm2, %v773_v35, %v776_v36 }
 0x201   : > { %v783_v38 = vmul.f32 %v778_v37, %v3315_v23 }
 0x203   : > { %v909_v40 = vpop.permute.xlu1 %908  ;;  %785 = vrot.lane.b32.xlu1 %v783_v38, %s3856_s30 }
 0x204   : > { %v911_v41 = vsel %vm494_vm2, %v906_v39, %v909_v40 }
 0x205   : > { %v916_v42 = vmul.f32 %v911_v41, %v3315_v23 }
 0x207   : > { %918 = vrot.lane.b32.xlu1 %v916_v42, %s3854_s12 }
 0x20b   : > { %524 = vrot.lane.b32.xlu1 %v485_v17, %s3162_s16 }
 0x25f   : > { %v504_v45 = vpop.permute.xlu1 %503 }
 0x260   : > { %v506_v46 = vadd.f32 %v504_v45, %v500_v44 }
 0x262   : > { %v535_v47 = vpack.c.bf16 %v506_v46, %v506_v46 }
 0x263   : > { %v3350_v50 = vpop.permute.xlu1 %658 }
 0x264   : > { %537 = vrot.lane.b32.xlu0 %v535_v47, %s3163_s22  ;;  %v661_v53 = vmul.f32 %v3350_v50, %v3285_v16 }
 0x268   : > { %527 = vrot.lane.b32.xlu0 %v3285_v16, %s3853_s13 }
 0x269   : > { %v521_v51 = vpop.permute.xlu0 %520 }
 0x26a   : > { %v523_v52 = vadd.f32 %v521_v51, %v517_v49 }
 0x26c   : > { %v790_v54 = vpack.c.bf16 %v523_v52, %v523_v52 }
 0x26d   : > { %v665_v55 = vpop.permute.xlu1 %664  ;;  %v3355_v57 = vpop.permute.xlu0 %779 }
 0x26e   : > { %v667_v56 = vadd.f32 %v665_v55, %v661_v53  ;;  %795 = vrot.lane.b32.xlu0 %v790_v54, %s3854_s12  ;;  %v782_v59 = vmul.f32 %v3355_v57, %v3285_v16 }
 0x270   : > { %v668_v58 = vpack.c.bf16 %v667_v56, %v667_v56 }
 0x271   : > { %v3360_v60 = vpop.permute.xlu0 %912 }
 0x272   : > { %670 = vrot.lane.b32.xlu1 %v668_v58, %s3852_s20  ;;  %v915_v63 = vmul.f32 %v3360_v60, %v3285_v16 }
 0x275   : > { %v786_v61 = vpop.permute.xlu1 %785 }
 0x276   : > { %v788_v62 = vadd.f32 %v786_v61, %v782_v59 }
 0x278   : > { %v789_v1 = vpack.c.bf16 %v788_v62, %v788_v62 }
 0x279   : > { %v919_v2 = vpop.permute.xlu1 %918 }
 0x27a   : > { %v921_v3 = vadd.f32 %v919_v2, %v915_v63  ;;  %792 = vrot.lane.b32.xlu1 %v789_v1, %s3851_s21 }
 0x27c   : > { %v922_v5 = vpack.c.bf16 %v921_v3, %v921_v3 }
 0x27d   : > { %v525_v8 = vpop.permute.xlu1 %524 }
 0x27e   : > { %924 = vrot.lane.b32.xlu0 %v922_v5, %s3165_s24 }
 0x2d6   : > { %v538_v6 = vpop.permute.xlu0 %537 }
 0x2d7   : > { %v544_v7 = vsel %vm539_vm3, %v538_v6, 0 }
 0x2d8   : > { %2824 = vmatpush3.bf16.xpose.msra.mxu1 %v544_v7  ;;  %2836 = vmatpush3.bf16.xpose.msra.mxu0 %v544_v7 }
 0x2d9   : > { %2847 = vmatprep.subr.bf16.mxu0 %v3158_v4  ;;  %2829 = vmatprep.subr.bf16.mxu1 %v3158_v4 }
 0x2da   : > { %v528_v9 = vpop.permute.xlu0 %527 }
 0x2db   : > { %v530_v10 = vsel %vm494_vm2, %v525_v8, %v528_v9 }
 0x2dc   : > { %v532_v12 = vmul.f32 %v530_v10, %v3315_v23 }
 0x2de   : > { %v533_v13 = vadd.f32 %v532_v12, %v531_v11 }
 0x2e0   : > { %v534_v14 = vpack.c.bf16 %v533_v13, %v533_v13  ;;  %v796_v15 = vpop.permute.xlu0 %795 }
 0x2e1   : > { %v801_v18 = vsel %vm539_vm3, %v796_v15, 0 }
 0x2e2   : > { %2826 = vmatmul.mubr.msk.bf16.vlgmr.msra.gmra.mxu1 %vm539_vm3, %v534_v14 }
 0x2e3   : > { %2831 = vmatprep.mubr.msk.bf16.mxu1 %vm3159_vm1, %v3158_v4 }
 0x2e4   : > { %v671_v17 = vpop.permute.xlu1 %670 }
 0x2e5   : > { %2838 = vmatmul.mubr.msk.bf16.vlgmr.msra.gmra.mxu0 %vm539_vm3, %v671_v17 }
 0x2e6   : > { %2848 = vmatpush3.bf16.xpose.msra.mxu0 %v801_v18  ;;  %2849 = vmatprep.mubr.msk.bf16.mxu0 %vm3159_vm1, %v3158_v4 }
 0x2e7   : > { %2859 = vmatprep.subr.bf16.mxu0 %v3158_v4 }
 0x2ec   : > { %v793_v19 = vpop.permute.xlu1 %792 }
 0x2ed   : > { %2850 = vmatmul.mubr.msk.bf16.vlgmr.msra.gmra.mxu0 %vm539_vm3, %v793_v19  ;;  %v600_v19 = vpack.c.bf16 %v3285_v16, %v3285_v16 }
 0x2ee   : > { %2860 = vmatpush3.bf16.xpose.msra.mxu0 %v801_v18  ;;  %2861 = vmatprep.mubr.msk.bf16.mxu0 %vm3159_vm1, %v3158_v4 }
 0x2ef   : > { %2871 = vmatprep.subr.bf16.mxu0 %v3158_v4 }
 0x2f0   : > { %v925_v20 = vpop.permute.xlu0 %924 }
 0x2f5   : > { %2862 = vmatmul.mubr.msk.bf16.vlgmr.msra.gmra.mxu0 %vm539_vm3, %v925_v20 }
 0x2f6   : > { %2879 = vmatprep.mubr.msk.bf16.mxu0 %vm3159_vm1, %v3158_v4 }
 0x3a2   : > { %v580_v26 = vpop.f32.mrf.mxu1 }
 0x3a3   : > { %v586_v28 = vmul.f32 0.25, %v580_v26 }
 0x3a4   : > { %v2827_v29 = vpop.f32.mrf.mxu1 }
 0x3a5   : > { %v709_v30 = vpop.f32.mrf.mxu0  ;;  %v587_v31 = vsel %vm3391_vm4, %v586_v28, -1e+30 }
 0x3a6   : > { %v715_v32 = vmul.f32 0.25, %v709_v30  ;;  %v583_v33 = vpop.f32.mrf.mxu1  ;;  %v588_v34 = vsel %vm494_vm2, %v587_v31, -inf }
 0x3a7   : > { %589 = vmax.xlane.f32.xlu1 %v588_v34  ;;  %v2839_v35 = vpop.f32.mrf.mxu0 }
 0x3a8   : > { %v2828_v36 = vpop.f32.mrf.mxu1  ;;  %v716_v37 = vsel %vm3391_vm4, %v715_v32, -1e+30 }
 0x3a9   : > { %v712_v38 = vpop.f32.mrf.mxu0  ;;  %v717_v39 = vsel %vm494_vm2, %v716_v37, -inf }
 0x3aa   : > { %718 = vmax.xlane.f32.xlu0 %v717_v39 }
 0x3ab   : > { %v2840_v40 = vpop.f32.mrf.mxu0 }
 0x3ad   : > { %v837_v41 = vpop.f32.mrf.mxu0 }
 0x3ae   : > { %v843_v42 = vmul.f32 0.25, %v837_v41 }
 0x3af   : > { %v2851_v44 = vpop.f32.mrf.mxu0 }
 0x3b0   : > { %v844_v45 = vsel %vm3391_vm4, %v843_v42, -1e+30  ;;  %v3032_v44 = vld [vmem:[%s3843_s5 + $0x18] sm:$0xff]  }
 0x3b1   : > { %v840_v46 = vpop.f32.mrf.mxu0  ;;  %v845_v47 = vsel %vm494_vm2, %v844_v45, -inf  ;;  %2872 = vmatpush3.bf16.msra.mxu0 %v3032_v44  ;;  %v3051_v44 = vld [vmem:[%s3846_s8 + $0x20] sm:$0xff]  }
 0x3b2   : > { %846 = vmax.xlane.f32.xlu0 %v845_v47  ;;  %2873 = vmatprep.subr.bf16.mxu0 %v3158_v4  ;;  %v3033_v47 = vld [vmem:[%s3843_s5 + $0x10] sm:$0xff]  }
 0x3b3   : > { %v2852_v49 = vpop.f32.mrf.mxu0 }
 0x3b5   : > { %v963_v51 = vpop.f32.mrf.mxu0  ;;  %2874 = vmatpush3.bf16.msra.mxu0 %v3033_v47  ;;  %v3054_v47 = vld [vmem:[%s3846_s8 + $0x8] sm:$0xff]  }
 0x3b6   : > { %v969_v52 = vmul.f32 0.25, %v963_v51  ;;  %v3034_v51 = vld [vmem:[%s3843_s5 + $0x8] sm:$0xff]   ;;  %2875 = vmatprep.subr.bf16.mxu0 %v3158_v4 }
 0x3b7   : > { %v2863_v53 = vpop.f32.mrf.mxu0 }
 0x3b8   : > { %v970_v54 = vsel %vm3391_vm4, %v969_v52, -1e+30 }
 0x3b9   : > { %v966_v55 = vpop.f32.mrf.mxu0  ;;  %v971_v56 = vsel %vm494_vm2, %v970_v54, -inf  ;;  %2876 = vmatpush3.bf16.msra.mxu0 %v3034_v51 }
 0x3ba   : > { %972 = vmax.xlane.f32.xlu1 %v971_v56  ;;  %2877 = vmatprep.subr.bf16.mxu0 %v3158_v4  ;;  %v3035_v55 = vld [vmem:[%s3843_s5] sm:$0xff]  }
 0x3bb   : > { %v2864_v58 = vpop.f32.mrf.mxu0 }
 0x3bd   : > { %2878 = vmatpush3.bf16.msra.mxu0 %v3035_v55 }
 0x430   : > { %v590_v59 = vpop.xlane.xlu1 %589 }
 0x431   : > { %v591_v61 = vsub.f32 %v587_v31, %v590_v59 }
 0x433   : > { %v592_v62 = vmul.f32 1.442695, %v591_v61  ;;  %v719_v63 = vpop.xlane.xlu0 %718 }
 0x434   : > { %v720_v1 = vsub.f32 %v716_v37, %v719_v63 }
 0x435   : > { %3102 = vpow2.f32 %v592_v62 }
 0x436   : > { %v721_v2 = vmul.f32 1.442695, %v720_v1 }
 0x438   : > { %3104 = vpow2.f32 %v721_v2 }
 0x43b   : > { %v847_v3 = vpop.xlane.xlu0 %846 }
 0x43c   : > { %v848_v5 = vsub.f32 %v844_v45, %v847_v3 }
 0x43e   : > { %v849_v6 = vmul.f32 1.442695, %v848_v5 }
 0x440   : > { %3106 = vpow2.f32 %v849_v6 }
 0x442   : > { %v3103_v7 = vpop.eup %3102 }
 0x443   : > { %v973_v8 = vpop.xlane.xlu1 %972  ;;  %v594_v9 = vsel %vm494_vm2, %v3103_v7, 0.0 }
 0x444   : > { %v974_v10 = vsub.f32 %v970_v54, %v973_v8  ;;  %595 = vadd.xlane.f32.xlu0 %v594_v9 }
 0x445   : > { %v3105_v11 = vpop.eup %3104 }
 0x446   : > { %v975_v12 = vmul.f32 1.442695, %v974_v10  ;;  %v723_v13 = vsel %vm494_vm2, %v3105_v11, 0.0 }
 0x447   : > { %724 = vadd.xlane.f32.xlu1 %v723_v13 }
 0x448   : > { %3108 = vpow2.f32 %v975_v12 }
 0x44d   : > { %v3107_v14 = vpop.eup %3106 }
 0x44e   : > { %v851_v15 = vsel %vm494_vm2, %v3107_v14, 0.0 }
 0x44f   : > { %852 = vadd.xlane.f32.xlu0 %v851_v15 }
 0x455   : > { %v3109_v17 = vpop.eup %3108 }
 0x456   : > { %v977_v18 = vsel %vm494_vm2, %v3109_v17, 0.0 }
 0x457   : > { %978 = vadd.xlane.f32.xlu1 %v977_v18 }
 0x465   : > { %602 = vrot.lane.b32.xlu0 %v600_v19, %s3856_s30 }
 0x468   : > { %857 = vrot.lane.b32.xlu1 %v600_v19, %s3168_s29 }
 0x4cd   : > { %v596_v20 = vpop.xlane.xlu0 %595 }
 0x4ce   : > { %3110 = vrcp.f32 %v596_v20 }
 0x4d0   : > { %v725_v22 = vpop.xlane.xlu1 %724 }
 0x4d1   : > { %3112 = vrcp.f32 %v725_v22  ;;  %v3036_v22 = vld [vmem:[%s3845_s7 + $0x30] ss:$8 sps:$4 sm:$0xff]  }
 0x4d8   : > { %v853_v24 = vpop.xlane.xlu0 %852 }
 0x4d9   : > { %3114 = vrcp.f32 %v853_v24  ;;  %v3038_v24 = vld [vmem:[%s3845_s7 + $0x34] ss:$8 sps:$4 sm:$0xff]  }
 0x4da   : > { %1196 = vmatprep.subr.bf16.mxu0 %v3038_v24 }
 0x4db   : > { %v3111_v26 = vpop.eup %3110 }
 0x4dc   : > { %v603_v28 = vpop.permute.xlu0 %602  ;;  %v598_v29 = vmul.f32 %v3111_v26, %v3103_v7  ;;  %v3039_v26 = vld [vmem:[%s3845_s7 + $0x20] ss:$8 sps:$4 sm:$0xff]  }
 0x4dd   : > { %v609_v30 = vsel %vm607_vm5, %v603_v28, 0  ;;  %v3174_v28 = vmov 0  }
 0x4de   : > { %2830 = vmatpush3.bf16.msra.mxu1 %v609_v30  ;;  %v599_v31 = vpack.c.bf16 %v598_v29, %v598_v29  ;;  %v3113_v16 = vpop.eup %3112  ;;  %v3044_v29 = vld [vmem:[%s3845_s7 + $0x14] ss:$8 sps:$4 sm:$0xff]  }
 0x4df   : > { %2841 = vmatprep.subr.bf16.mxu1 %v3158_v4  ;;  %v727_v33 = vmul.f32 %v3113_v16, %v3105_v11  ;;  %v3045_v16 = vld [vmem:[%s3845_s7] ss:$8 sps:$4 sm:$0xff]  }
 0x4e0   : > { %v979_v32 = vpop.xlane.xlu1 %978 }
 0x4e1   : > { %2832 = vmatmul.mubr.msk.bf16.vlgmr.msra.gmra.mxu1 %vm494_vm2, %v599_v31  ;;  %3116 = vrcp.f32 %v979_v32  ;;  %v728_v35 = vpack.c.bf16 %v727_v33, %v727_v33  ;;  %v3047_v31 = vld [vmem:[%s3845_s7 + $0x4] ss:$8 sps:$4 sm:$0xff]  }
 0x4e2   : > { %2842 = vmatpush3.bf16.msra.mxu1 %v609_v30  ;;  %2843 = vmatprep.mubr.msk.bf16.mxu1 %vm3159_vm1, %v3158_v4  ;;  %v3042_v30 = vld [vmem:[%s3845_s7 + $0x10] ss:$8 sps:$4 sm:$0xff]  }
 0x4e3   : > { %2853 = vmatprep.subr.bf16.mxu1 %v3158_v4 }
 0x4e4   : > { %v858_v34 = vpop.permute.xlu1 %857 }
 0x4e5   : > { %v863_v37 = vsel %vm607_vm5, %v858_v34, 0 }
 0x4e6   : > { %v3115_v36 = vpop.eup %3114 }
 0x4e7   : > { %v855_v38 = vmul.f32 %v3115_v36, %v3107_v14  ;;  %v2604_v36 = vld [vmem:[%s3844_s6] ss:$0 sm:$0xff] }
 0x4e9   : > { %2844 = vmatmul.mubr.msk.bf16.vlgmr.msra.gmra.mxu1 %vm494_vm2, %v728_v35  ;;  %v856_v39 = vpack.c.bf16 %v855_v38, %v855_v38 }
 0x4ea   : > { %2854 = vmatpush3.bf16.msra.mxu1 %v863_v37  ;;  %2855 = vmatprep.mubr.msk.bf16.mxu1 %vm3159_vm1, %v3158_v4 }
 0x4eb   : > { %2865 = vmatprep.subr.bf16.mxu1 %v3158_v4 }
 0x4ee   : > { %v3117_v40 = vpop.eup %3116 }
 0x4ef   : > { %v981_v41 = vmul.f32 %v3117_v40, %v3109_v17  ;;  %v3048_v40 = vld [vmem:[%s3846_s8 + $0x38] sm:$0xff]  }
 0x4f1   : > { %2856 = vmatmul.mubr.msk.bf16.vlgmr.msra.gmra.mxu1 %vm494_vm2, %v856_v39  ;;  %v982_v42 = vpack.c.bf16 %v981_v41, %v981_v41  ;;  %v3049_v41 = vld [vmem:[%s3846_s8 + $0x30] sm:$0xff]  }
 0x4f2   : > { %2866 = vmatpush3.bf16.msra.mxu1 %v863_v37  ;;  %2867 = vmatprep.mubr.msk.bf16.mxu1 %vm3159_vm1, %v3158_v4 }
 0x4f3   : > { %2903 = vmatprep.subr.bf16.mxu1 %v3158_v4 }
 0x4f9   : > { %2868 = vmatmul.mubr.msk.bf16.vlgmr.msra.gmra.mxu1 %vm494_vm2, %v982_v42  ;;  %v3050_v42 = vld [vmem:[%s3846_s8 + $0x28] sm:$0xff]  }
 0x4fa   : > { %2911 = vmatprep.mubr.msk.bf16.mxu1 %vm3159_vm1, %v3158_v4 }
 0x5a1   : > { %v645_v45 = vpop.f32.mrf.mxu1 }
 0x5a3   : > { %v2833_v46 = vpop.f32.mrf.mxu1 }
 0x5a4   : > { %v3053_v46 = vld [vmem:[%s3846_s8 + $0x10] sm:$0xff]  }
 0x5a5   : > { %v648_v49 = vpop.f32.mrf.mxu1 }
 0x5a6   : > { %v3055_v49 = vld [vmem:[%s3846_s8] sm:$0xff]  }
 0x5a7   : > { %v2834_v52 = vpop.f32.mrf.mxu1 }
 0x5a9   : > { %v766_v53 = vpop.f32.mrf.mxu1 }
 0x5aa   : > { %1027 = vrot.lane.b32.xlu1 %v766_v53, %s3168_s29 }
 0x5ab   : > { %v2845_v54 = vpop.f32.mrf.mxu1 }
 0x5ad   : > { %v769_v56 = vpop.f32.mrf.mxu1 }
 0x5af   : > { %v2846_v58 = vpop.f32.mrf.mxu1 }
 0x5b1   : > { %v899_v59 = vpop.f32.mrf.mxu1 }
 0x5b2   : > { %1031 = vrot.lane.b32.xlu0 %v899_v59, %s3856_s30 }
 0x5b3   : > { %v2857_v61 = vpop.f32.mrf.mxu1 }
 0x5b5   : > { %v902_v62 = vpop.f32.mrf.mxu1 }
 0x5b7   : > { %v2858_v63 = vpop.f32.mrf.mxu1 }
 0x5b9   : > { %v1020_v1 = vpop.f32.mrf.mxu1 }
 0x5ba   : > { %1035 = vrot.lane.b32.xlu1 %v1020_v1, %s3854_s12 }
 0x5bb   : > { %v2869_v2 = vpop.f32.mrf.mxu1 }
 0x5bd   : > { %v1023_v3 = vpop.f32.mrf.mxu1 }
 0x5bf   : > { %v2870_v5 = vpop.f32.mrf.mxu1 }
 0x61c   : > { %v1028_v6 = vpop.permute.xlu1 %1027 }
 0x61d   : > { %v1038_v8 = vsel %vm539_vm3, %v645_v45, %v1028_v6  ;;  %v3052_v45 = vld [vmem:[%s3846_s8 + $0x18] sm:$0xff]  }
 0x624   : > { %v1032_v7 = vpop.permute.xlu0 %1031 }
 0x625   : > { %v1040_v9 = vsel %vm1039_vm6, %v1038_v8, %v1032_v7 }
 0x62c   : > { %v1036_v10 = vpop.permute.xlu1 %1035 }
 0x62d   : > { %v1042_v11 = vsel %vm1041_vm7, %v1040_v9, %v1036_v10  ;;  %v3056_v9 = vld [vmem:[%s3842_s4 + $0x38] sm:$0xff]   ;;  %v3057_v10 = vld [vmem:[%s3842_s4 + $0x30] sm:$0xff]  }
 0x62e   : > { %v1051_v12 = vpack.c.bf16 %v1042_v11, %v1042_v11  ;;  %2904 = vmatpush3.bf16.msra.mxu1 %v3056_v9  ;;  %v3058_v11 = vld [vmem:[%s3842_s4 + $0x28] sm:$0xff]  }
 0x62f   : > { %2905 = vmatprep.subr.bf16.mxu1 %v3158_v4 }
 0x630   : > { %2880 = vmatmul.mubr.msk.bf16.vlgmr.msra.gmra.mxu0 %vm393_vm0, %v1051_v12  ;;  %v3059_v12 = vld [vmem:[%s3842_s4 + $0x20] sm:$0xff]  }
 0x631   : > { %1197 = vmatpush1.bf16.msra.mxu0 %v3036_v22  ;;  %1220 = vmatprep.mubr.bf16.mxu0 %v3174_v28 }
 0x632   : > { %2906 = vmatpush3.bf16.msra.mxu1 %v3057_v10 }
 0x633   : > { %2907 = vmatprep.subr.bf16.mxu1 %v3158_v4 }
 0x636   : > { %2908 = vmatpush3.bf16.msra.mxu1 %v3058_v11 }
 0x637   : > { %2909 = vmatprep.subr.bf16.mxu1 %v3158_v4 }
 0x63a   : > { %2910 = vmatpush3.bf16.msra.mxu1 %v3059_v12 }
 0x63b   : > { %2915 = vmatprep.subr.bf16.mxu1 %v3158_v4 }
 0x6f0   : > { %v1113_v13 = vpop.f32.mrf.mxu0 }
 0x6f1   : > { %v3456_v14 = vadd.f32 %v1113_v13, %v3251_v0  ;;  %v3041_v0 = vld [vmem:[%s3845_s7 + $0x24] ss:$8 sps:$4 sm:$0xff]  }
 0x6f2   : > { %v2881_v15 = vpop.f32.mrf.mxu0  ;;  %1198 = vmatprep.subr.bf16.mxu0 %v3041_v0 }
 0x6f3   : > { %v1121_v17 = vmul.f32 %v3456_v14, %v3456_v14  ;;  %1199 = vmatpush1.bf16.msra.mxu0 %v3039_v26 }
 0x6f4   : > { %v1116_v18 = vpop.f32.mrf.mxu0  ;;  %1200 = vmatprep.subr.bf16.mxu0 %v3044_v29 }
 0x6f5   : > { %v1122_v19 = vsel %vm393_vm0, %v1121_v17, 0.0  ;;  %v2624_v18 = vld [vmem:[%s3841_s3 + $0x1] ss:$0 sm:$0xff] }
 0x6f6   : > { %1123 = vadd.xlane.f32.xlu0 %v1122_v19  ;;  %v2882_v20 = vpop.f32.mrf.mxu0 }
 0x6f7   : > { %1201 = vmatpush1.bf16.msra.mxu0 %v3042_v30 }
 0x6f8   : > { %1202 = vmatprep.subr.bf16.mxu0 %v3047_v31 }
 0x6fb   : > { %1203 = vmatpush1.bf16.msra.mxu0 %v3045_v16 }
 0x6fc   : > { %2883 = vmatprep.subr.bf16.mxu0 %v3158_v4 }
 0x77f   : > { %v1124_v32 = vpop.xlane.xlu0 %1123 }
 0x780   : > { %v1125_v33 = vmul.f32 0.015625, %v1124_v32 }
 0x782   : > { %v1126_v34 = vadd.f32 1e-06, %v1125_v33 }
 0x784   : > { %3118 = vrsqrt.f32 %v1126_v34 }
 0x791   : > { %v3119_v35 = vpop.eup %3118 }
 0x792   : > { %v1128_v37 = vmul.f32 %v3119_v35, %v3456_v14 }
 0x794   : > { %v1135_v38 = vmul.f32 %v2604_v36, %v1128_v37 }
 0x796   : > { %v1144_v39 = vpack.c.bf16 %v1135_v38, %v1135_v38 }
 0x798   : > { %2613 = vmatmul.mubr.msk.bf16.vlgmr.msra.gmra.mxu0 %vm393_vm0, %v1144_v39 }
 0x799   : > { %2899 = vmatprep.mubr.msk.bf16.mxu0 %vm3159_vm1, %v3158_v4  ;;  %2884 = vmatpush3.bf16.msra.mxu0 %v3048_v40 }
 0x79a   : > { %2885 = vmatprep.subr.bf16.mxu0 %v3158_v4 }
 0x79d   : > { %2886 = vmatpush3.bf16.msra.mxu0 %v3049_v41 }
 0x79e   : > { %2887 = vmatprep.subr.bf16.mxu0 %v3158_v4 }
 0x7a1   : > { %2888 = vmatpush3.bf16.msra.mxu0 %v3050_v42 }
 0x7a2   : > { %2889 = vmatprep.subr.bf16.mxu0 %v3158_v4 }
 0x7a5   : > { %2890 = vmatpush3.bf16.msra.mxu0 %v3051_v44 }
 0x7a6   : > { %2891 = vmatprep.subr.bf16.mxu0 %v3158_v4 }
 0x7a9   : > { %2892 = vmatpush3.bf16.msra.mxu0 %v3052_v45 }
 0x7aa   : > { %2893 = vmatprep.subr.bf16.mxu0 %v3158_v4 }
 0x7ad   : > { %2894 = vmatpush3.bf16.msra.mxu0 %v3053_v46 }
 0x7ae   : > { %2895 = vmatprep.subr.bf16.mxu0 %v3158_v4 }
 0x7b1   : > { %2896 = vmatpush3.bf16.msra.mxu0 %v3054_v47 }
 0x7b2   : > { %2897 = vmatprep.subr.bf16.mxu0 %v3158_v4 }
 0x7b5   : > { %2898 = vmatpush3.bf16.msra.mxu0 %v3055_v49 }
 0x7b6   : > { %2927 = vmatprep.subr.bf16.mxu0 %v3158_v4 }
 0x858   : > { %v1222_v51 = vpop.f32.mrf.mxu0 }
 0x859   : > { %v2614_v52 = vmul.f32 -1.442695, %v1222_v51 }
 0x85a   : > { %v1224_v53 = vpop.f32.mrf.mxu0 }
 0x85b   : > { %3120 = vpow2.f32 %v2614_v52 }
 0x85c   : > { %v1226_v54 = vpop.f32.mrf.mxu0 }
 0x85e   : > { %v1227_v55 = vpop.f32.mrf.mxu0 }
 0x868   : > { %v3121_v56 = vpop.eup %3120 }
 0x869   : > { %v1232_v58 = vadd.f32 1.0, %v3121_v56 }
 0x86b   : > { %3122 = vrcp.f32 %v1232_v58 }
 0x878   : > { %v3123_v59 = vpop.eup %3122 }
 0x879   : > { %v1235_v61 = vmul.f32 %v3123_v59, %v1222_v51 }
 0x87b   : > { %v1236_v62 = vmul.f32 %v1235_v61, %v1224_v53 }
 0x87d   : > { %v1253_v63 = vpack.c.bf16 %v1236_v62, %v1236_v62 }
 0x87f   : > { %2900 = vmatmul.mubr.bf16.vlgmr.msra.gmra.mxu0 %v1253_v63 }
 0x880   : > { %2929 = vmatprep.mubr.msk.bf16.mxu0 %vm3159_vm1, %v3158_v4 }
 0x93f   : > { %v1336_v1 = vpop.f32.mrf.mxu0 }
 0x940   : > { %v3529_v2 = vadd.f32 %v1336_v1, %v3456_v14 }
 0x941   : > { %v2901_v3 = vpop.f32.mrf.mxu0 }
 0x942   : > { %v1345_v5 = vmul.f32 %v3529_v2, %v3529_v2 }
 0x943   : > { %v1339_v6 = vpop.f32.mrf.mxu0 }
 0x944   : > { %v1346_v7 = vsel %vm393_vm0, %v1345_v5, 0.0 }
 0x945   : > { %1347 = vadd.xlane.f32.xlu1 %v1346_v7  ;;  %v2902_v8 = vpop.f32.mrf.mxu0 }
 0x9ce   : > { %v1348_v13 = vpop.xlane.xlu1 %1347 }
 0x9cf   : > { %v1349_v14 = vmul.f32 0.015625, %v1348_v13 }
 0x9d1   : > { %v1350_v15 = vadd.f32 1e-06, %v1349_v14 }
 0x9d3   : > { %3124 = vrsqrt.f32 %v1350_v15 }
 0x9e0   : > { %v3125_v17 = vpop.eup %3124 }
 0x9e1   : > { %v1352_v19 = vmul.f32 %v3125_v17, %v3529_v2 }
 0x9e3   : > { %v1359_v20 = vmul.f32 %v2624_v18, %v1352_v19 }
 0x9e5   : > { %v1369_v22 = vpack.c.bf16 %v1359_v20, %v1359_v20 }
 0x9e7   : > { %2912 = vmatmul.mubr.msk.bf16.vlgmr.msra.gmra.mxu1 %vm393_vm0, %v1369_v22 }
 0x9e8   : > { %2917 = vmatprep.mubr.msk.bf16.mxu1 %vm3159_vm1, %v3158_v4 }
 0xaa7   : > { %v3557_v24 = vpop.f32.mrf.mxu1 }
 0xaa8   : > { %1443 = vrot.lane.b32.xlu1 %v3557_v24, %s3160_s14  ;;  %v1437_v0 = vsub.f32 0.0, %v3557_v24  ;;  %v1447_v53 = vmul.f32 %v3557_v24, %v3339_v43  ;;  %v1461_v59 = vmul.f32 %v3557_v24, %v3344_v48  ;;  %v1600_v62 = vmul.f32 %v3557_v24, %v3350_v50 }
 0xaa9   : > { %v2913_v26 = vpop.f32.mrf.mxu1  ;;  %v1718_v5 = vmul.f32 %v3557_v24, %v3355_v57  ;;  %v1848_v50 = vmul.f32 %v3557_v24, %v3360_v60  ;;  %v1475_v14 = vmul.f32 %v3557_v24, %v3299_v21 }
 0xaaa   : > { %1439 = vrot.lane.b32.xlu0 %v1437_v0, %s3161_s15 }
 0xaab   : > { %v1434_v29 = vpop.f32.mrf.mxu1 }
 0xaac   : > { %1457 = vrot.lane.b32.xlu1 %v3557_v24, %s3161_s15  ;;  %s3861_s15 = smov 48  }
 0xaad   : > { %v2914_v30 = vpop.f32.mrf.mxu1 }
 0xaae   : > { %1454 = vrot.lane.b32.xlu0 %v1437_v0, %s3164_s23  ;;  %s3862_s23 = smov 8  }
 0xab0   : > { %1596 = vrot.lane.b32.xlu1 %v3557_v24, %s3162_s16 }
 0xab2   : > { %1593 = vrot.lane.b32.xlu0 %v1437_v0, %s3166_s25 }
 0xab4   : > { %1714 = vrot.lane.b32.xlu1 %v3557_v24, %s3166_s25 }
 0xab6   : > { %1711 = vrot.lane.b32.xlu0 %v1437_v0, %s3167_s26 }
 0xab8   : > { %1844 = vrot.lane.b32.xlu1 %v3557_v24, %s3167_s26 }
 0xaba   : > { %1841 = vrot.lane.b32.xlu0 %v1437_v0, %s3160_s14  ;;  %s3860_s14 = smov 32  }
 0xb1a   : > { %v1444_v31 = vpop.permute.xlu1 %1443 }
 0xb1c   : > { %v1440_v16 = vpop.permute.xlu0 %1439 }
 0xb1d   : > { %v1446_v32 = vsel %vm494_vm2, %v1440_v16, %v1444_v31 }
 0xb1e   : > { %v1448_v33 = vmul.f32 %v1446_v32, %v3315_v23  ;;  %v1458_v34 = vpop.permute.xlu1 %1457 }
 0xb20   : > { %1450 = vrot.lane.b32.xlu0 %v1448_v33, %s3163_s22  ;;  %v1455_v35 = vpop.permute.xlu0 %1454 }
 0xb21   : > { %v1460_v36 = vsel %vm494_vm2, %v1455_v35, %v1458_v34 }
 0xb22   : > { %v1462_v37 = vmul.f32 %v1460_v36, %v3315_v23  ;;  %v1597_v38 = vpop.permute.xlu1 %1596 }
 0xb24   : > { %1464 = vrot.lane.b32.xlu1 %v1462_v37, %s3165_s24  ;;  %v1594_v39 = vpop.permute.xlu0 %1593 }
 0xb25   : > { %v1599_v40 = vsel %vm494_vm2, %v1594_v39, %v1597_v38 }
 0xb26   : > { %v1601_v41 = vmul.f32 %v1599_v40, %v3315_v23  ;;  %v1715_v42 = vpop.permute.xlu1 %1714 }
 0xb28   : > { %1603 = vrot.lane.b32.xlu0 %v1601_v41, %s3168_s29  ;;  %v1712_v44 = vpop.permute.xlu0 %1711 }
 0xb29   : > { %v1717_v45 = vsel %vm494_vm2, %v1712_v44, %v1715_v42 }
 0xb2a   : > { %v1719_v46 = vmul.f32 %v1717_v45, %v3315_v23  ;;  %v1845_v47 = vpop.permute.xlu1 %1844 }
 0xb2c   : > { %1721 = vrot.lane.b32.xlu1 %v1719_v46, %s3860_s14  ;;  %v1842_v49 = vpop.permute.xlu0 %1841 }
 0xb2d   : > { %v1847_v51 = vsel %vm494_vm2, %v1842_v49, %v1845_v47 }
 0xb2e   : > { %v1849_v52 = vmul.f32 %v1847_v51, %v3315_v23 }
 0xb30   : > { %1851 = vrot.lane.b32.xlu0 %v1849_v52, %s3861_s15 }
 0xb34   : > { %1468 = vrot.lane.b32.xlu0 %v1437_v0, %s3162_s16  ;;  %s3863_s16 = smov 112  }
 0xb92   : > { %v1451_v54 = vpop.permute.xlu0 %1450 }
 0xb93   : > { %v1453_v55 = vadd.f32 %v1451_v54, %v1447_v53 }
 0xb95   : > { %v1479_v56 = vpack.c.bf16 %v1453_v55, %v1453_v55 }
 0xb96   : > { %v1465_v58 = vpop.permute.xlu1 %1464 }
 0xb97   : > { %1481 = vrot.lane.b32.xlu1 %v1479_v56, %s3163_s22  ;;  %v1467_v61 = vadd.f32 %v1465_v58, %v1461_v59  ;;  %s3864_s22 = smov 96  }
 0xb99   : > { %v1726_v3 = vpack.c.bf16 %v1467_v61, %v1467_v61 }
 0xb9a   : > { %v1604_v63 = vpop.permute.xlu0 %1603 }
 0xb9b   : > { %v1606_v1 = vadd.f32 %v1604_v63, %v1600_v62  ;;  %1471 = vrot.lane.b32.xlu1 %v3557_v24, %s3862_s23 }
 0xb9d   : > { %v1607_v43 = vpack.c.bf16 %v1606_v1, %v1606_v1 }
 0xb9e   : > { %v1722_v6 = vpop.permute.xlu1 %1721 }
 0xb9f   : > { %v1724_v7 = vadd.f32 %v1722_v6, %v1718_v5  ;;  %1731 = vrot.lane.b32.xlu1 %v1726_v3, %s3861_s15  ;;  %1609 = vrot.lane.b32.xlu0 %v1607_v43, %s3863_s16 }
 0xba1   : > { %v1725_v48 = vpack.c.bf16 %v1724_v7, %v1724_v7 }
 0xba2   : > { %v1852_v8 = vpop.permute.xlu0 %1851 }
 0xba3   : > { %v1854_v9 = vadd.f32 %v1852_v8, %v1848_v50  ;;  %1728 = vrot.lane.b32.xlu0 %v1725_v48, %s3864_s22 }
 0xba5   : > { %v1855_v10 = vpack.c.bf16 %v1854_v9, %v1854_v9 }
 0xba6   : > { %v1469_v12 = vpop.permute.xlu0 %1468 }
 0xba7   : > { %1857 = vrot.lane.b32.xlu1 %v1855_v10, %s3165_s24 }
 0xc09   : > { %v1482_v11 = vpop.permute.xlu1 %1481 }
 0xc0a   : > { %v1487_v57 = vsel %vm539_vm3, %v1482_v11, 0 }
 0xc0b   : > { %2916 = vmatpush3.bf16.xpose.msra.mxu1 %v1487_v57  ;;  %2928 = vmatpush3.bf16.xpose.msra.mxu0 %v1487_v57 }
 0xc0c   : > { %2939 = vmatprep.subr.bf16.mxu0 %v3158_v4  ;;  %2921 = vmatprep.subr.bf16.mxu1 %v3158_v4 }
 0xc0d   : > { %v1472_v13 = vpop.permute.xlu1 %1471 }
 0xc0e   : > { %v1474_v60 = vsel %vm494_vm2, %v1469_v12, %v1472_v13  ;;  %v1543_v13 = vpack.c.bf16 %v3557_v24, %v3557_v24 }
 0xc0f   : > { %v1476_v15 = vmul.f32 %v1474_v60, %v3315_v23 }
 0xc11   : > { %v1477_v17 = vadd.f32 %v1476_v15, %v1475_v14  ;;  %v1732_v18 = vpop.permute.xlu1 %1731  ;;  %v1610_v19 = vpop.permute.xlu0 %1609 }
 0xc12   : > { %v1737_v20 = vsel %vm539_vm3, %v1732_v18, 0  ;;  %2930 = vmatmul.mubr.msk.bf16.vlgmr.msra.gmra.mxu0 %vm539_vm3, %v1610_v19 }
 0xc13   : > { %v1478_v22 = vpack.c.bf16 %v1477_v17, %v1477_v17  ;;  %2940 = vmatpush3.bf16.xpose.msra.mxu0 %v1737_v20  ;;  %2941 = vmatprep.mubr.msk.bf16.mxu0 %vm3159_vm1, %v3158_v4 }
 0xc14   : > { %2951 = vmatprep.subr.bf16.mxu0 %v3158_v4 }
 0xc15   : > { %2918 = vmatmul.mubr.msk.bf16.vlgmr.msra.gmra.mxu1 %vm539_vm3, %v1478_v22  ;;  %v1729_v21 = vpop.permute.xlu0 %1728 }
 0xc16   : > { %2923 = vmatprep.mubr.msk.bf16.mxu1 %vm3159_vm1, %v3158_v4 }
 0xc19   : > { %v1858_v23 = vpop.permute.xlu1 %1857 }
 0xc1a   : > { %2942 = vmatmul.mubr.msk.bf16.vlgmr.msra.gmra.mxu0 %vm539_vm3, %v1729_v21 }
 0xc1b   : > { %2952 = vmatpush3.bf16.xpose.msra.mxu0 %v1737_v20  ;;  %2953 = vmatprep.mubr.msk.bf16.mxu0 %vm3159_vm1, %v3158_v4 }
 0xc1c   : > { %2963 = vmatprep.subr.bf16.mxu0 %v3158_v4 }
 0xc22   : > { %2954 = vmatmul.mubr.msk.bf16.vlgmr.msra.gmra.mxu0 %vm539_vm3, %v1858_v23 }
 0xc23   : > { %2971 = vmatprep.mubr.msk.bf16.mxu0 %vm3159_vm1, %v3158_v4 }
 0xcd2   : > { %v1648_v0 = vpop.f32.mrf.mxu0 }
 0xcd3   : > { %v1654_v26 = vmul.f32 0.25, %v1648_v0 }
 0xcd4   : > { %v2931_v29 = vpop.f32.mrf.mxu0 }
 0xcd5   : > { %v1523_v30 = vpop.f32.mrf.mxu1  ;;  %v1655_v31 = vsel %vm3391_vm4, %v1654_v26, -1e+30 }
 0xcd6   : > { %v1529_v16 = vmul.f32 0.25, %v1523_v30  ;;  %v1651_v32 = vpop.f32.mrf.mxu0  ;;  %v1656_v33 = vsel %vm494_vm2, %v1655_v31, -inf }
 0xcd7   : > { %v2919_v34 = vpop.f32.mrf.mxu1  ;;  %1657 = vmax.xlane.f32.xlu1 %v1656_v33 }
 0xcd8   : > { %v2932_v35 = vpop.f32.mrf.mxu0  ;;  %v1530_v36 = vsel %vm3391_vm4, %v1529_v16, -1e+30 }
 0xcd9   : > { %v1526_v37 = vpop.f32.mrf.mxu1  ;;  %v1531_v38 = vsel %vm494_vm2, %v1530_v36, -inf  ;;  %v3060_v35 = vld [vmem:[%s3843_s5 + $0x38] sm:$0xff]  }
 0xcda   : > { %1532 = vmax.xlane.f32.xlu0 %v1531_v38  ;;  %v1773_v39 = vpop.f32.mrf.mxu0  ;;  %2964 = vmatpush3.bf16.msra.mxu0 %v3060_v35  ;;  %v3061_v38 = vld [vmem:[%s3843_s5 + $0x30] sm:$0xff]  }
 0xcdb   : > { %v1779_v40 = vmul.f32 0.25, %v1773_v39  ;;  %v2920_v41 = vpop.f32.mrf.mxu1  ;;  %2965 = vmatprep.subr.bf16.mxu0 %v3158_v4 }
 0xcdc   : > { %v2943_v42 = vpop.f32.mrf.mxu0 }
 0xcdd   : > { %v1780_v44 = vsel %vm3391_vm4, %v1779_v40, -1e+30  ;;  %v3062_v40 = vld [vmem:[%s3843_s5 + $0x28] sm:$0xff]  }
 0xcde   : > { %v1776_v45 = vpop.f32.mrf.mxu0  ;;  %v1781_v46 = vsel %vm494_vm2, %v1780_v44, -inf  ;;  %2966 = vmatpush3.bf16.msra.mxu0 %v3061_v38 }
 0xcdf   : > { %1782 = vmax.xlane.f32.xlu0 %v1781_v46  ;;  %2967 = vmatprep.subr.bf16.mxu0 %v3158_v4 }
 0xce0   : > { %v2944_v47 = vpop.f32.mrf.mxu0 }
 0xce2   : > { %v1896_v49 = vpop.f32.mrf.mxu0  ;;  %2968 = vmatpush3.bf16.msra.mxu0 %v3062_v40 }
 0xce3   : > { %v1902_v51 = vmul.f32 0.25, %v1896_v49  ;;  %2969 = vmatprep.subr.bf16.mxu0 %v3158_v4 }
 0xce4   : > { %v2955_v52 = vpop.f32.mrf.mxu0 }
 0xce5   : > { %v1903_v53 = vsel %vm3391_vm4, %v1902_v51, -1e+30 }
 0xce6   : > { %v1899_v54 = vpop.f32.mrf.mxu0  ;;  %v1904_v55 = vsel %vm494_vm2, %v1903_v53, -inf }
 0xce7   : > { %1905 = vmax.xlane.f32.xlu0 %v1904_v55 }
 0xce8   : > { %v2956_v56 = vpop.f32.mrf.mxu0 }
 0xd60   : > { %v1658_v58 = vpop.xlane.xlu1 %1657 }
 0xd61   : > { %v1659_v59 = vsub.f32 %v1655_v31, %v1658_v58 }
 0xd63   : > { %v1660_v61 = vmul.f32 1.442695, %v1659_v59  ;;  %v1533_v62 = vpop.xlane.xlu0 %1532 }
 0xd64   : > { %v1534_v63 = vsub.f32 %v1530_v36, %v1533_v62 }
 0xd65   : > { %3126 = vpow2.f32 %v1660_v61 }
 0xd66   : > { %v1535_v1 = vmul.f32 1.442695, %v1534_v63 }
 0xd68   : > { %3128 = vpow2.f32 %v1535_v1  ;;  %v1783_v3 = vpop.xlane.xlu0 %1782 }
 0xd69   : > { %v1784_v43 = vsub.f32 %v1780_v44, %v1783_v3  ;;  %v3063_v44 = vld [vmem:[%s3843_s5 + $0x20] sm:$0xff]  }
 0xd6a   : > { %2970 = vmatpush3.bf16.msra.mxu0 %v3063_v44 }
 0xd6b   : > { %v1785_v5 = vmul.f32 1.442695, %v1784_v43  ;;  %2975 = vmatprep.subr.bf16.mxu0 %v3158_v4 }
 0xd6d   : > { %3130 = vpow2.f32 %v1785_v5 }
 0xd70   : > { %v1906_v6 = vpop.xlane.xlu0 %1905 }
 0xd71   : > { %v1907_v27 = vsub.f32 %v1903_v53, %v1906_v6 }
 0xd72   : > { %v3127_v7 = vpop.eup %3126 }
 0xd73   : > { %v1908_v48 = vmul.f32 1.442695, %v1907_v27  ;;  %v1662_v50 = vsel %vm494_vm2, %v3127_v7, 0.0 }
 0xd74   : > { %1663 = vadd.xlane.f32.xlu0 %v1662_v50 }
 0xd75   : > { %v3129_v8 = vpop.eup %3128  ;;  %3132 = vpow2.f32 %v1908_v48 }
 0xd76   : > { %v1537_v9 = vsel %vm494_vm2, %v3129_v8, 0.0 }
 0xd77   : > { %1538 = vadd.xlane.f32.xlu1 %v1537_v9  ;;  %v3066_v9 = vld [vmem:[%s3845_s7 + $0x74] ss:$8 sps:$4 sm:$0xff]  }
 0xd7a   : > { %v3131_v10 = vpop.eup %3130 }
 0xd7b   : > { %v1787_v11 = vsel %vm494_vm2, %v3131_v10, 0.0 }
 0xd7c   : > { %1788 = vadd.xlane.f32.xlu1 %v1787_v11  ;;  %v3072_v11 = vld [vmem:[%s3845_s7 + $0x54] ss:$8 sps:$4 sm:$0xff]  }
 0xd82   : > { %v3133_v57 = vpop.eup %3132 }
 0xd83   : > { %v1910_v12 = vsel %vm494_vm2, %v3133_v57, 0.0 }
 0xd84   : > { %1911 = vadd.xlane.f32.xlu0 %v1910_v12  ;;  %v3075_v12 = vld [vmem:[%s3845_s7 + $0x44] ss:$8 sps:$4 sm:$0xff]  }
 0xd8d   : > { %1545 = vrot.lane.b32.xlu1 %v1543_v13, %s3860_s14 }
 0xd9a   : > { %1793 = vrot.lane.b32.xlu0 %v1543_v13, %s3168_s29  ;;  %v3073_v13 = vld [vmem:[%s3845_s7 + $0x40] ss:$8 sps:$4 sm:$0xff]  }
 0xdfd   : > { %v1664_v14 = vpop.xlane.xlu0 %1663 }
 0xe00   : > { %v1539_v60 = vpop.xlane.xlu1 %1538 }
 0xe01   : > { %3134 = vrcp.f32 %v1539_v60 }
 0xe02   : > { %3136 = vrcp.f32 %v1664_v14 }
 0xe05   : > { %v1789_v15 = vpop.xlane.xlu1 %1788 }
 0xe06   : > { %3138 = vrcp.f32 %v1789_v15 }
 0xe09   : > { %v1546_v17 = vpop.permute.xlu1 %1545 }
 0xe0a   : > { %v1551_v18 = vsel %vm607_vm5, %v1546_v17, 0 }
 0xe0b   : > { %2922 = vmatpush3.bf16.msra.mxu1 %v1551_v18 }
 0xe0c   : > { %2933 = vmatprep.subr.bf16.mxu1 %v3158_v4 }
 0xe0d   : > { %v1912_v21 = vpop.xlane.xlu0 %1911 }
 0xe0e   : > { %v3135_v19 = vpop.eup %3134  ;;  %3140 = vrcp.f32 %v1912_v21  ;;  %v3077_v21 = vld [vmem:[%s3846_s8 + $0x70] sm:$0xff]  }
 0xe0f   : > { %v1541_v20 = vmul.f32 %v3135_v19, %v3129_v8  ;;  %v3137_v24 = vpop.eup %3136  ;;  %v3064_v8 = vld [vmem:[%s3845_s7 + $0x70] ss:$8 sps:$4 sm:$0xff]  }
 0xe10   : > { %v1666_v23 = vmul.f32 %v3137_v24, %v3127_v7  ;;  %v3076_v24 = vld [vmem:[%s3846_s8 + $0x78] sm:$0xff]  }
 0xe11   : > { %v1542_v22 = vpack.c.bf16 %v1541_v20, %v1541_v20  ;;  %v1794_v0 = vpop.permute.xlu0 %1793 }
 0xe12   : > { %v1667_v26 = vpack.c.bf16 %v1666_v23, %v1666_v23  ;;  %v1799_v30 = vsel %vm607_vm5, %v1794_v0, 0  ;;  %v3078_v23 = vld [vmem:[%s3846_s8 + $0x68] sm:$0xff]   ;;  %v3079_v0 = vld [vmem:[%s3846_s8 + $0x60] sm:$0xff]  }
 0xe13   : > { %2924 = vmatmul.mubr.msk.bf16.vlgmr.msra.gmra.mxu1 %vm494_vm2, %v1542_v22  ;;  %v3139_v29 = vpop.eup %3138 }
 0xe14   : > { %2934 = vmatpush3.bf16.msra.mxu1 %v1551_v18  ;;  %2935 = vmatprep.mubr.msk.bf16.mxu1 %vm3159_vm1, %v3158_v4  ;;  %v1791_v31 = vmul.f32 %v3139_v29, %v3131_v10  ;;  %v3067_v10 = vld [vmem:[%s3845_s7 + $0x60] ss:$8 sps:$4 sm:$0xff]   ;;  %v3081_v29 = vld [vmem:[%s3846_s8 + $0x50] sm:$0xff]  }
 0xe15   : > { %2945 = vmatprep.subr.bf16.mxu1 %v3158_v4  ;;  %v2660_v18 = vld [vmem:[%s3844_s6 + $0x1] ss:$0 sm:$0xff] }
 0xe16   : > { %v1792_v16 = vpack.c.bf16 %v1791_v31, %v1791_v31  ;;  %v3083_v31 = vld [vmem:[%s3846_s8 + $0x40] sm:$0xff]  }
 0xe1b   : > { %2936 = vmatmul.mubr.msk.bf16.vlgmr.msra.gmra.mxu1 %vm494_vm2, %v1667_v26  ;;  %v3141_v32 = vpop.eup %3140  ;;  %v3080_v26 = vld [vmem:[%s3846_s8 + $0x58] sm:$0xff]  }
 0xe1c   : > { %2946 = vmatpush3.bf16.msra.mxu1 %v1799_v30  ;;  %2947 = vmatprep.mubr.msk.bf16.mxu1 %vm3159_vm1, %v3158_v4  ;;  %v1914_v33 = vmul.f32 %v3141_v32, %v3133_v57  ;;  %v3070_v57 = vld [vmem:[%s3845_s7 + $0x50] ss:$8 sps:$4 sm:$0xff]  }
 0xe1d   : > { %2957 = vmatprep.subr.bf16.mxu1 %v3158_v4 }
 0xe1e   : > { %v1915_v34 = vpack.c.bf16 %v1914_v33, %v1914_v33 }
 0xe23   : > { %2948 = vmatmul.mubr.msk.bf16.vlgmr.msra.gmra.mxu1 %vm494_vm2, %v1792_v16 }
 0xe24   : > { %2958 = vmatpush3.bf16.msra.mxu1 %v1799_v30  ;;  %2959 = vmatprep.mubr.msk.bf16.mxu1 %vm3159_vm1, %v3158_v4  ;;  %v3082_v30 = vld [vmem:[%s3846_s8 + $0x48] sm:$0xff]  }
 0xe25   : > { %2130 = vmatprep.subr.bf16.mxu1 %v3066_v9  ;;  %v3099_v9 = vld [vmem:[%s3848_s10] sm:$0xff]  }
 0xe2b   : > { %2960 = vmatmul.mubr.msk.bf16.vlgmr.msra.gmra.mxu1 %vm494_vm2, %v1915_v34 }
 0xe2c   : > { %2154 = vmatprep.mubr.bf16.mxu1 %v3174_v28  ;;  %2131 = vmatpush1.bf16.msra.mxu1 %v3064_v8  ;;  %v3098_v8 = vld [vmem:[%s3848_s10 + $0x40] sm:$0xff]  }
 0xed3   : > { %v1587_v36 = vpop.f32.mrf.mxu1 }
 0xed5   : > { %v2925_v37 = vpop.f32.mrf.mxu1 }
 0xed7   : > { %v1590_v39 = vpop.f32.mrf.mxu1 }
 0xed9   : > { %v2926_v28 = vpop.f32.mrf.mxu1 }
 0xedb   : > { %v1705_v41 = vpop.f32.mrf.mxu1 }
 0xedc   : > { %1960 = vrot.lane.b32.xlu1 %v1705_v41, %s3168_s29  ;;  %v3085_v41 = vld [vmem:[%s3848_s10 + $0x38] sm:$0xff]   ;;  %s3865_s29 = sshll.u32 %s3867_s18, 3 }
 0xedd   : > { %v2937_v42 = vpop.f32.mrf.mxu1  ;;  %v2432_v44 = vsel %vm393_vm0, %v3085_v41, 0  ;;  %s381_s21 = scalar_lea.vmem %s3849_s11, %s3865_s29 }
 0xede   : > { %v3086_v42 = vld [vmem:[%s3848_s10 + $0x70] sm:$0xff]  }
 0xedf   : > { %v1708_v45 = vpop.f32.mrf.mxu1 }
 0xee0   : > { %v3087_v45 = vld [vmem:[%s3848_s10 + $0x30] sm:$0xff]  }
 0xee1   : > { %v2938_v46 = vpop.f32.mrf.mxu1 }
 0xee2   : > { %v2429_v46 = vsel %vm393_vm0, %v3087_v45, 0 }
 0xee3   : > { %v1835_v47 = vpop.f32.mrf.mxu1 }
 0xee4   : > { %1964 = vrot.lane.b32.xlu1 %v1835_v47, %s3860_s14  ;;  %v3088_v47 = vld [vmem:[%s3848_s10 + $0x68] sm:$0xff]  }
 0xee5   : > { %v2949_v49 = vpop.f32.mrf.mxu1 }
 0xee6   : > { %v3089_v49 = vld [vmem:[%s3848_s10 + $0x28] sm:$0xff]  }
 0xee7   : > { %v1838_v51 = vpop.f32.mrf.mxu1 }
 0xee8   : > { %v2426_v51 = vsel %vm393_vm0, %v3089_v49, 0 }
 0xee9   : > { %v2950_v52 = vpop.f32.mrf.mxu1 }
 0xeea   : > { %v3090_v52 = vld [vmem:[%s3848_s10 + $0x60] sm:$0xff]  }
 0xeeb   : > { %v1953_v53 = vpop.f32.mrf.mxu1 }
 0xeec   : > { %1968 = vrot.lane.b32.xlu0 %v1953_v53, %s3861_s15  ;;  %v3091_v53 = vld [vmem:[%s3848_s10 + $0x20] sm:$0xff]  }
 0xeed   : > { %v2961_v54 = vpop.f32.mrf.mxu1 }
 0xeee   : > { %v2423_v54 = vsel %vm393_vm0, %v3091_v53, 0 }
 0xeef   : > { %v1956_v55 = vpop.f32.mrf.mxu1 }
 0xef0   : > { %v3092_v55 = vld [vmem:[%s3848_s10 + $0x58] sm:$0xff]  }
 0xef1   : > { %v2962_v56 = vpop.f32.mrf.mxu1 }
 0xef2   : > { %v3093_v56 = vld [vmem:[%s3848_s10 + $0x18] sm:$0xff]  }
 0xf4e   : > { %v1961_v58 = vpop.permute.xlu1 %1960 }
 0xf4f   : > { %v1971_v61 = vsel %vm539_vm3, %v1587_v36, %v1961_v58  ;;  %v2420_v58 = vsel %vm393_vm0, %v3093_v56, 0 }
 0xf56   : > { %v1965_v59 = vpop.permute.xlu1 %1964 }
 0xf57   : > { %v1972_v62 = vsel %vm1039_vm6, %v1971_v61, %v1965_v59 }
 0xf5e   : > { %v1969_v63 = vpop.permute.xlu0 %1968 }
 0xf5f   : > { %v1973_v1 = vsel %vm1041_vm7, %v1972_v62, %v1969_v63 }
 0xf60   : > { %v1983_v3 = vpack.c.bf16 %v1973_v1, %v1973_v1 }
 0xf62   : > { %2972 = vmatmul.mubr.msk.bf16.vlgmr.msra.gmra.mxu0 %vm393_vm0, %v1983_v3 }
 0xf63   : > { %2991 = vmatprep.mubr.msk.bf16.mxu0 %vm3159_vm1, %v3158_v4  ;;  %2976 = vmatpush3.bf16.msra.mxu0 %v3076_v24  ;;  %v2502_v24 = vadd.s32 128, %v3388_v25 }
 0xf64   : > { %2977 = vmatprep.subr.bf16.mxu0 %v3158_v4 }
 0xf67   : > { %2978 = vmatpush3.bf16.msra.mxu0 %v3077_v21 }
 0xf68   : > { %2979 = vmatprep.subr.bf16.mxu0 %v3158_v4 }
 0xf6b   : > { %2980 = vmatpush3.bf16.msra.mxu0 %v3078_v23 }
 0xf6c   : > { %2981 = vmatprep.subr.bf16.mxu0 %v3158_v4 }
 0xf6f   : > { %2982 = vmatpush3.bf16.msra.mxu0 %v3079_v0 }
 0xf70   : > { %2983 = vmatprep.subr.bf16.mxu0 %v3158_v4 }
 0xf73   : > { %2984 = vmatpush3.bf16.msra.mxu0 %v3080_v26 }
 0xf74   : > { %2985 = vmatprep.subr.bf16.mxu0 %v3158_v4 }
 0xf77   : > { %2986 = vmatpush3.bf16.msra.mxu0 %v3081_v29 }
 0xf78   : > { %2987 = vmatprep.subr.bf16.mxu0 %v3158_v4 }
 0xf7b   : > { %2988 = vmatpush3.bf16.msra.mxu0 %v3082_v30 }
 0xf7c   : > { %2989 = vmatprep.subr.bf16.mxu0 %v3158_v4  ;;  %v3084_v4 = vld [vmem:[%s3848_s10 + $0x78] sm:$0xff]  }
 0xf7f   : > { %2990 = vmatpush3.bf16.msra.mxu0 %v3083_v31 }
0x1022   : > { %v2045_v43 = vpop.f32.mrf.mxu0 }
0x1023   : > { %v3692_v5 = vadd.f32 %v2045_v43, %v3529_v2  ;;  %v3069_v2 = vld [vmem:[%s3845_s7 + $0x64] ss:$8 sps:$4 sm:$0xff]  }
0x1024   : > { %v2973_v6 = vpop.f32.mrf.mxu0  ;;  %2132 = vmatprep.subr.bf16.mxu1 %v3069_v2  ;;  %v2411_v2 = vsel %vm393_vm0, %v3099_v9, 0 }
0x1025   : > { %v2054_v27 = vmul.f32 %v3692_v5, %v3692_v5  ;;  %2133 = vmatpush1.bf16.msra.mxu1 %v3067_v10  ;;  %v3094_v6 = vld [vmem:[%s3848_s10 + $0x50] sm:$0xff]  }
0x1026   : > { %v2048_v7 = vpop.f32.mrf.mxu0  ;;  %2134 = vmatprep.subr.bf16.mxu1 %v3072_v11 }
0x1027   : > { %v2055_v48 = vsel %vm393_vm0, %v2054_v27, 0.0  ;;  %v3095_v27 = vld [vmem:[%s3848_s10 + $0x10] sm:$0xff]  }
0x1028   : > { %2056 = vadd.xlane.f32.xlu1 %v2055_v48  ;;  %v2974_v50 = vpop.f32.mrf.mxu0  ;;  %v2417_v7 = vsel %vm393_vm0, %v3095_v27, 0  ;;  %v3097_v48 = vld [vmem:[%s3848_s10 + $0x8] sm:$0xff]  }
0x1029   : > { %2135 = vmatpush1.bf16.msra.mxu1 %v3070_v57  ;;  %v2414_v50 = vsel %vm393_vm0, %v3097_v48, 0 }
0x102a   : > { %2136 = vmatprep.subr.bf16.mxu1 %v3075_v12 }
0x102d   : > { %2137 = vmatpush1.bf16.msra.mxu1 %v3073_v13  ;;  %v2703_v13 = vld [vmem:[%s3847_s9] ss:$0 sm:$0xff] }
0x102e   : > { %2995 = vmatprep.subr.msk.bf16.mxu1 %vm393_vm0, %v3084_v4 }
0x10b1   : > { %v2057_v60 = vpop.xlane.xlu1 %2056 }
0x10b2   : > { %v2058_v14 = vmul.f32 0.015625, %v2057_v60 }
0x10b4   : > { %v2059_v15 = vadd.f32 1e-06, %v2058_v14 }
0x10b6   : > { %3142 = vrsqrt.f32 %v2059_v15 }
0x10c3   : > { %v3143_v17 = vpop.eup %3142 }
0x10c4   : > { %v2061_v19 = vmul.f32 %v3143_v17, %v3692_v5 }
0x10c6   : > { %v2068_v20 = vmul.f32 %v2660_v18, %v2061_v19 }
0x10c8   : > { %v2078_v22 = vpack.c.bf16 %v2068_v20, %v2068_v20 }
0x10ca   : > { %2677 = vmatmul.mubr.msk.bf16.vlgmr.msra.gmra.mxu1 %vm393_vm0, %v2078_v22 }
0x10cb   : > { %2794 = vmatpush3.bf16.xpose.msra.mxu1 %v2432_v44 }
0x10cc   : > { %2996 = vmatprep.subr.msk.bf16.mxu1 %vm393_vm0, %v3086_v42 }
0x10d3   : > { %2796 = vmatpush3.bf16.xpose.msra.mxu1 %v2429_v46 }
0x10d4   : > { %2997 = vmatprep.subr.msk.bf16.mxu1 %vm393_vm0, %v3088_v47 }
0x10db   : > { %2798 = vmatpush3.bf16.xpose.msra.mxu1 %v2426_v51 }
0x10dc   : > { %2998 = vmatprep.subr.msk.bf16.mxu1 %vm393_vm0, %v3090_v52 }
0x10e3   : > { %2800 = vmatpush3.bf16.xpose.msra.mxu1 %v2423_v54 }
0x10e4   : > { %2999 = vmatprep.subr.msk.bf16.mxu1 %vm393_vm0, %v3092_v55 }
0x10eb   : > { %2802 = vmatpush3.bf16.xpose.msra.mxu1 %v2420_v58 }
0x10ec   : > { %3000 = vmatprep.subr.msk.bf16.mxu1 %vm393_vm0, %v3094_v6 }
0x10f3   : > { %2804 = vmatpush3.bf16.xpose.msra.mxu1 %v2417_v7 }
0x118a   : > { %v2156_v16 = vpop.f32.mrf.mxu1 }
0x118b   : > { %v2678_v32 = vmul.f32 -1.442695, %v2156_v16 }
0x118c   : > { %v2158_v33 = vpop.f32.mrf.mxu1 }
0x118d   : > { %3144 = vpow2.f32 %v2678_v32 }
0x118e   : > { %v2160_v34 = vpop.f32.mrf.mxu1 }
0x1190   : > { %v2161_v35 = vpop.f32.mrf.mxu1 }
0x119a   : > { %v3145_v36 = vpop.eup %3144 }
0x119b   : > { %v2166_v37 = vadd.f32 1.0, %v3145_v36 }
0x119d   : > { %3146 = vrcp.f32 %v2166_v37 }
0x11aa   : > { %v3147_v38 = vpop.eup %3146 }
0x11ab   : > { %v2169_v39 = vmul.f32 %v3147_v38, %v2156_v16 }
0x11ad   : > { %v2170_v40 = vmul.f32 %v2169_v39, %v2158_v33 }
0x11af   : > { %v2188_v28 = vpack.c.bf16 %v2170_v40, %v2170_v40 }
0x11b1   : > { %2992 = vmatmul.mubr.bf16.vlgmr.msra.gmra.mxu0 %v2188_v28 }
0x1271   : > { %v2271_v59 = vpop.f32.mrf.mxu0 }
0x1272   : > { %v2277_v61 = vadd.f32 %v2271_v59, %v3692_v5  ;;  %v3096_v5 = vld [vmem:[%s3848_s10 + $0x48] sm:$0xff]  }
0x1273   : > { %v2993_v62 = vpop.f32.mrf.mxu0  ;;  %3001 = vmatprep.subr.msk.bf16.mxu1 %vm393_vm0, %v3096_v5 }
0x1274   : > { %v2279_v63 = vmul.f32 %v2277_v61, %v2277_v61  ;;  %2806 = vmatpush3.bf16.xpose.msra.mxu1 %v2414_v50 }
0x1275   : > { %v2274_v1 = vpop.f32.mrf.mxu0  ;;  %3002 = vmatprep.subr.msk.bf16.mxu1 %vm393_vm0, %v3098_v8 }
0x1276   : > { %v2280_v3 = vsel %vm393_vm0, %v2279_v63, 0.0 }
0x1277   : > { %2281 = vadd.xlane.f32.xlu0 %v2280_v3  ;;  %v2994_v43 = vpop.f32.mrf.mxu0 }
0x127c   : > { %2808 = vmatpush3.bf16.xpose.msra.mxu1 %v2411_v2 }
0x1300   : > { %v2282_v10 = vpop.xlane.xlu0 %2281 }
0x1301   : > { %v2283_v11 = vmul.f32 0.015625, %v2282_v10 }
0x1303   : > { %v2284_v57 = vadd.f32 1e-06, %v2283_v11 }
0x1305   : > { %3148 = vrsqrt.f32 %v2284_v57 }
0x1312   : > { %v3149_v12 = vpop.eup %3148 }
0x1313   : > { %v2286_v60 = vmul.f32 %v3149_v12, %v2277_v61 }
0x1315   : > { %v2293_v14 = vmul.f32 %v2703_v13, %v2286_v60 }
0x1317   : > { %v2326_v15 = vpack.c.bf16 %v2293_v14, %v2293_v14 }
0x1319   : > { %2809 = vmatprep.mubr.msk.bf16.mxu1 %vm393_vm0, %v2326_v15 }
0x131a   : > { %2810 = vmatmul.mubr.msk.bf16.vlgmr.msra.gmra.mxu1 %vm393_vm0, %v2326_v15 }
0x13da   : > { %v2492_v17 = vpop.f32.mrf.mxu1 }
0x13dc   : > { %v2494_v18 = vpop.f32.mrf.mxu1 }
0x13dd   : > { %v2499_v19 = vmax.f32 %v2492_v17, %v2494_v18 }
0x13de   : > { %v2496_v20 = vpop.f32.mrf.mxu1 }
0x13df   : > { %2500 = vmax.xlane.f32.xlu0 %v2499_v19 }
0x13e0   : > { %v2497_v22 = vpop.f32.mrf.mxu1 }
0x1468   : > { %v2501_v21 = vpop.xlane.xlu0 %2500 }
0x1469   : > { %vm2503_vm8 = vcmp.ge.f32.partialorder %v2492_v17, %v2501_v21  ;;  %vm2504_vm9 = vcmp.ge.f32.partialorder %v2494_v18, %v2501_v21 }
0x146a   : > { %v2505_v23 = vsel %vm2503_vm8, %v3388_v25, 256  ;;  %v2506_v0 = vsel %vm2504_vm9, %v2502_v24, 256 }
0x146b   : > { %vm2507_vm10 = vcmp.lt.s32.totalorder %v2505_v23, %v2506_v0 }
0x146c   : > { %v2508_v26 = vsel %vm2507_vm10, %v2505_v23, %v2506_v0 }
0x146d   : > { %v2510_v29 = vshra.s32 %v2508_v26, 16  ;;  %v2509_v31 = vand.u32 65535, %v2508_v26 }
0x146f   : > { %v2512_v30 = vcvt.s32.f32 %v2510_v29  ;;  %v2511_v32 = vcvt.s32.f32 %v2509_v31 }
0x1471   : > { %2513 = vmin.xlane.f32.xlu1 %v2512_v30 }
0x14fa   : > { %v2514_v16 = vpop.xlane.xlu1 %2513 }
0x14fb   : > { %vm2515_vm11 = vcmp.eq.f32.partialorder %v2512_v30, %v2514_v16  ;;  %v2520_v34 = vcvt.f32.s32 %v2514_v16 }
0x14fc   : > { %v2516_v33 = vsel %vm2515_vm11, %v2511_v32, inf }
0x14fd   : > { %2517 = vmin.xlane.f32.xlu0 %v2516_v33  ;;  %v2521_v36 = vshll.u32 %v2520_v34, 16 }
0x1586   : > { %v2518_v35 = vpop.xlane.xlu0 %2517 }
0x1587   : > { %v2519_v37 = vcvt.f32.s32 %v2518_v35 }
0x1589   : > { %v2522_v25 = vadd.s32 %v2521_v36, %v2519_v37 }
0x158b   : > { %2524 = vst.msk [vmem:[%s381_s21] sm:$0xff] %vm2523_vm12, %v2522_v25 }
0x158c PF: > { %s21_s17 = sadd.s32 1, %s3156_s17  }
0x158d   : > { %p18_p4 = scmp.ge.s32.totalorder %s21_s17, 4  }
0x158f   :  { %20 = sbr.rel (!%p18_p4) target bundleno = 1 (0x1), region = 100 }

// kernel: stacked_forward.3
= control target key start
LH: loop header
LB: loop body
LE: loop exit
PB: predicated region body
PF: predicated region fallthrough
CT: control target
= control target key end

     0   :  { %s3994_s0 = inlined_call_operand.vmem [shape: f32[2,8,64], index: 0, kind: input, shape index: {}]   ;;  %s3995_s1 = inlined_call_operand.vmem [shape: f32[8,16], index: 1, kind: input, shape index: {}]   ;;  %s3996_s2 = inlined_call_operand.vmem [shape: f32[8,16], index: 2, kind: input, shape index: {}]   ;;  %s3997_s3 = inlined_call_operand.vmem [shape: f32[2,1,64], index: 3, kind: input, shape index: {}]   ;;  %s3998_s4 = inlined_call_operand.vmem [shape: bf16[2,64,128], index: 4, kind: input, shape index: {}]   ;;  %s3999_s5 = inlined_call_operand.vmem [shape: bf16[2,64,64], index: 5, kind: input, shape index: {}]   ;;  %s4000_s6 = inlined_call_operand.vmem [shape: f32[2,1,64], index: 6, kind: input, shape index: {}]   ;;  %s4001_s7 = inlined_call_operand.vmem [shape: bf16[2,64,256], index: 7, kind: input, shape index: {}]   ;;  %s4002_s8 = inlined_call_operand.vmem [shape: bf16[2,128,64], index: 8, kind: input, shape index: {}]   ;;  %s4003_s9 = inlined_call_operand.vmem [shape: f32[1,64], index: 9, kind: input, shape index: {}]   ;;  %s4004_s10 = inlined_call_operand.vmem [shape: bf16[256,64], index: 10, kind: input, shape index: {}]   ;;  %s4005_s11 = inlined_call_operand.hbm [shape: f32[2,8,256], index: 11, kind: output, shape index: {}]  }
   0x1   :  { %4026 = sst [smem:[#allocation5_spill]] %s3994_s0 }
   0x2   :  { %16 = vsyncpa [#allocation3], 0 }
   0x3   :  { %18 = vsyncpa [#allocation3 + $0x1], 0  ;;  %s3321_s17 = smov 0   ;;  %s3323_s18 = smov 0  }
   0x4   :  { %s3325_s19 = smov 0   ;;  %s3327_s20 = smov 0  }
   0x5 LB: > { %s3342_s21 = sadd.s32 4294967295, %s3241_s20   ;;  %s2575_s22 = sadd.s32 4294967294, %s3241_s20   ;;  %s3241_s20 = sphi %s3327_s20, %s4047_s20   ;;  %s3237_s19 = sphi %s3325_s19, %s4046_s19   ;;  %s3233_s18 = sphi %s3323_s18, %s4045_s18   ;;  %s3229_s17 = sphi %s3321_s17, %s4044_s17  }
   0x6   : > { %s3346_s23 = sadd.s32 1, %s3241_s20   ;;  %s267_s24 = sadd.s32 1, %s3237_s19 }
   0x7   : > { %s264_s25 = ssub.s32 %s3241_s20, %s3346_s23  ;;  %p277_p0 = scmp.ne.s32.totalorder %s3237_s19, %s3233_s18 }
   0x8   : > { %p265_p1 = scmp.eq.s32.totalorder %s264_s25, 0  ;;  %p278_p2 = scmp.eq.s32.totalorder %s3342_s21, 1 }
   0x9   : > { %p283_p3 = scmp.ne.s32.totalorder %s3233_s18, %s3229_s17  ;;  %p284_p4 = scmp.eq.s32.totalorder %s2575_s22, 1 }
   0xa   : > { %s3357_s26 = scalar_select %p265_p1, %s3237_s19, %s267_s24  }
   0xb   : > { %p3359_p5 = por %p278_p2, %p277_p0  ;;  %p3363_p6 = por %p284_p4, %p283_p3 }
   0xc   : > { %p2578_p7 = scmp.ge.s32.totalorder %s3241_s20, 1  ;;  %p339_p8 = scmp.lt.s32.totalorder %s3241_s20, 3 }
   0xe   : > { %p340_p9 = pnand %p2578_p7, %p339_p8 }
   0xf   : > { %p378_p10 = scmp.lt.s32.totalorder (!%p340_p9), %s3342_s21, 1  ;;  %s4029_s0 = sld [smem:[#allocation5_spill]] (!%p340_p9) }
  0x10   : > { %343 = sbr.rel (%p340_p9) target bundleno = 5110 (0x13f6), region = 64  ;;  %s3245_s15 = smov (!%p340_p9), 72  }
  0x11   : > { %s4020_s16 = smov (!%p340_p9), 56   ;;  %s4017_s22 = smov (!%p340_p9), 120  }
  0x12   : > { %s4015_s12 = smov (!%p340_p9), 80   ;;  %s4006_s13 = smov (!%p340_p9), 104  }
  0x13   : > { %s4024_s24 = smov (!%p340_p9), 32   ;;  %s4022_s25 = smov (!%p340_p9), 48  }
  0x15   : > { %s379_s29 = scalar_select %p378_p10, %s3342_s21, 1  ;;  %vm393_vm0 = vcmask 523264   ;;  %v3059_v3 = vld [vmem:[%s3998_s4 + $0x18] sm:$0xff]   ;;  %v3243_v4 = vmov 0.0   ;;  %v3060_v5 = vld [vmem:[%s3998_s4 + $0x10] sm:$0xff]   ;;  %vm3244_vm1 = vmmov 0  }
  0x16   : > { %2811 = vmatprep.subr.bf16.mxu0 %v3243_v4  ;;  %2819 = vmatprep.mubr.msk.bf16.mxu0 %vm3244_vm1, %v3243_v4  ;;  %v3061_v6 = vld [vmem:[%s3998_s4 + $0x8] sm:$0xff]   ;;  %v3062_v7 = vld [vmem:[%s3998_s4] sm:$0xff]   ;;  %vm494_vm2 = vcmask 64512   ;;  %vm539_vm3 = vcmask 130048   ;;  %vm607_vm5 = vcmask 1043456   ;;  %vm1039_vm6 = vcmask 261120  }
  0x17   : > { %s2580_s30 = sshll.u32 %s379_s29, 3  ;;  %2812 = vmatpush3.bf16.msra.mxu0 %v3059_v3  ;;  %2823 = vmatprep.subr.bf16.mxu1 %v3243_v4  ;;  %v2581_v12 = vld [vmem:[%s3997_s3] ss:$0 sm:$0xff]  ;;  %s4010_s29 = smov 64   ;;  %vm1041_vm7 = vcmask 392192  }
  0x18   : > { %s381_s14 = scalar_lea.vmem %s4029_s0, %s2580_s30  ;;  %2813 = vmatprep.subr.bf16.mxu0 %v3243_v4  ;;  %2825 = vmatprep.mubr.msk.bf16.mxu1 %vm3244_vm1, %v3243_v4  ;;  %v3422_v21 = vld [vmem:[%s3995_s1] sm:$0xff]  ;;  %s4019_s30 = smov 40  }
  0x19   : > { %v3374_v0 = vld [vmem:[%s381_s14] sm:$0xff]  ;;  %s4008_s14 = smov 88  }
  0x1a   : > { %v392_v1 = vmul.f32 %v3374_v0, %v3374_v0  ;;  %v3438_v23 = vld [vmem:[%s3996_s2] sm:$0xff] }
  0x1b   : > { %2814 = vmatpush3.bf16.msra.mxu0 %v3060_v5 }
  0x1c   : > { %v394_v2 = vsel %vm393_vm0, %v392_v1, 0.0  ;;  %2815 = vmatprep.subr.bf16.mxu0 %v3243_v4 }
  0x1d   : > { %395 = vadd.xlane.f32.xlu0 %v394_v2 }
  0x1f   : > { %2816 = vmatpush3.bf16.msra.mxu0 %v3061_v6 }
  0x20   : > { %2817 = vmatprep.subr.bf16.mxu0 %v3243_v4 }
  0x23   : > { %2818 = vmatpush3.bf16.msra.mxu0 %v3062_v7 }
  0x24   : > { %2835 = vmatprep.subr.bf16.mxu0 %v3243_v4 }
  0xa6   : > { %v396_v8 = vpop.xlane.xlu0 %395 }
  0xa7   : > { %v398_v9 = vmul.f32 0.015625, %v396_v8 }
  0xa9   : > { %v399_v10 = vadd.f32 1e-06, %v398_v9 }
  0xab   : > { %3131 = vrsqrt.f32 %v399_v10 }
  0xb8   : > { %v3132_v11 = vpop.eup %3131 }
  0xb9   : > { %v401_v13 = vmul.f32 %v3132_v11, %v3374_v0 }
  0xbb   : > { %v408_v14 = vmul.f32 %v2581_v12, %v401_v13 }
  0xbd   : > { %v417_v15 = vpack.c.bf16 %v408_v14, %v408_v14 }
  0xbf   : > { %2820 = vmatmul.mubr.msk.bf16.vlgmr.msra.gmra.mxu0 %vm393_vm0, %v417_v15 }
  0xc0   : > { %2837 = vmatprep.mubr.msk.bf16.mxu0 %vm3244_vm1, %v3243_v4 }
 0x17f   : > { %v3408_v16 = vpop.f32.mrf.mxu0 }
 0x180   : > { %491 = vrot.lane.b32.xlu1 %v3408_v16, %s3245_s15  ;;  %v485_v17 = vsub.f32 0.0, %v3408_v16  ;;  %v531_v11 = vmul.f32 %v3408_v16, %v3422_v21 }
 0x181   : > { %v2821_v18 = vpop.f32.mrf.mxu0 }
 0x182   : > { %487 = vrot.lane.b32.xlu0 %v485_v17, %s4020_s16 }
 0x183   : > { %v482_v19 = vpop.f32.mrf.mxu0 }
 0x184   : > { %510 = vrot.lane.b32.xlu1 %v3408_v16, %s4020_s16  ;;  %s4036_s16 = smov 88  }
 0x185   : > { %v2822_v20 = vpop.f32.mrf.mxu0 }
 0x186   : > { %905 = vrot.lane.b32.xlu0 %v485_v17, %s3245_s15 }
 0x188   : > { %654 = vrot.lane.b32.xlu1 %v3408_v16, %s4017_s22 }
 0x18a   : > { %497 = vrot.lane.b32.xlu0 %v3422_v21, %s4010_s29 }
 0x18c   : > { %507 = vrot.lane.b32.xlu1 %v485_v17, %s4019_s30  ;;  %s4038_s30 = smov 80  }
 0x18e   : > { %514 = vrot.lane.b32.xlu0 %v3422_v21, %s4015_s12 }
 0x190   : > { %651 = vrot.lane.b32.xlu1 %v485_v17, %s4006_s13 }
 0x194   : > { %772 = vrot.lane.b32.xlu1 %v485_v17, %s4008_s14 }
 0x198   : > { %775 = vrot.lane.b32.xlu1 %v3408_v16, %s4006_s13  ;;  %s3253_s13 = smov 16  }
 0x19c   : > { %908 = vrot.lane.b32.xlu1 %v3408_v16, %s4008_s14  ;;  %s4012_s14 = smov 8  }
 0x1f2   : > { %v492_v22 = vpop.permute.xlu1 %491 }
 0x1f4   : > { %v488_v24 = vpop.permute.xlu0 %487 }
 0x1f5   : > { %v495_v25 = vsel %vm494_vm2, %v488_v24, %v492_v22  ;;  %v386_v22 = vlaneseq }
 0x1f6   : > { %v501_v26 = vmul.f32 %v495_v25, %v3438_v23  ;;  %v511_v27 = vpop.permute.xlu1 %510 }
 0x1f7   : > { %v387_v24 = vshrl.u32 %v386_v22, 7  ;;  %v389_v25 = vand.u32 127, %v386_v22 }
 0x1f8   : > { %503 = vrot.lane.b32.xlu1 %v501_v26, %s4010_s29  ;;  %v906_v39 = vpop.permute.xlu0 %905 }
 0x1f9   : > { %vm3511_vm4 = vcmp.ge.s32.totalorder %v387_v24, %v389_v25 }
 0x1fa   : > { %v655_v28 = vpop.permute.xlu1 %654 }
 0x1fc   : > { %658 = vrot.lane.b32.xlu1 %v3422_v21, %s3253_s13  ;;  %v3462_v43 = vpop.permute.xlu0 %497 }
 0x1fd   : > { %v500_v44 = vmul.f32 %v3462_v43, %v3408_v16 }
 0x1fe   : > { %v508_v29 = vpop.permute.xlu1 %507 }
 0x1ff   : > { %v513_v30 = vsel %vm494_vm2, %v508_v29, %v511_v27 }
 0x200   : > { %v518_v31 = vmul.f32 %v513_v30, %v3438_v23  ;;  %v3467_v48 = vpop.permute.xlu0 %514 }
 0x201   : > { %v517_v49 = vmul.f32 %v3467_v48, %v3408_v16 }
 0x202   : > { %v652_v32 = vpop.permute.xlu1 %651  ;;  %520 = vrot.lane.b32.xlu0 %v518_v31, %s4015_s12 }
 0x203   : > { %v657_v33 = vsel %vm494_vm2, %v652_v32, %v655_v28 }
 0x204   : > { %v662_v34 = vmul.f32 %v657_v33, %v3438_v23 }
 0x206   : > { %v773_v35 = vpop.permute.xlu1 %772  ;;  %779 = vrot.lane.b32.xlu0 %v3422_v21, %s4024_s24  ;;  %664 = vrot.lane.b32.xlu1 %v662_v34, %s3253_s13 }
 0x20a   : > { %v776_v36 = vpop.permute.xlu1 %775  ;;  %912 = vrot.lane.b32.xlu0 %v3422_v21, %s4022_s25 }
 0x20b   : > { %v778_v37 = vsel %vm494_vm2, %v773_v35, %v776_v36 }
 0x20c   : > { %v783_v38 = vmul.f32 %v778_v37, %v3438_v23 }
 0x20e   : > { %v909_v40 = vpop.permute.xlu1 %908  ;;  %785 = vrot.lane.b32.xlu1 %v783_v38, %s4024_s24 }
 0x20f   : > { %v911_v41 = vsel %vm494_vm2, %v906_v39, %v909_v40 }
 0x210   : > { %v916_v42 = vmul.f32 %v911_v41, %v3438_v23 }
 0x212   : > { %918 = vrot.lane.b32.xlu1 %v916_v42, %s4022_s25 }
 0x216   : > { %524 = vrot.lane.b32.xlu1 %v485_v17, %s4017_s22  ;;  %s4037_s22 = smov 64  }
 0x26a   : > { %v504_v45 = vpop.permute.xlu1 %503 }
 0x26b   : > { %v506_v46 = vadd.f32 %v504_v45, %v500_v44 }
 0x26d   : > { %v535_v47 = vpack.c.bf16 %v506_v46, %v506_v46 }
 0x26e   : > { %v3473_v50 = vpop.permute.xlu1 %658 }
 0x26f   : > { %537 = vrot.lane.b32.xlu0 %v535_v47, %s4010_s29  ;;  %v661_v53 = vmul.f32 %v3473_v50, %v3408_v16  ;;  %s4014_s29 = smov 112  }
 0x273   : > { %527 = vrot.lane.b32.xlu0 %v3408_v16, %s4012_s14  ;;  %s4013_s14 = smov 96  }
 0x274   : > { %v521_v51 = vpop.permute.xlu0 %520 }
 0x275   : > { %v523_v52 = vadd.f32 %v521_v51, %v517_v49 }
 0x277   : > { %v790_v54 = vpack.c.bf16 %v523_v52, %v523_v52 }
 0x278   : > { %v665_v55 = vpop.permute.xlu1 %664  ;;  %v3478_v57 = vpop.permute.xlu0 %779 }
 0x279   : > { %v667_v56 = vadd.f32 %v665_v55, %v661_v53  ;;  %795 = vrot.lane.b32.xlu0 %v790_v54, %s4022_s25  ;;  %v782_v59 = vmul.f32 %v3478_v57, %v3408_v16 }
 0x27b   : > { %v668_v58 = vpack.c.bf16 %v667_v56, %v667_v56 }
 0x27c   : > { %v3483_v60 = vpop.permute.xlu0 %912 }
 0x27d   : > { %670 = vrot.lane.b32.xlu1 %v668_v58, %s4014_s29  ;;  %v915_v63 = vmul.f32 %v3483_v60, %v3408_v16  ;;  %s4032_s29 = smov 56  }
 0x280   : > { %v786_v61 = vpop.permute.xlu1 %785 }
 0x281   : > { %v788_v62 = vadd.f32 %v786_v61, %v782_v59 }
 0x283   : > { %v789_v1 = vpack.c.bf16 %v788_v62, %v788_v62 }
 0x284   : > { %v919_v2 = vpop.permute.xlu1 %918 }
 0x285   : > { %v921_v3 = vadd.f32 %v919_v2, %v915_v63  ;;  %792 = vrot.lane.b32.xlu1 %v789_v1, %s4013_s14  ;;  %s4033_s14 = smov 40  }
 0x287   : > { %v922_v5 = vpack.c.bf16 %v921_v3, %v921_v3 }
 0x288   : > { %v525_v8 = vpop.permute.xlu1 %524 }
 0x289   : > { %924 = vrot.lane.b32.xlu0 %v922_v5, %s4015_s12  ;;  %s4040_s12 = smov 48  }
 0x2e1   : > { %v538_v6 = vpop.permute.xlu0 %537 }
 0x2e2   : > { %v544_v7 = vsel %vm539_vm3, %v538_v6, 0 }
 0x2e3   : > { %2824 = vmatpush3.bf16.xpose.msra.mxu1 %v544_v7  ;;  %2836 = vmatpush3.bf16.xpose.msra.mxu0 %v544_v7 }
 0x2e4   : > { %2847 = vmatprep.subr.bf16.mxu0 %v3243_v4  ;;  %2829 = vmatprep.subr.bf16.mxu1 %v3243_v4 }
 0x2e5   : > { %v528_v9 = vpop.permute.xlu0 %527 }
 0x2e6   : > { %v530_v10 = vsel %vm494_vm2, %v525_v8, %v528_v9 }
 0x2e7   : > { %v532_v12 = vmul.f32 %v530_v10, %v3438_v23 }
 0x2e9   : > { %v533_v13 = vadd.f32 %v532_v12, %v531_v11 }
 0x2eb   : > { %v534_v14 = vpack.c.bf16 %v533_v13, %v533_v13  ;;  %v796_v15 = vpop.permute.xlu0 %795 }
 0x2ec   : > { %v801_v18 = vsel %vm539_vm3, %v796_v15, 0 }
 0x2ed   : > { %2826 = vmatmul.mubr.msk.bf16.vlgmr.msra.gmra.mxu1 %vm539_vm3, %v534_v14 }
 0x2ee   : > { %2831 = vmatprep.mubr.msk.bf16.mxu1 %vm3244_vm1, %v3243_v4 }
 0x2ef   : > { %v671_v17 = vpop.permute.xlu1 %670 }
 0x2f0   : > { %2838 = vmatmul.mubr.msk.bf16.vlgmr.msra.gmra.mxu0 %vm539_vm3, %v671_v17 }
 0x2f1   : > { %2848 = vmatpush3.bf16.xpose.msra.mxu0 %v801_v18  ;;  %2849 = vmatprep.mubr.msk.bf16.mxu0 %vm3244_vm1, %v3243_v4 }
 0x2f2   : > { %2859 = vmatprep.subr.bf16.mxu0 %v3243_v4 }
 0x2f7   : > { %v793_v19 = vpop.permute.xlu1 %792 }
 0x2f8   : > { %2850 = vmatmul.mubr.msk.bf16.vlgmr.msra.gmra.mxu0 %vm539_vm3, %v793_v19  ;;  %v600_v19 = vpack.c.bf16 %v3408_v16, %v3408_v16 }
 0x2f9   : > { %2860 = vmatpush3.bf16.xpose.msra.mxu0 %v801_v18  ;;  %2861 = vmatprep.mubr.msk.bf16.mxu0 %vm3244_vm1, %v3243_v4 }
 0x2fa   : > { %2871 = vmatprep.subr.bf16.mxu0 %v3243_v4 }
 0x2fb   : > { %v925_v20 = vpop.permute.xlu0 %924 }
 0x300   : > { %2862 = vmatmul.mubr.msk.bf16.vlgmr.msra.gmra.mxu0 %vm539_vm3, %v925_v20 }
 0x301   : > { %2879 = vmatprep.mubr.msk.bf16.mxu0 %vm3244_vm1, %v3243_v4 }
 0x3ad   : > { %v580_v26 = vpop.f32.mrf.mxu1 }
 0x3ae   : > { %v586_v28 = vmul.f32 0.25, %v580_v26 }
 0x3af   : > { %v2827_v29 = vpop.f32.mrf.mxu1 }
 0x3b0   : > { %v709_v30 = vpop.f32.mrf.mxu0  ;;  %v587_v31 = vsel %vm3511_vm4, %v586_v28, -1e+30 }
 0x3b1   : > { %v715_v32 = vmul.f32 0.25, %v709_v30  ;;  %v583_v33 = vpop.f32.mrf.mxu1  ;;  %v588_v34 = vsel %vm494_vm2, %v587_v31, -inf }
 0x3b2   : > { %589 = vmax.xlane.f32.xlu1 %v588_v34  ;;  %v2839_v35 = vpop.f32.mrf.mxu0 }
 0x3b3   : > { %v2828_v36 = vpop.f32.mrf.mxu1  ;;  %v716_v37 = vsel %vm3511_vm4, %v715_v32, -1e+30 }
 0x3b4   : > { %v712_v38 = vpop.f32.mrf.mxu0  ;;  %v717_v39 = vsel %vm494_vm2, %v716_v37, -inf }
 0x3b5   : > { %718 = vmax.xlane.f32.xlu0 %v717_v39 }
 0x3b6   : > { %v2840_v40 = vpop.f32.mrf.mxu0 }
 0x3b8   : > { %v837_v41 = vpop.f32.mrf.mxu0 }
 0x3b9   : > { %v843_v42 = vmul.f32 0.25, %v837_v41 }
 0x3ba   : > { %v2851_v44 = vpop.f32.mrf.mxu0 }
 0x3bb   : > { %v844_v45 = vsel %vm3511_vm4, %v843_v42, -1e+30  ;;  %v3063_v42 = vld [vmem:[%s3999_s5 + $0x18] sm:$0xff]  }
 0x3bc   : > { %v840_v46 = vpop.f32.mrf.mxu0  ;;  %v845_v47 = vsel %vm494_vm2, %v844_v45, -inf  ;;  %2872 = vmatpush3.bf16.msra.mxu0 %v3063_v42  ;;  %v3083_v42 = vld [vmem:[%s4002_s8 + $0x18] sm:$0xff]  }
 0x3bd   : > { %846 = vmax.xlane.f32.xlu0 %v845_v47  ;;  %2873 = vmatprep.subr.bf16.mxu0 %v3243_v4  ;;  %v3064_v46 = vld [vmem:[%s3999_s5 + $0x10] sm:$0xff]  }
 0x3be   : > { %v2852_v49 = vpop.f32.mrf.mxu0 }
 0x3bf   : > { %v3065_v49 = vld [vmem:[%s3999_s5 + $0x8] sm:$0xff]  }
 0x3c0   : > { %v963_v51 = vpop.f32.mrf.mxu0  ;;  %2874 = vmatpush3.bf16.msra.mxu0 %v3064_v46  ;;  %v3086_v46 = vld [vmem:[%s4002_s8] sm:$0xff]  }
 0x3c1   : > { %v969_v52 = vmul.f32 0.25, %v963_v51  ;;  %2875 = vmatprep.subr.bf16.mxu0 %v3243_v4 }
 0x3c2   : > { %v2863_v53 = vpop.f32.mrf.mxu0 }
 0x3c3   : > { %v970_v54 = vsel %vm3511_vm4, %v969_v52, -1e+30 }
 0x3c4   : > { %v966_v55 = vpop.f32.mrf.mxu0  ;;  %v971_v56 = vsel %vm494_vm2, %v970_v54, -inf  ;;  %2876 = vmatpush3.bf16.msra.mxu0 %v3065_v49 }
 0x3c5   : > { %972 = vmax.xlane.f32.xlu1 %v971_v56  ;;  %2877 = vmatprep.subr.bf16.mxu0 %v3243_v4 }
 0x3c6   : > { %v2864_v58 = vpop.f32.mrf.mxu0 }
 0x43b   : > { %v590_v59 = vpop.xlane.xlu1 %589 }
 0x43c   : > { %v591_v61 = vsub.f32 %v587_v31, %v590_v59 }
 0x43e   : > { %v592_v62 = vmul.f32 1.442695, %v591_v61  ;;  %v719_v63 = vpop.xlane.xlu0 %718 }
 0x43f   : > { %v720_v1 = vsub.f32 %v716_v37, %v719_v63 }
 0x440   : > { %3133 = vpow2.f32 %v592_v62 }
 0x441   : > { %v721_v2 = vmul.f32 1.442695, %v720_v1 }
 0x443   : > { %3135 = vpow2.f32 %v721_v2 }
 0x446   : > { %v847_v3 = vpop.xlane.xlu0 %846 }
 0x447   : > { %v848_v5 = vsub.f32 %v844_v45, %v847_v3 }
 0x449   : > { %v849_v6 = vmul.f32 1.442695, %v848_v5 }
 0x44b   : > { %3137 = vpow2.f32 %v849_v6 }
 0x44d   : > { %v3134_v7 = vpop.eup %3133 }
 0x44e   : > { %v973_v8 = vpop.xlane.xlu1 %972  ;;  %v594_v9 = vsel %vm494_vm2, %v3134_v7, 0.0 }
 0x44f   : > { %v974_v10 = vsub.f32 %v970_v54, %v973_v8  ;;  %595 = vadd.xlane.f32.xlu0 %v594_v9  ;;  %v3066_v54 = vld [vmem:[%s3999_s5] sm:$0xff]  }
 0x450   : > { %v3136_v11 = vpop.eup %3135  ;;  %2878 = vmatpush3.bf16.msra.mxu0 %v3066_v54 }
 0x451   : > { %v975_v12 = vmul.f32 1.442695, %v974_v10  ;;  %v723_v13 = vsel %vm494_vm2, %v3136_v11, 0.0 }
 0x452   : > { %724 = vadd.xlane.f32.xlu1 %v723_v13 }
 0x453   : > { %3139 = vpow2.f32 %v975_v12 }
 0x458   : > { %v3138_v14 = vpop.eup %3137 }
 0x459   : > { %v851_v15 = vsel %vm494_vm2, %v3138_v14, 0.0 }
 0x45a   : > { %852 = vadd.xlane.f32.xlu0 %v851_v15 }
 0x460   : > { %v3140_v17 = vpop.eup %3139 }
 0x461   : > { %v977_v18 = vsel %vm494_vm2, %v3140_v17, 0.0 }
 0x462   : > { %978 = vadd.xlane.f32.xlu1 %v977_v18 }
 0x470   : > { %602 = vrot.lane.b32.xlu0 %v600_v19, %s4024_s24 }
 0x473   : > { %857 = vrot.lane.b32.xlu1 %v600_v19, %s3253_s13 }
 0x4d8   : > { %v596_v20 = vpop.xlane.xlu0 %595 }
 0x4d9   : > { %3141 = vrcp.f32 %v596_v20  ;;  %v3067_v20 = vld [vmem:[%s4001_s7 + $0x30] ss:$8 sps:$4 sm:$0xff]  }
 0x4db   : > { %v725_v22 = vpop.xlane.xlu1 %724 }
 0x4dc   : > { %3143 = vrcp.f32 %v725_v22  ;;  %v3069_v22 = vld [vmem:[%s4001_s7 + $0x34] ss:$8 sps:$4 sm:$0xff]  }
 0x4dd   : > { %1196 = vmatprep.subr.bf16.mxu0 %v3069_v22 }
 0x4e3   : > { %v853_v24 = vpop.xlane.xlu0 %852 }
 0x4e4   : > { %3145 = vrcp.f32 %v853_v24  ;;  %v3070_v24 = vld [vmem:[%s4001_s7 + $0x20] ss:$8 sps:$4 sm:$0xff]  }
 0x4e6   : > { %v3142_v25 = vpop.eup %3141 }
 0x4e7   : > { %v603_v26 = vpop.permute.xlu0 %602  ;;  %v598_v28 = vmul.f32 %v3142_v25, %v3134_v7  ;;  %v3259_v25 = vmov 0  }
 0x4e8   : > { %v609_v29 = vsel %vm607_vm5, %v603_v26, 0  ;;  %v3075_v26 = vld [vmem:[%s4001_s7 + $0x14] ss:$8 sps:$4 sm:$0xff]  }
 0x4e9   : > { %2830 = vmatpush3.bf16.msra.mxu1 %v609_v29  ;;  %v599_v30 = vpack.c.bf16 %v598_v28, %v598_v28  ;;  %v3144_v16 = vpop.eup %3143  ;;  %v3073_v28 = vld [vmem:[%s4001_s7 + $0x10] ss:$8 sps:$4 sm:$0xff]  }
 0x4ea   : > { %2841 = vmatprep.subr.bf16.mxu1 %v3243_v4  ;;  %v727_v32 = vmul.f32 %v3144_v16, %v3136_v11 }
 0x4eb   : > { %v979_v31 = vpop.xlane.xlu1 %978 }
 0x4ec   : > { %2832 = vmatmul.mubr.msk.bf16.vlgmr.msra.gmra.mxu1 %vm494_vm2, %v599_v30  ;;  %3147 = vrcp.f32 %v979_v31  ;;  %v728_v34 = vpack.c.bf16 %v727_v32, %v727_v32  ;;  %v3076_v30 = vld [vmem:[%s4001_s7] ss:$8 sps:$4 sm:$0xff]  }
 0x4ed   : > { %2842 = vmatpush3.bf16.msra.mxu1 %v609_v29  ;;  %2843 = vmatprep.mubr.msk.bf16.mxu1 %vm3244_vm1, %v3243_v4  ;;  %v3078_v29 = vld [vmem:[%s4001_s7 + $0x4] ss:$8 sps:$4 sm:$0xff]  }
 0x4ee   : > { %2853 = vmatprep.subr.bf16.mxu1 %v3243_v4 }
 0x4ef   : > { %v858_v33 = vpop.permute.xlu1 %857 }
 0x4f0   : > { %v863_v36 = vsel %vm607_vm5, %v858_v33, 0 }
 0x4f1   : > { %v3146_v35 = vpop.eup %3145 }
 0x4f2   : > { %v855_v37 = vmul.f32 %v3146_v35, %v3138_v14 }
 0x4f4   : > { %2844 = vmatmul.mubr.msk.bf16.vlgmr.msra.gmra.mxu1 %vm494_vm2, %v728_v34  ;;  %v856_v38 = vpack.c.bf16 %v855_v37, %v855_v37  ;;  %v2600_v34 = vld [vmem:[%s4000_s6] ss:$0 sm:$0xff] }
 0x4f5   : > { %2854 = vmatpush3.bf16.msra.mxu1 %v863_v36  ;;  %2855 = vmatprep.mubr.msk.bf16.mxu1 %vm3244_vm1, %v3243_v4 }
 0x4f6   : > { %2865 = vmatprep.subr.bf16.mxu1 %v3243_v4 }
 0x4f9   : > { %v3148_v39 = vpop.eup %3147 }
 0x4fa   : > { %v981_v40 = vmul.f32 %v3148_v39, %v3140_v17  ;;  %v3080_v39 = vld [vmem:[%s4002_s8 + $0x30] sm:$0xff]  }
 0x4fc   : > { %2856 = vmatmul.mubr.msk.bf16.vlgmr.msra.gmra.mxu1 %vm494_vm2, %v856_v38  ;;  %v982_v41 = vpack.c.bf16 %v981_v40, %v981_v40  ;;  %v3079_v38 = vld [vmem:[%s4002_s8 + $0x38] sm:$0xff]   ;;  %v3081_v40 = vld [vmem:[%s4002_s8 + $0x28] sm:$0xff]  }
 0x4fd   : > { %2866 = vmatpush3.bf16.msra.mxu1 %v863_v36  ;;  %2867 = vmatprep.mubr.msk.bf16.mxu1 %vm3244_vm1, %v3243_v4 }
 0x4fe   : > { %2903 = vmatprep.subr.bf16.mxu1 %v3243_v4 }
 0x504   : > { %2868 = vmatmul.mubr.msk.bf16.vlgmr.msra.gmra.mxu1 %vm494_vm2, %v982_v41  ;;  %v3082_v41 = vld [vmem:[%s4002_s8 + $0x20] sm:$0xff]  }
 0x505   : > { %2911 = vmatprep.mubr.msk.bf16.mxu1 %vm3244_vm1, %v3243_v4 }
 0x5ac   : > { %v645_v44 = vpop.f32.mrf.mxu1 }
 0x5ae   : > { %v2833_v45 = vpop.f32.mrf.mxu1 }
 0x5af   : > { %v3085_v45 = vld [vmem:[%s4002_s8 + $0x8] sm:$0xff]  }
 0x5b0   : > { %v648_v47 = vpop.f32.mrf.mxu1 }
 0x5b2   : > { %v2834_v51 = vpop.f32.mrf.mxu1 }
 0x5b4   : > { %v766_v52 = vpop.f32.mrf.mxu1 }
 0x5b5   : > { %1027 = vrot.lane.b32.xlu1 %v766_v52, %s3253_s13 }
 0x5b6   : > { %v2845_v53 = vpop.f32.mrf.mxu1 }
 0x5b8   : > { %v769_v55 = vpop.f32.mrf.mxu1 }
 0x5ba   : > { %v2846_v56 = vpop.f32.mrf.mxu1 }
 0x5bc   : > { %v899_v58 = vpop.f32.mrf.mxu1 }
 0x5bd   : > { %1031 = vrot.lane.b32.xlu0 %v899_v58, %s4024_s24  ;;  %s4034_s24 = smov 120  }
 0x5be   : > { %v2857_v59 = vpop.f32.mrf.mxu1 }
 0x5c0   : > { %v902_v61 = vpop.f32.mrf.mxu1 }
 0x5c2   : > { %v2858_v62 = vpop.f32.mrf.mxu1 }
 0x5c4   : > { %v1020_v63 = vpop.f32.mrf.mxu1 }
 0x5c5   : > { %1035 = vrot.lane.b32.xlu1 %v1020_v63, %s4022_s25  ;;  %s4035_s25 = smov 104  }
 0x5c6   : > { %v2869_v1 = vpop.f32.mrf.mxu1 }
 0x5c8   : > { %v1023_v2 = vpop.f32.mrf.mxu1 }
 0x5ca   : > { %v2870_v3 = vpop.f32.mrf.mxu1 }
 0x627   : > { %v1028_v5 = vpop.permute.xlu1 %1027 }
 0x628   : > { %v1038_v7 = vsel %vm539_vm3, %v645_v44, %v1028_v5  ;;  %v3084_v44 = vld [vmem:[%s4002_s8 + $0x10] sm:$0xff]  }
 0x62f   : > { %v1032_v6 = vpop.permute.xlu0 %1031 }
 0x630   : > { %v1040_v8 = vsel %vm1039_vm6, %v1038_v7, %v1032_v6  ;;  %v3087_v7 = vld [vmem:[%s3998_s4 + $0x38] sm:$0xff]  }
 0x631   : > { %2904 = vmatpush3.bf16.msra.mxu1 %v3087_v7 }
 0x632   : > { %2905 = vmatprep.subr.bf16.mxu1 %v3243_v4 }
 0x637   : > { %v1036_v9 = vpop.permute.xlu1 %1035 }
 0x638   : > { %v1042_v10 = vsel %vm1041_vm7, %v1040_v8, %v1036_v9  ;;  %v3088_v8 = vld [vmem:[%s3998_s4 + $0x30] sm:$0xff]   ;;  %v3089_v9 = vld [vmem:[%s3998_s4 + $0x28] sm:$0xff]  }
 0x639   : > { %v1051_v11 = vpack.c.bf16 %v1042_v10, %v1042_v10  ;;  %2906 = vmatpush3.bf16.msra.mxu1 %v3088_v8  ;;  %v3090_v10 = vld [vmem:[%s3998_s4 + $0x20] sm:$0xff]  }
 0x63a   : > { %2907 = vmatprep.subr.bf16.mxu1 %v3243_v4 }
 0x63b   : > { %2880 = vmatmul.mubr.msk.bf16.vlgmr.msra.gmra.mxu0 %vm393_vm0, %v1051_v11 }
 0x63c   : > { %1197 = vmatpush1.bf16.msra.mxu0 %v3067_v20  ;;  %1220 = vmatprep.mubr.bf16.mxu0 %v3259_v25 }
 0x63d   : > { %2908 = vmatpush3.bf16.msra.mxu1 %v3089_v9 }
 0x63e   : > { %2909 = vmatprep.subr.bf16.mxu1 %v3243_v4 }
 0x641   : > { %2910 = vmatpush3.bf16.msra.mxu1 %v3090_v10 }
 0x642   : > { %2915 = vmatprep.subr.bf16.mxu1 %v3243_v4 }
 0x6fb   : > { %v1113_v12 = vpop.f32.mrf.mxu0 }
 0x6fc   : > { %v3576_v13 = vadd.f32 %v1113_v12, %v3374_v0  ;;  %v3072_v0 = vld [vmem:[%s4001_s7 + $0x24] ss:$8 sps:$4 sm:$0xff]  }
 0x6fd   : > { %v2881_v14 = vpop.f32.mrf.mxu0  ;;  %1198 = vmatprep.subr.bf16.mxu0 %v3072_v0 }
 0x6fe   : > { %v1121_v15 = vmul.f32 %v3576_v13, %v3576_v13  ;;  %1199 = vmatpush1.bf16.msra.mxu0 %v3070_v24 }
 0x6ff   : > { %v1116_v17 = vpop.f32.mrf.mxu0  ;;  %1200 = vmatprep.subr.bf16.mxu0 %v3075_v26 }
 0x700   : > { %v1122_v18 = vsel %vm393_vm0, %v1121_v15, 0.0  ;;  %v2620_v15 = vld [vmem:[%s3997_s3 + $0x1] ss:$0 sm:$0xff] }
 0x701   : > { %1123 = vadd.xlane.f32.xlu0 %v1122_v18  ;;  %v2882_v19 = vpop.f32.mrf.mxu0 }
 0x702   : > { %1201 = vmatpush1.bf16.msra.mxu0 %v3073_v28 }
 0x703   : > { %1202 = vmatprep.subr.bf16.mxu0 %v3078_v29 }
 0x706   : > { %1203 = vmatpush1.bf16.msra.mxu0 %v3076_v30 }
 0x707   : > { %2883 = vmatprep.subr.bf16.mxu0 %v3243_v4 }
 0x78a   : > { %v1124_v16 = vpop.xlane.xlu0 %1123 }
 0x78b   : > { %v1125_v31 = vmul.f32 0.015625, %v1124_v16 }
 0x78d   : > { %v1126_v32 = vadd.f32 1e-06, %v1125_v31 }
 0x78f   : > { %3149 = vrsqrt.f32 %v1126_v32 }
 0x79c   : > { %v3150_v33 = vpop.eup %3149 }
 0x79d   : > { %v1128_v35 = vmul.f32 %v3150_v33, %v3576_v13 }
 0x79f   : > { %v1135_v36 = vmul.f32 %v2600_v34, %v1128_v35 }
 0x7a1   : > { %v1144_v37 = vpack.c.bf16 %v1135_v36, %v1135_v36 }
 0x7a3   : > { %2609 = vmatmul.mubr.msk.bf16.vlgmr.msra.gmra.mxu0 %vm393_vm0, %v1144_v37 }
 0x7a4   : > { %2899 = vmatprep.mubr.msk.bf16.mxu0 %vm3244_vm1, %v3243_v4  ;;  %2884 = vmatpush3.bf16.msra.mxu0 %v3079_v38 }
 0x7a5   : > { %2885 = vmatprep.subr.bf16.mxu0 %v3243_v4 }
 0x7a8   : > { %2886 = vmatpush3.bf16.msra.mxu0 %v3080_v39 }
 0x7a9   : > { %2887 = vmatprep.subr.bf16.mxu0 %v3243_v4 }
 0x7ac   : > { %2888 = vmatpush3.bf16.msra.mxu0 %v3081_v40 }
 0x7ad   : > { %2889 = vmatprep.subr.bf16.mxu0 %v3243_v4 }
 0x7b0   : > { %2890 = vmatpush3.bf16.msra.mxu0 %v3082_v41 }
 0x7b1   : > { %2891 = vmatprep.subr.bf16.mxu0 %v3243_v4 }
 0x7b4   : > { %2892 = vmatpush3.bf16.msra.mxu0 %v3083_v42 }
 0x7b5   : > { %2893 = vmatprep.subr.bf16.mxu0 %v3243_v4 }
 0x7b8   : > { %2894 = vmatpush3.bf16.msra.mxu0 %v3084_v44 }
 0x7b9   : > { %2895 = vmatprep.subr.bf16.mxu0 %v3243_v4 }
 0x7bc   : > { %2896 = vmatpush3.bf16.msra.mxu0 %v3085_v45 }
 0x7bd   : > { %2897 = vmatprep.subr.bf16.mxu0 %v3243_v4 }
 0x7c0   : > { %2898 = vmatpush3.bf16.msra.mxu0 %v3086_v46 }
 0x7c1   : > { %2927 = vmatprep.subr.bf16.mxu0 %v3243_v4 }
 0x863   : > { %v1222_v47 = vpop.f32.mrf.mxu0 }
 0x864   : > { %v2610_v49 = vmul.f32 -1.442695, %v1222_v47 }
 0x865   : > { %v1224_v51 = vpop.f32.mrf.mxu0 }
 0x866   : > { %3151 = vpow2.f32 %v2610_v49 }
 0x867   : > { %v1226_v52 = vpop.f32.mrf.mxu0 }
 0x869   : > { %v1227_v53 = vpop.f32.mrf.mxu0 }
 0x873   : > { %v3152_v54 = vpop.eup %3151 }
 0x874   : > { %v1232_v55 = vadd.f32 1.0, %v3152_v54 }
 0x876   : > { %3153 = vrcp.f32 %v1232_v55 }
 0x883   : > { %v3154_v56 = vpop.eup %3153 }
 0x884   : > { %v1235_v58 = vmul.f32 %v3154_v56, %v1222_v47 }
 0x886   : > { %v1236_v59 = vmul.f32 %v1235_v58, %v1224_v51 }
 0x888   : > { %v1253_v61 = vpack.c.bf16 %v1236_v59, %v1236_v59 }
 0x88a   : > { %2900 = vmatmul.mubr.bf16.vlgmr.msra.gmra.mxu0 %v1253_v61 }
 0x88b   : > { %2929 = vmatprep.mubr.msk.bf16.mxu0 %vm3244_vm1, %v3243_v4 }
 0x94a   : > { %v1336_v62 = vpop.f32.mrf.mxu0 }
 0x94b   : > { %v3649_v63 = vadd.f32 %v1336_v62, %v3576_v13 }
 0x94c   : > { %v2901_v1 = vpop.f32.mrf.mxu0 }
 0x94d   : > { %v1345_v2 = vmul.f32 %v3649_v63, %v3649_v63 }
 0x94e   : > { %v1339_v3 = vpop.f32.mrf.mxu0 }
 0x94f   : > { %v1346_v5 = vsel %vm393_vm0, %v1345_v2, 0.0 }
 0x950   : > { %1347 = vadd.xlane.f32.xlu1 %v1346_v5  ;;  %v2902_v6 = vpop.f32.mrf.mxu0 }
 0x9d9   : > { %v1348_v11 = vpop.xlane.xlu1 %1347 }
 0x9da   : > { %v1349_v12 = vmul.f32 0.015625, %v1348_v11 }
 0x9dc   : > { %v1350_v13 = vadd.f32 1e-06, %v1349_v12 }
 0x9de   : > { %3155 = vrsqrt.f32 %v1350_v13 }
 0x9eb   : > { %v3156_v14 = vpop.eup %3155 }
 0x9ec   : > { %v1352_v17 = vmul.f32 %v3156_v14, %v3649_v63 }
 0x9ee   : > { %v1359_v18 = vmul.f32 %v2620_v15, %v1352_v17 }
 0x9f0   : > { %v1369_v19 = vpack.c.bf16 %v1359_v18, %v1359_v18 }
 0x9f2   : > { %2912 = vmatmul.mubr.msk.bf16.vlgmr.msra.gmra.mxu1 %vm393_vm0, %v1369_v19 }
 0x9f3   : > { %2917 = vmatprep.mubr.msk.bf16.mxu1 %vm3244_vm1, %v3243_v4 }
 0xab2   : > { %v3677_v20 = vpop.f32.mrf.mxu1 }
 0xab3   : > { %1443 = vrot.lane.b32.xlu1 %v3677_v20, %s3245_s15  ;;  %v1437_v22 = vsub.f32 0.0, %v3677_v20  ;;  %v1447_v49 = vmul.f32 %v3677_v20, %v3462_v43  ;;  %v1461_v55 = vmul.f32 %v3677_v20, %v3467_v48  ;;  %v1600_v58 = vmul.f32 %v3677_v20, %v3473_v50 }
 0xab4   : > { %v2913_v0 = vpop.f32.mrf.mxu1  ;;  %v1718_v1 = vmul.f32 %v3677_v20, %v3478_v57  ;;  %v1848_v50 = vmul.f32 %v3677_v20, %v3483_v60  ;;  %v1475_v11 = vmul.f32 %v3677_v20, %v3422_v21 }
 0xab5   : > { %1439 = vrot.lane.b32.xlu0 %v1437_v22, %s4032_s29 }
 0xab6   : > { %v1434_v24 = vpop.f32.mrf.mxu1 }
 0xab7   : > { %1457 = vrot.lane.b32.xlu1 %v3677_v20, %s4032_s29  ;;  %s4041_s29 = smov 8  }
 0xab8   : > { %v2914_v26 = vpop.f32.mrf.mxu1 }
 0xab9   : > { %1454 = vrot.lane.b32.xlu0 %v1437_v22, %s4033_s14  ;;  %s4042_s14 = smov 112  }
 0xabb   : > { %1596 = vrot.lane.b32.xlu1 %v3677_v20, %s4034_s24 }
 0xabd   : > { %1593 = vrot.lane.b32.xlu0 %v1437_v22, %s4035_s25 }
 0xabf   : > { %1714 = vrot.lane.b32.xlu1 %v3677_v20, %s4035_s25 }
 0xac1   : > { %1711 = vrot.lane.b32.xlu0 %v1437_v22, %s4036_s16 }
 0xac3   : > { %1844 = vrot.lane.b32.xlu1 %v3677_v20, %s4036_s16 }
 0xac5   : > { %1841 = vrot.lane.b32.xlu0 %v1437_v22, %s3245_s15  ;;  %s4039_s15 = smov 32  }
 0xb25   : > { %v1444_v28 = vpop.permute.xlu1 %1443 }
 0xb27   : > { %v1440_v29 = vpop.permute.xlu0 %1439 }
 0xb28   : > { %v1446_v30 = vsel %vm494_vm2, %v1440_v29, %v1444_v28 }
 0xb29   : > { %v1448_v16 = vmul.f32 %v1446_v30, %v3438_v23  ;;  %v1458_v31 = vpop.permute.xlu1 %1457 }
 0xb2b   : > { %1450 = vrot.lane.b32.xlu0 %v1448_v16, %s4037_s22  ;;  %v1455_v32 = vpop.permute.xlu0 %1454 }
 0xb2c   : > { %v1460_v33 = vsel %vm494_vm2, %v1455_v32, %v1458_v31 }
 0xb2d   : > { %v1462_v34 = vmul.f32 %v1460_v33, %v3438_v23  ;;  %v1597_v35 = vpop.permute.xlu1 %1596 }
 0xb2f   : > { %1464 = vrot.lane.b32.xlu1 %v1462_v34, %s4038_s30  ;;  %v1594_v36 = vpop.permute.xlu0 %1593 }
 0xb30   : > { %v1599_v37 = vsel %vm494_vm2, %v1594_v36, %v1597_v35 }
 0xb31   : > { %v1601_v38 = vmul.f32 %v1599_v37, %v3438_v23  ;;  %v1715_v39 = vpop.permute.xlu1 %1714 }
 0xb33   : > { %1603 = vrot.lane.b32.xlu0 %v1601_v38, %s3253_s13  ;;  %v1712_v40 = vpop.permute.xlu0 %1711 }
 0xb34   : > { %v1717_v41 = vsel %vm494_vm2, %v1712_v40, %v1715_v39 }
 0xb35   : > { %v1719_v42 = vmul.f32 %v1717_v41, %v3438_v23  ;;  %v1845_v44 = vpop.permute.xlu1 %1844 }
 0xb37   : > { %1721 = vrot.lane.b32.xlu1 %v1719_v42, %s4039_s15  ;;  %v1842_v45 = vpop.permute.xlu0 %1841 }
 0xb38   : > { %v1847_v46 = vsel %vm494_vm2, %v1842_v45, %v1845_v44 }
 0xb39   : > { %v1849_v47 = vmul.f32 %v1847_v46, %v3438_v23 }
 0xb3b   : > { %1851 = vrot.lane.b32.xlu0 %v1849_v47, %s4040_s12 }
 0xb3f   : > { %1468 = vrot.lane.b32.xlu0 %v1437_v22, %s4034_s24  ;;  %s4043_s24 = smov 96  }
 0xb9d   : > { %v1451_v51 = vpop.permute.xlu0 %1450 }
 0xb9e   : > { %v1453_v52 = vadd.f32 %v1451_v51, %v1447_v49 }
 0xba0   : > { %v1479_v53 = vpack.c.bf16 %v1453_v52, %v1453_v52 }
 0xba1   : > { %v1465_v54 = vpop.permute.xlu1 %1464 }
 0xba2   : > { %1481 = vrot.lane.b32.xlu1 %v1479_v53, %s4037_s22  ;;  %v1467_v56 = vadd.f32 %v1465_v54, %v1461_v55 }
 0xba4   : > { %v1726_v62 = vpack.c.bf16 %v1467_v56, %v1467_v56 }
 0xba5   : > { %v1604_v59 = vpop.permute.xlu0 %1603 }
 0xba6   : > { %v1606_v61 = vadd.f32 %v1604_v59, %v1600_v58  ;;  %1471 = vrot.lane.b32.xlu1 %v3677_v20, %s4041_s29 }
 0xba8   : > { %v1607_v43 = vpack.c.bf16 %v1606_v61, %v1606_v61 }
 0xba9   : > { %v1722_v2 = vpop.permute.xlu1 %1721 }
 0xbaa   : > { %v1724_v3 = vadd.f32 %v1722_v2, %v1718_v1  ;;  %1731 = vrot.lane.b32.xlu1 %v1726_v62, %s4040_s12  ;;  %1609 = vrot.lane.b32.xlu0 %v1607_v43, %s4042_s14 }
 0xbac   : > { %v1725_v48 = vpack.c.bf16 %v1724_v3, %v1724_v3 }
 0xbad   : > { %v1852_v5 = vpop.permute.xlu0 %1851 }
 0xbae   : > { %v1854_v6 = vadd.f32 %v1852_v5, %v1848_v50  ;;  %1728 = vrot.lane.b32.xlu0 %v1725_v48, %s4043_s24  ;;  %s375_s24 = sand.u32 1, %s3233_s18  }
 0xbaf   : > { %s2579_s25 = sshll.u32 %s375_s24, 4  ;;  %s2502_s29 = scalar_lea.sflag [#allocation3], %s375_s24 }
 0xbb0   : > { %v1855_v7 = vpack.c.bf16 %v1854_v6, %v1854_v6 }
 0xbb1   : > { %v1469_v9 = vpop.permute.xlu0 %1468 }
 0xbb2   : > { %1857 = vrot.lane.b32.xlu1 %v1855_v7, %s4038_s30 }
 0xc14   : > { %v1482_v8 = vpop.permute.xlu1 %1481 }
 0xc15   : > { %v1487_v57 = vsel %vm539_vm3, %v1482_v8, 0 }
 0xc16   : > { %2916 = vmatpush3.bf16.xpose.msra.mxu1 %v1487_v57  ;;  %2928 = vmatpush3.bf16.xpose.msra.mxu0 %v1487_v57 }
 0xc17   : > { %2939 = vmatprep.subr.bf16.mxu0 %v3243_v4  ;;  %2921 = vmatprep.subr.bf16.mxu1 %v3243_v4 }
 0xc18   : > { %v1472_v10 = vpop.permute.xlu1 %1471 }
 0xc19   : > { %v1474_v60 = vsel %vm494_vm2, %v1469_v9, %v1472_v10  ;;  %v1543_v9 = vpack.c.bf16 %v3677_v20, %v3677_v20 }
 0xc1a   : > { %v1476_v12 = vmul.f32 %v1474_v60, %v3438_v23 }
 0xc1c   : > { %v1477_v13 = vadd.f32 %v1476_v12, %v1475_v11  ;;  %v1732_v14 = vpop.permute.xlu1 %1731  ;;  %v1610_v15 = vpop.permute.xlu0 %1609 }
 0xc1d   : > { %v1737_v17 = vsel %vm539_vm3, %v1732_v14, 0  ;;  %2930 = vmatmul.mubr.msk.bf16.vlgmr.msra.gmra.mxu0 %vm539_vm3, %v1610_v15 }
 0xc1e   : > { %v1478_v18 = vpack.c.bf16 %v1477_v13, %v1477_v13  ;;  %2940 = vmatpush3.bf16.xpose.msra.mxu0 %v1737_v17  ;;  %2941 = vmatprep.mubr.msk.bf16.mxu0 %vm3244_vm1, %v3243_v4 }
 0xc1f   : > { %2951 = vmatprep.subr.bf16.mxu0 %v3243_v4 }
 0xc20   : > { %2918 = vmatmul.mubr.msk.bf16.vlgmr.msra.gmra.mxu1 %vm539_vm3, %v1478_v18  ;;  %v1729_v21 = vpop.permute.xlu0 %1728 }
 0xc21   : > { %2923 = vmatprep.mubr.msk.bf16.mxu1 %vm3244_vm1, %v3243_v4 }
 0xc24   : > { %v1858_v23 = vpop.permute.xlu1 %1857 }
 0xc25   : > { %2942 = vmatmul.mubr.msk.bf16.vlgmr.msra.gmra.mxu0 %vm539_vm3, %v1729_v21 }
 0xc26   : > { %2952 = vmatpush3.bf16.xpose.msra.mxu0 %v1737_v17  ;;  %2953 = vmatprep.mubr.msk.bf16.mxu0 %vm3244_vm1, %v3243_v4 }
 0xc27   : > { %2963 = vmatprep.subr.bf16.mxu0 %v3243_v4 }
 0xc2d   : > { %2954 = vmatmul.mubr.msk.bf16.vlgmr.msra.gmra.mxu0 %vm539_vm3, %v1858_v23 }
 0xc2e   : > { %2971 = vmatprep.mubr.msk.bf16.mxu0 %vm3244_vm1, %v3243_v4 }
 0xcdd   : > { %v1648_v19 = vpop.f32.mrf.mxu0 }
 0xcde   : > { %v1654_v22 = vmul.f32 0.25, %v1648_v19 }
 0xcdf   : > { %v2931_v0 = vpop.f32.mrf.mxu0 }
 0xce0   : > { %v1523_v24 = vpop.f32.mrf.mxu1  ;;  %v1655_v26 = vsel %vm3511_vm4, %v1654_v22, -1e+30 }
 0xce1   : > { %v1529_v28 = vmul.f32 0.25, %v1523_v24  ;;  %v1651_v29 = vpop.f32.mrf.mxu0  ;;  %v1656_v30 = vsel %vm494_vm2, %v1655_v26, -inf }
 0xce2   : > { %v2919_v16 = vpop.f32.mrf.mxu1  ;;  %1657 = vmax.xlane.f32.xlu1 %v1656_v30 }
 0xce3   : > { %v2932_v31 = vpop.f32.mrf.mxu0  ;;  %v1530_v32 = vsel %vm3511_vm4, %v1529_v28, -1e+30  ;;  %v3091_v16 = vld [vmem:[%s3999_s5 + $0x38] sm:$0xff]  }
 0xce4   : > { %v1526_v33 = vpop.f32.mrf.mxu1  ;;  %v1531_v34 = vsel %vm494_vm2, %v1530_v32, -inf  ;;  %2964 = vmatpush3.bf16.msra.mxu0 %v3091_v16 }
 0xce5   : > { %1532 = vmax.xlane.f32.xlu0 %v1531_v34  ;;  %v1773_v35 = vpop.f32.mrf.mxu0  ;;  %2965 = vmatprep.subr.bf16.mxu0 %v3243_v4  ;;  %v3092_v33 = vld [vmem:[%s3999_s5 + $0x30] sm:$0xff]  }
 0xce6   : > { %v1779_v36 = vmul.f32 0.25, %v1773_v35  ;;  %v2920_v37 = vpop.f32.mrf.mxu1  ;;  %v3093_v35 = vld [vmem:[%s3999_s5 + $0x28] sm:$0xff]  }
 0xce7   : > { %v2943_v38 = vpop.f32.mrf.mxu0 }
 0xce8   : > { %v1780_v39 = vsel %vm3511_vm4, %v1779_v36, -1e+30  ;;  %2966 = vmatpush3.bf16.msra.mxu0 %v3092_v33  ;;  %v3094_v38 = vld [vmem:[%s3999_s5 + $0x20] sm:$0xff]  }
 0xce9   : > { %v1776_v40 = vpop.f32.mrf.mxu0  ;;  %v1781_v41 = vsel %vm494_vm2, %v1780_v39, -inf  ;;  %2967 = vmatprep.subr.bf16.mxu0 %v3243_v4 }
 0xcea   : > { %1782 = vmax.xlane.f32.xlu0 %v1781_v41 }
 0xceb   : > { %v2944_v42 = vpop.f32.mrf.mxu0 }
 0xcec   : > { %2968 = vmatpush3.bf16.msra.mxu0 %v3093_v35 }
 0xced   : > { %v1896_v44 = vpop.f32.mrf.mxu0  ;;  %2969 = vmatprep.subr.bf16.mxu0 %v3243_v4 }
 0xcee   : > { %v1902_v45 = vmul.f32 0.25, %v1896_v44 }
 0xcef   : > { %v2955_v46 = vpop.f32.mrf.mxu0 }
 0xcf0   : > { %v1903_v47 = vsel %vm3511_vm4, %v1902_v45, -1e+30  ;;  %2970 = vmatpush3.bf16.msra.mxu0 %v3094_v38  ;;  %v3118_v38 = vld [vmem:[%s4004_s10 + $0x30] sm:$0xff]  }
 0xcf1   : > { %v1899_v49 = vpop.f32.mrf.mxu0  ;;  %v1904_v51 = vsel %vm494_vm2, %v1903_v47, -inf  ;;  %2975 = vmatprep.subr.bf16.mxu0 %v3243_v4 }
 0xcf2   : > { %1905 = vmax.xlane.f32.xlu0 %v1904_v51 }
 0xcf3   : > { %v2956_v52 = vpop.f32.mrf.mxu0 }
 0xd6b   : > { %v1658_v53 = vpop.xlane.xlu1 %1657 }
 0xd6c   : > { %v1659_v54 = vsub.f32 %v1655_v26, %v1658_v53 }
 0xd6e   : > { %v1660_v55 = vmul.f32 1.442695, %v1659_v54  ;;  %v1533_v56 = vpop.xlane.xlu0 %1532 }
 0xd6f   : > { %v1534_v58 = vsub.f32 %v1530_v32, %v1533_v56 }
 0xd70   : > { %3157 = vpow2.f32 %v1660_v55 }
 0xd71   : > { %v1535_v59 = vmul.f32 1.442695, %v1534_v58 }
 0xd73   : > { %3159 = vpow2.f32 %v1535_v59  ;;  %v1783_v61 = vpop.xlane.xlu0 %1782 }
 0xd74   : > { %v1784_v62 = vsub.f32 %v1780_v39, %v1783_v61 }
 0xd76   : > { %v1785_v43 = vmul.f32 1.442695, %v1784_v62 }
 0xd78   : > { %3161 = vpow2.f32 %v1785_v43 }
 0xd7b   : > { %v1906_v1 = vpop.xlane.xlu0 %1905 }
 0xd7c   : > { %v1907_v27 = vsub.f32 %v1903_v47, %v1906_v1 }
 0xd7d   : > { %v3158_v2 = vpop.eup %3157 }
 0xd7e   : > { %v1908_v3 = vmul.f32 1.442695, %v1907_v27  ;;  %v1662_v48 = vsel %vm494_vm2, %v3158_v2, 0.0 }
 0xd7f   : > { %1663 = vadd.xlane.f32.xlu0 %v1662_v48  ;;  %v3095_v48 = vld [vmem:[%s4001_s7 + $0x70] ss:$8 sps:$4 sm:$0xff]  }
 0xd80   : > { %v3160_v50 = vpop.eup %3159  ;;  %3163 = vpow2.f32 %v1908_v3 }
 0xd81   : > { %v1537_v5 = vsel %vm494_vm2, %v3160_v50, 0.0 }
 0xd82   : > { %1538 = vadd.xlane.f32.xlu1 %v1537_v5  ;;  %v3098_v5 = vld [vmem:[%s4001_s7 + $0x60] ss:$8 sps:$4 sm:$0xff]  }
 0xd85   : > { %v3162_v6 = vpop.eup %3161 }
 0xd86   : > { %v1787_v7 = vsel %vm494_vm2, %v3162_v6, 0.0 }
 0xd87   : > { %1788 = vadd.xlane.f32.xlu1 %v1787_v7  ;;  %v3101_v7 = vld [vmem:[%s4001_s7 + $0x50] ss:$8 sps:$4 sm:$0xff]  }
 0xd8d   : > { %v3164_v8 = vpop.eup %3163 }
 0xd8e   : > { %v1910_v57 = vsel %vm494_vm2, %v3164_v8, 0.0 }
 0xd8f   : > { %1911 = vadd.xlane.f32.xlu0 %v1910_v57  ;;  %v3104_v57 = vld [vmem:[%s4001_s7 + $0x40] ss:$8 sps:$4 sm:$0xff]  }
 0xd98   : > { %1545 = vrot.lane.b32.xlu1 %v1543_v9, %s4039_s15 }
 0xda5   : > { %1793 = vrot.lane.b32.xlu0 %v1543_v9, %s3253_s13 }
 0xe08   : > { %v1664_v60 = vpop.xlane.xlu0 %1663 }
 0xe0b   : > { %v1539_v10 = vpop.xlane.xlu1 %1538 }
 0xe0c   : > { %3165 = vrcp.f32 %v1539_v10 }
 0xe0d   : > { %3167 = vrcp.f32 %v1664_v60 }
 0xe10   : > { %v1789_v11 = vpop.xlane.xlu1 %1788 }
 0xe11   : > { %3169 = vrcp.f32 %v1789_v11 }
 0xe14   : > { %v1546_v12 = vpop.permute.xlu1 %1545 }
 0xe15   : > { %v1551_v13 = vsel %vm607_vm5, %v1546_v12, 0  ;;  %v2656_v12 = vld [vmem:[%s4000_s6 + $0x1] ss:$0 sm:$0xff] }
 0xe16   : > { %2922 = vmatpush3.bf16.msra.mxu1 %v1551_v13 }
 0xe17   : > { %2933 = vmatprep.subr.bf16.mxu1 %v3243_v4 }
 0xe18   : > { %v1912_v18 = vpop.xlane.xlu0 %1911 }
 0xe19   : > { %v3166_v14 = vpop.eup %3165  ;;  %3171 = vrcp.f32 %v1912_v18  ;;  %v3109_v18 = vld [vmem:[%s4002_s8 + $0x68] sm:$0xff]  }
 0xe1a   : > { %v1541_v15 = vmul.f32 %v3166_v14, %v3160_v50  ;;  %v3168_v20 = vpop.eup %3167  ;;  %v3097_v50 = vld [vmem:[%s4001_s7 + $0x74] ss:$8 sps:$4 sm:$0xff]  }
 0xe1b   : > { %v1666_v21 = vmul.f32 %v3168_v20, %v3158_v2  ;;  %v3108_v20 = vld [vmem:[%s4002_s8 + $0x70] sm:$0xff]  }
 0xe1c   : > { %v1542_v17 = vpack.c.bf16 %v1541_v15, %v1541_v15  ;;  %v1794_v23 = vpop.permute.xlu0 %1793 }
 0xe1d   : > { %v1667_v19 = vpack.c.bf16 %v1666_v21, %v1666_v21  ;;  %v1799_v0 = vsel %vm607_vm5, %v1794_v23, 0  ;;  %v3110_v21 = vld [vmem:[%s4002_s8 + $0x60] sm:$0xff]   ;;  %v3111_v23 = vld [vmem:[%s4002_s8 + $0x58] sm:$0xff]  }
 0xe1e   : > { %2924 = vmatmul.mubr.msk.bf16.vlgmr.msra.gmra.mxu1 %vm494_vm2, %v1542_v17  ;;  %v3170_v22 = vpop.eup %3169  ;;  %v3107_v17 = vld [vmem:[%s4002_s8 + $0x78] sm:$0xff]  }
 0xe1f   : > { %2934 = vmatpush3.bf16.msra.mxu1 %v1551_v13  ;;  %2935 = vmatprep.mubr.msk.bf16.mxu1 %vm3244_vm1, %v3243_v4  ;;  %v1791_v24 = vmul.f32 %v3170_v22, %v3162_v6  ;;  %v3103_v6 = vld [vmem:[%s4001_s7 + $0x54] ss:$8 sps:$4 sm:$0xff]   ;;  %v3113_v22 = vld [vmem:[%s4002_s8 + $0x48] sm:$0xff]  }
 0xe20   : > { %2945 = vmatprep.subr.bf16.mxu1 %v3243_v4 }
 0xe21   : > { %v1792_v26 = vpack.c.bf16 %v1791_v24, %v1791_v24 }
 0xe26   : > { %2936 = vmatmul.mubr.msk.bf16.vlgmr.msra.gmra.mxu1 %vm494_vm2, %v1667_v19  ;;  %v3172_v28 = vpop.eup %3171  ;;  %v3112_v19 = vld [vmem:[%s4002_s8 + $0x50] sm:$0xff]  }
 0xe27   : > { %2946 = vmatpush3.bf16.msra.mxu1 %v1799_v0  ;;  %2947 = vmatprep.mubr.msk.bf16.mxu1 %vm3244_vm1, %v3243_v4  ;;  %v1914_v29 = vmul.f32 %v3172_v28, %v3164_v8  ;;  %v3106_v8 = vld [vmem:[%s4001_s7 + $0x44] ss:$8 sps:$4 sm:$0xff]  }
 0xe28   : > { %2957 = vmatprep.subr.bf16.mxu1 %v3243_v4 }
 0xe29   : > { %v1915_v30 = vpack.c.bf16 %v1914_v29, %v1914_v29 }
 0xe2e   : > { %2948 = vmatmul.mubr.msk.bf16.vlgmr.msra.gmra.mxu1 %vm494_vm2, %v1792_v26 }
 0xe2f   : > { %2958 = vmatpush3.bf16.msra.mxu1 %v1799_v0  ;;  %2959 = vmatprep.mubr.msk.bf16.mxu1 %vm3244_vm1, %v3243_v4  ;;  %v3114_v0 = vld [vmem:[%s4002_s8 + $0x40] sm:$0xff]  }
 0xe30   : > { %2130 = vmatprep.subr.bf16.mxu1 %v3097_v50 }
 0xe36   : > { %2960 = vmatmul.mubr.msk.bf16.vlgmr.msra.gmra.mxu1 %vm494_vm2, %v1915_v30 }
 0xe37   : > { %2154 = vmatprep.mubr.bf16.mxu1 %v3259_v25  ;;  %2131 = vmatpush1.bf16.msra.mxu1 %v3095_v48  ;;  %v3130_v48 = vld [vmem:[%s4004_s10] sm:$0xff]  }
 0xe38   : > { %v2411_v50 = vsel %vm393_vm0, %v3130_v48, 0 }
 0xede   : > { %v1587_v31 = vpop.f32.mrf.mxu1 }
 0xee0   : > { %v2925_v32 = vpop.f32.mrf.mxu1 }
 0xee2   : > { %v1590_v34 = vpop.f32.mrf.mxu1 }
 0xee4   : > { %v2926_v25 = vpop.f32.mrf.mxu1 }
 0xee5   : > { %v3116_v25 = vld [vmem:[%s4004_s10 + $0x38] sm:$0xff]  }
 0xee6   : > { %v1705_v36 = vpop.f32.mrf.mxu1 }
 0xee7   : > { %1960 = vrot.lane.b32.xlu1 %v1705_v36, %s3253_s13  ;;  %v3117_v36 = vld [vmem:[%s4004_s10 + $0x70] sm:$0xff]   ;;  %s377_s13 = scalar_lea.vmem [#allocation2], %s2579_s25 }
 0xee8   : > { %v2937_v37 = vpop.f32.mrf.mxu1 }
 0xee9   : > { %v2432_v37 = vsel %vm393_vm0, %v3116_v25, 0 }
 0xeea   : > { %v1708_v39 = vpop.f32.mrf.mxu1 }
 0xeeb   : > { %v2429_v39 = vsel %vm393_vm0, %v3118_v38, 0 }
 0xeec   : > { %v2938_v40 = vpop.f32.mrf.mxu1 }
 0xeed   : > { %v3119_v40 = vld [vmem:[%s4004_s10 + $0x68] sm:$0xff]  }
 0xeee   : > { %v1835_v41 = vpop.f32.mrf.mxu1 }
 0xeef   : > { %1964 = vrot.lane.b32.xlu1 %v1835_v41, %s4039_s15  ;;  %v3120_v41 = vld [vmem:[%s4004_s10 + $0x28] sm:$0xff]   ;;  %s2516_s15 = sshll.u32 %s377_s13, 4  ;;  %s3950_s15 = int_to_ptr.vmem [resolvable:$true] %s2516_s15 }
 0xef0   : > { %v2949_v42 = vpop.f32.mrf.mxu1  ;;  %s3181_s14 = scalar_lea.vmem %s3950_s15, 256 }
 0xef1   : > { %v2426_v42 = vsel %vm393_vm0, %v3120_v41, 0  ;;  %p3182_p11 = scmp.ne.s32.totalorder %s3950_s15, %s3181_s14 }
 0xef2   : > { %v1838_v44 = vpop.f32.mrf.mxu1 }
 0xef3   : > { %v3121_v44 = vld [vmem:[%s4004_s10 + $0x60] sm:$0xff]   ;;  %p3183_p12 = pnand %p3182_p11, %p3359_p5 }
 0xef4   : > { %v2950_v45 = vpop.f32.mrf.mxu1 }
 0xef5   : > { %v3122_v45 = vld [vmem:[%s4004_s10 + $0x20] sm:$0xff]   ;;  %p3184_p13 = pneg %p3183_p12 }
 0xef6   : > { %v1953_v46 = vpop.f32.mrf.mxu1 }
 0xef7   : > { %1968 = vrot.lane.b32.xlu0 %v1953_v46, %s4040_s12  ;;  %v2423_v46 = vsel %vm393_vm0, %v3122_v45, 0  ;;  %s2722_s12 = sshll.u32 %s3342_s21, 8  ;;  %s3260_s21 = smov [#allocation2]  }
 0xef8   : > { %v2961_v47 = vpop.f32.mrf.mxu1  ;;  %s3955_s30 = scalar_lea.hbm %s4005_s11, %s2722_s12  ;;  %s3185_s25 = sshll.u32 %s3260_s21, 4  ;;  %s3186_s25 = int_to_ptr.vmem [resolvable:$false] %s3185_s25 }
 0xef9   : > { %v3123_v47 = vld [vmem:[%s4004_s10 + $0x58] sm:$0xff]   ;;  %s3187_s0 = scalar_lea.vmem %s3186_s25, 512  ;;  %p3188_p0 = scmp.lt.s32.totalorder %s3950_s15, %s3186_s25 }
 0xefa   : > { %v1956_v49 = vpop.f32.mrf.mxu1  ;;  %p3189_p1 = scmp.lt.s32.totalorder %s3187_s0, %s3181_s14 }
 0xefb   : > { %v3124_v49 = vld [vmem:[%s4004_s10 + $0x18] sm:$0xff]  }
 0xefc   : > { %v2962_v51 = vpop.f32.mrf.mxu1  ;;  %p3190_p2 = por %p3189_p1, %p3188_p0 }
 0xefd   : > { %v2420_v51 = vsel %vm393_vm0, %v3124_v49, 0 }
 0xefe   : > { %p3191_p3 = pnand %p3190_p2, %p3184_p13 }
 0xf59   : > { %v1961_v52 = vpop.permute.xlu1 %1960 }
 0xf5a   : > { %v1971_v54 = vsel %vm539_vm3, %v1587_v31, %v1961_v52 }
 0xf61   : > { %v1965_v53 = vpop.permute.xlu1 %1964 }
 0xf62   : > { %v1972_v55 = vsel %vm1039_vm6, %v1971_v54, %v1965_v53 }
 0xf69   : > { %v1969_v56 = vpop.permute.xlu0 %1968 }
 0xf6a   : > { %v1973_v58 = vsel %vm1041_vm7, %v1972_v55, %v1969_v56 }
 0xf6b   : > { %v1983_v59 = vpack.c.bf16 %v1973_v58, %v1973_v58 }
 0xf6d   : > { %2972 = vmatmul.mubr.msk.bf16.vlgmr.msra.gmra.mxu0 %vm393_vm0, %v1983_v59 }
 0xf6e   : > { %2991 = vmatprep.mubr.msk.bf16.mxu0 %vm3244_vm1, %v3243_v4  ;;  %2976 = vmatpush3.bf16.msra.mxu0 %v3107_v17 }
 0xf6f   : > { %2977 = vmatprep.subr.bf16.mxu0 %v3243_v4 }
 0xf72   : > { %2978 = vmatpush3.bf16.msra.mxu0 %v3108_v20 }
 0xf73   : > { %2979 = vmatprep.subr.bf16.mxu0 %v3243_v4 }
 0xf76   : > { %2980 = vmatpush3.bf16.msra.mxu0 %v3109_v18 }
 0xf77   : > { %2981 = vmatprep.subr.bf16.mxu0 %v3243_v4 }
 0xf7a   : > { %2982 = vmatpush3.bf16.msra.mxu0 %v3110_v21 }
 0xf7b   : > { %2983 = vmatprep.subr.bf16.mxu0 %v3243_v4 }
 0xf7e   : > { %2984 = vmatpush3.bf16.msra.mxu0 %v3111_v23 }
 0xf7f   : > { %2985 = vmatprep.subr.bf16.mxu0 %v3243_v4 }
 0xf82   : > { %2986 = vmatpush3.bf16.msra.mxu0 %v3112_v19 }
 0xf83   : > { %2987 = vmatprep.subr.bf16.mxu0 %v3243_v4 }
 0xf86   : > { %2988 = vmatpush3.bf16.msra.mxu0 %v3113_v22 }
 0xf87   : > { %2989 = vmatprep.subr.bf16.mxu0 %v3243_v4  ;;  %v3115_v4 = vld [vmem:[%s4004_s10 + $0x78] sm:$0xff]  }
 0xf8a   : > { %2990 = vmatpush3.bf16.msra.mxu0 %v3114_v0 }
0x102d   : > { %v2045_v61 = vpop.f32.mrf.mxu0 }
0x102e   : > { %v3812_v62 = vadd.f32 %v2045_v61, %v3649_v63  ;;  %v3100_v63 = vld [vmem:[%s4001_s7 + $0x64] ss:$8 sps:$4 sm:$0xff]   ;;  %v3125_v61 = vld [vmem:[%s4004_s10 + $0x50] sm:$0xff]  }
0x102f   : > { %v2973_v43 = vpop.f32.mrf.mxu0  ;;  %2132 = vmatprep.subr.bf16.mxu1 %v3100_v63 }
0x1030   : > { %v2054_v1 = vmul.f32 %v3812_v62, %v3812_v62  ;;  %2133 = vmatpush1.bf16.msra.mxu1 %v3098_v5  ;;  %v3126_v43 = vld [vmem:[%s4004_s10 + $0x10] sm:$0xff]  }
0x1031   : > { %v2048_v27 = vpop.f32.mrf.mxu0  ;;  %2134 = vmatprep.subr.bf16.mxu1 %v3103_v6 }
0x1032   : > { %v2055_v2 = vsel %vm393_vm0, %v2054_v1, 0.0  ;;  %v2417_v1 = vsel %vm393_vm0, %v3126_v43, 0  ;;  %v3128_v27 = vld [vmem:[%s4004_s10 + $0x8] sm:$0xff]  }
0x1033   : > { %2056 = vadd.xlane.f32.xlu1 %v2055_v2  ;;  %v2974_v3 = vpop.f32.mrf.mxu0  ;;  %v2414_v2 = vsel %vm393_vm0, %v3128_v27, 0 }
0x1034   : > { %2135 = vmatpush1.bf16.msra.mxu1 %v3101_v7  ;;  %v3129_v3 = vld [vmem:[%s4004_s10 + $0x40] sm:$0xff]  }
0x1035   : > { %2136 = vmatprep.subr.bf16.mxu1 %v3106_v8  ;;  %v2699_v8 = vld [vmem:[%s4003_s9] ss:$0 sm:$0xff] }
0x1038   : > { %2137 = vmatpush1.bf16.msra.mxu1 %v3104_v57 }
0x1039   : > { %2995 = vmatprep.subr.msk.bf16.mxu1 %vm393_vm0, %v3115_v4 }
0x10bc   : > { %v2057_v9 = vpop.xlane.xlu1 %2056 }
0x10bd   : > { %v2058_v10 = vmul.f32 0.015625, %v2057_v9 }
0x10bf   : > { %v2059_v60 = vadd.f32 1e-06, %v2058_v10 }
0x10c1   : > { %3173 = vrsqrt.f32 %v2059_v60 }
0x10ce   : > { %v3174_v11 = vpop.eup %3173 }
0x10cf   : > { %v2061_v13 = vmul.f32 %v3174_v11, %v3812_v62 }
0x10d1   : > { %v2068_v14 = vmul.f32 %v2656_v12, %v2061_v13 }
0x10d3   : > { %v2078_v15 = vpack.c.bf16 %v2068_v14, %v2068_v14 }
0x10d5   : > { %2673 = vmatmul.mubr.msk.bf16.vlgmr.msra.gmra.mxu1 %vm393_vm0, %v2078_v15 }
0x10d6   : > { %2794 = vmatpush3.bf16.xpose.msra.mxu1 %v2432_v37 }
0x10d7   : > { %2996 = vmatprep.subr.msk.bf16.mxu1 %vm393_vm0, %v3117_v36 }
0x10de   : > { %2796 = vmatpush3.bf16.xpose.msra.mxu1 %v2429_v39 }
0x10df   : > { %2997 = vmatprep.subr.msk.bf16.mxu1 %vm393_vm0, %v3119_v40 }
0x10e6   : > { %2798 = vmatpush3.bf16.xpose.msra.mxu1 %v2426_v42 }
0x10e7   : > { %2998 = vmatprep.subr.msk.bf16.mxu1 %vm393_vm0, %v3121_v44 }
0x10ee   : > { %2800 = vmatpush3.bf16.xpose.msra.mxu1 %v2423_v46 }
0x10ef   : > { %2999 = vmatprep.subr.msk.bf16.mxu1 %vm393_vm0, %v3123_v47 }
0x10f6   : > { %2802 = vmatpush3.bf16.xpose.msra.mxu1 %v2420_v51 }
0x10f7   : > { %3000 = vmatprep.subr.msk.bf16.mxu1 %vm393_vm0, %v3125_v61 }
0x10fe   : > { %2804 = vmatpush3.bf16.xpose.msra.mxu1 %v2417_v1 }
0x1195   : > { %v2156_v24 = vpop.f32.mrf.mxu1 }
0x1196   : > { %v2674_v26 = vmul.f32 -1.442695, %v2156_v24 }
0x1197   : > { %v2158_v28 = vpop.f32.mrf.mxu1 }
0x1198   : > { %3175 = vpow2.f32 %v2674_v26 }
0x1199   : > { %v2160_v29 = vpop.f32.mrf.mxu1 }
0x119b   : > { %v2161_v30 = vpop.f32.mrf.mxu1 }
0x11a5   : > { %v3176_v16 = vpop.eup %3175 }
0x11a6   : > { %v2166_v31 = vadd.f32 1.0, %v3176_v16 }
0x11a8   : > { %3177 = vrcp.f32 %v2166_v31 }
0x11b5   : > { %v3178_v32 = vpop.eup %3177 }
0x11b6   : > { %v2169_v33 = vmul.f32 %v3178_v32, %v2156_v24 }
0x11b8   : > { %v2170_v34 = vmul.f32 %v2169_v33, %v2158_v28 }
0x11ba   : > { %v2188_v35 = vpack.c.bf16 %v2170_v34, %v2170_v34 }
0x11bc   : > { %2992 = vmatmul.mubr.bf16.vlgmr.msra.gmra.mxu0 %v2188_v35 }
0x127c   : > { %v2271_v52 = vpop.f32.mrf.mxu0 }
0x127d   : > { %v2277_v53 = vadd.f32 %v2271_v52, %v3812_v62  ;;  %v3127_v62 = vld [vmem:[%s4004_s10 + $0x48] sm:$0xff]  }
0x127e   : > { %v2993_v54 = vpop.f32.mrf.mxu0  ;;  %3001 = vmatprep.subr.msk.bf16.mxu1 %vm393_vm0, %v3127_v62 }
0x127f   : > { %v2279_v55 = vmul.f32 %v2277_v53, %v2277_v53  ;;  %2806 = vmatpush3.bf16.xpose.msra.mxu1 %v2414_v2 }
0x1280   : > { %v2274_v56 = vpop.f32.mrf.mxu0  ;;  %3002 = vmatprep.subr.msk.bf16.mxu1 %vm393_vm0, %v3129_v3 }
0x1281   : > { %v2280_v58 = vsel %vm393_vm0, %v2279_v55, 0.0 }
0x1282   : > { %2281 = vadd.xlane.f32.xlu0 %v2280_v58  ;;  %v2994_v59 = vpop.f32.mrf.mxu0 }
0x1287   : > { %2808 = vmatpush3.bf16.xpose.msra.mxu1 %v2411_v50 }
0x130b   : > { %v2282_v63 = vpop.xlane.xlu0 %2281 }
0x130c   : > { %v2283_v5 = vmul.f32 0.015625, %v2282_v63 }
0x130e   : > { %v2284_v6 = vadd.f32 1e-06, %v2283_v5 }
0x1310   : > { %3179 = vrsqrt.f32 %v2284_v6 }
0x131d   : > { %v3180_v7 = vpop.eup %3179 }
0x131e   : > { %v2286_v57 = vmul.f32 %v3180_v7, %v2277_v53 }
0x1320   : > { %v2293_v9 = vmul.f32 %v2699_v8, %v2286_v57 }
0x1322   : > { %v2326_v10 = vpack.c.bf16 %v2293_v9, %v2293_v9 }
0x1324   : > { %2809 = vmatprep.mubr.msk.bf16.mxu1 %vm393_vm0, %v2326_v10 }
0x1325   : > { %2810 = vmatmul.mubr.msk.bf16.vlgmr.msra.gmra.mxu1 %vm393_vm0, %v2326_v10 }
0x13e5   : > { %v2492_v60 = vpop.f32.mrf.mxu1 }
0x13e6   : > { %2499 = vst [vmem:[%s377_s13] sm:$0xff] %v2492_v60 }
0x13e7   : > { %v2494_v11 = vpop.f32.mrf.mxu1 }
0x13e8   : > { %2500 = vst [vmem:[%s377_s13 + $0x8] sm:$0xff] %v2494_v11 }
0x13e9   : > { %v2496_v12 = vpop.f32.mrf.mxu1 }
0x13ea   : > { %3194 = shalt.err (!%p3191_p3)
}
0x13eb   : > { %s3195_s13 = scalar_lea.hbm %s3955_s30, 256  ;;  %s3199_s16 = scalar_lea.hbm %s4005_s11, 512 }
0x13ec   : > { %p3196_p4 = scmp.ne.s32.totalorder %s3955_s30, %s3195_s13  ;;  %p3200_p9 = scmp.lt.s32.totalorder %s3955_s30, %s4005_s11 }
0x13ed   : > { %p3201_p10 = scmp.lt.s32.totalorder %s3199_s16, %s3195_s13 }
0x13ee   : > { %p3197_p7 = pnand %p3196_p4, %p3359_p5 }
0x13ef   : > { %p3202_p11 = por %p3201_p10, %p3200_p9 }
0x13f0   : > { %p3198_p8 = pneg %p3197_p7 }
0x13f2   : > { %p3203_p12 = pnand %p3202_p11, %p3198_p8 }
0x13f4   : > { %3206 = shalt.err (!%p3203_p12)
}
0x13f5   : > { %3003 = dma.vmem_to_hbm [thread:$0]  (%p3359_p5), %s3950_s15, 256, %s3955_s30, %s2502_s29   ;;  %v2497_v13 = vpop.f32.mrf.mxu1 }
0x13f6 PF: > { %p3009_p13 = scmp.ge.s32.totalorder %s3241_s20, 2  ;;  %s2528_s0 = sand.u32 1, %s3229_s17  }
0x13f7   : > { %s2529_s14 = scalar_lea.sflag [#allocation3], %s2528_s0 }
0x13f8   : > { %p3006_p0 = pnand %p3009_p13, %p3363_p6 }
0x13fa   : > { %p3007_p1 = pneg %p3006_p0 }
0x13fc   : > { %3224 = dma.done.wait (%p3007_p1), %s2529_s14, 256  }
0x13fd   : > { %3226 = vsyncadd (%p3007_p1), %s2529_s14, 4294967040  ;;  %p21_p2 = scmp.ge.s32.totalorder %s3346_s23, 4   ;;  %s4044_s17 = smov %s3233_s18 }
0x13fe   : > { %s4045_s18 = smov %s3237_s19  ;;  %s4046_s19 = smov %s3357_s26 }
0x13ff   : > { %s4047_s20 = smov %s3346_s23  ;;  %23 = sbr.rel (!%p21_p2) target bundleno = 5 (0x5), region = 105 }
0x1404   :  { %2534 = vsyncpa [#allocation3], 1 }
0x1405   :  { %2536 = vsyncpa [#allocation3 + $0x1], 1 }

</bundles_post_ra>
